<compile_context>
chip_gen: v7x
topology: tpu7x:2x2x1
jax: 0.10.0
libtpu: 0.0.40
codegen_flags: <defaults>
</compile_context>

<pallas_src>
import functools

import jax
import jax.numpy as jnp
from jax import lax
from jax.experimental import pallas as pl
from jax.experimental.pallas import tpu as pltpu

BN_EPS = 1e-3


def conv_bn_kernel(x_ref, w_ref, gb_ref, o_ref, *, real_p, inv_p):
    """One grid step = one lane-dense tile of output channels.

    x_ref:  (P_pad, Cin)  bf16, rows >= real_p are exactly zero
    w_ref:  (Cin,  tc)    bf16 weight tile (contiguous slab of pre-tiled W^T)
    gb_ref: (2,    tc)    f32, row 0 = gamma, row 1 = beta
    o_ref:  (P_pad, tc)   f32 output tile
    """
    y = jnp.dot(x_ref[...], w_ref[...], preferred_element_type=jnp.float32)

    # Batch statistics over the real_p real pixels (padded rows masked out).
    mean = jnp.sum(y, axis=0, keepdims=True) * inv_p            # (1, tc)
    row_mask = lax.broadcasted_iota(jnp.int32, (y.shape[0], 1), 0) < real_p
    diff = jnp.where(row_mask, y - mean, 0.0)
    var = jnp.sum(diff * diff, axis=0, keepdims=True) * inv_p   # biased (training)

    gamma = gb_ref[0:1, :]
    beta = gb_ref[1:2, :]
    scale = lax.rsqrt(var + BN_EPS) * gamma
    shift = beta - mean * scale
    o_ref[...] = (y * scale + shift).astype(o_ref.dtype)


def prepare_params(weight, gamma, beta, *, tc=320):
    """One-time (init-time) parameter conversion — NOT in the per-call path.

    weight: (Cout, Cin) f32  ->  (T, Cin, tc) bf16, each tile contiguous in HBM
    gamma/beta: (Cout,) f32  ->  (T, 2, tc) f32 packed
    """
    Cout, Cin = weight.shape
    assert Cout % tc == 0 and Cin % 128 == 0
    T = Cout // tc
    w_t = jnp.transpose(weight, (1, 0)).astype(jnp.bfloat16)        # (Cin, Cout)
    w_tiles = jnp.transpose(w_t.reshape(Cin, T, tc), (1, 0, 2))     # (T, Cin, tc)
    gb = jnp.stack([gamma, beta], axis=0).astype(jnp.float32)       # (2, Cout)
    gb_tiles = jnp.transpose(gb.reshape(2, T, tc), (1, 0, 2))       # (T, 2, tc)
    return w_tiles, gb_tiles


def conv1x1_batchnorm(x_nchw, w_tiles, gb_tiles):
    """x_nchw: (N, Cin, H, W); w_tiles: (T, Cin, tc); gb_tiles: (T, 2, tc)."""
    N, Cin, H, W = x_nchw.shape
    T, _, tc = w_tiles.shape
    Cout = T * tc
    P = N * H * W
    P_pad = ((P + 15) // 16) * 16          # bf16 sublane-friendly padding (49 -> 64)

    # Per-call glue: lane-dense bf16 activations, zero-padded pixel rows.
    x_t = jnp.transpose(x_nchw, (0, 2, 3, 1)).reshape(P, Cin)
    x_t = jnp.pad(x_t, ((0, P_pad - P), (0, 0))).astype(jnp.bfloat16)

    kernel = functools.partial(conv_bn_kernel, real_p=P, inv_p=1.0 / P)

    y_tiles = pl.pallas_call(
        kernel,
        out_shape=jax.ShapeDtypeStruct((T, P_pad, tc), jnp.float32),
        grid_spec=pltpu.PrefetchScalarGridSpec(
            num_scalar_prefetch=0,
            grid=(T,),                                           # 2 Cout tiles
            in_specs=[
                pl.BlockSpec((P_pad, Cin), lambda c: (0, 0)),    # X^T, grid-invariant
                pl.BlockSpec((None, Cin, tc), lambda c: (c, 0, 0)),  # contiguous weight tile
                pl.BlockSpec((None, 2, tc), lambda c: (c, 0, 0)),    # packed gamma/beta
            ],
            out_specs=pl.BlockSpec((None, P_pad, tc), lambda c: (c, 0, 0)),
        ),
        compiler_params=pltpu.CompilerParams(
            dimension_semantics=("parallel",),   # v7x: one tile per TensorCore
        ),
    )(x_t, w_tiles, gb_tiles)

    # Glue: (T, P_pad, tc) -> (P, Cout) -> NCHW. Tiny (~160 KB), negligible.
    y_t = jnp.transpose(y_tiles, (1, 0, 2)).reshape(P_pad, Cout)
    y = y_t[:P].reshape(N, H, W, Cout).astype(x_nchw.dtype)
    return jnp.transpose(y, (0, 3, 1, 2))


def reference(x_nchw, weight, gamma, beta):
    """Pure-JAX f32 reference: 1x1 conv + training-mode batch norm."""
    N, Cin, H, W = x_nchw.shape
    Cout = weight.shape[0]
    x_mat = jnp.transpose(x_nchw, (1, 0, 2, 3)).reshape(Cin, -1)
    y = weight @ x_mat                                    # (Cout, N*H*W)
    mean = jnp.mean(y, axis=1, keepdims=True)
    var = jnp.mean((y - mean) ** 2, axis=1, keepdims=True)
    y = (y - mean) * lax.rsqrt(var + BN_EPS) * gamma[:, None] + beta[:, None]
    return jnp.transpose(y.reshape(Cout, N, H, W), (1, 0, 2, 3))


if __name__ == "__main__":
    # Shapes implied by the module: Conv2d(3840, 640, 1x1), input (1, 3840, 7, 7).
    N, Cin, H, W = 1, 3840, 7, 7
    Cout = 640

    key = jax.random.PRNGKey(0)
    kx, kw = jax.random.split(key)
    x = jax.random.normal(kx, (N, Cin, H, W), dtype=jnp.float32)
    weight = jax.random.normal(kw, (Cout, Cin), dtype=jnp.float32) * (1.0 / Cin) ** 0.5
    gamma = jnp.ones((Cout,), dtype=jnp.float32)   # BatchNorm2d affine init
    beta = jnp.zeros((Cout,), dtype=jnp.float32)

    # One-time parameter prep (out of the per-call path).
    w_tiles, gb_tiles = prepare_params(weight, gamma, beta, tc=320)
    w_tiles = jax.block_until_ready(w_tiles)
    gb_tiles = jax.block_until_ready(gb_tiles)

    out = conv1x1_batchnorm(x, w_tiles, gb_tiles)
    out = jax.block_until_ready(out)

    ref = reference(x, weight, gamma, beta)
    assert out.shape == (N, Cout, H, W)
    # Kernel uses bf16 inputs with f32 accumulation; after BN normalization the
    # absolute error is ~1e-2 worst case, so compare with bf16 tolerance.
    assert jnp.allclose(out, ref, atol=2e-2, rtol=2e-2)

    print("KERNEL_OK")
</pallas_src>

<mosaic_0001>
module attributes {stable_mosaic.version = 11 : i64} {
  func.func @conv_bn_kernel(%arg0: i32, %arg1: memref<64x3840xbf16, #tpu.memory_space<vmem>>, %arg2: memref<1x3840x320xbf16, #tpu.memory_space<vmem>>, %arg3: memref<1x2x320xf32, #tpu.memory_space<vmem>>, %arg4: memref<1x64x320xf32, #tpu.memory_space<vmem>>) attributes {dimension_semantics = [#tpu.dimension_semantics<parallel>], iteration_bounds = array<i64: 2>, scalar_prefetch = 0 : i64, scratch_operands = 0 : i64, tpu.core_type = #tpu.core_type<tc>, window_params = [{pipeline_mode = #tpu.pipeline_mode<synchronous>, transform_indices = @transform_0, window_bounds = array<i64: 64, 3840>}, {transform_indices = @transform_1, window_bounds = array<i64: 1, 3840, 320>}, {transform_indices = @transform_2, window_bounds = array<i64: 1, 2, 320>}, {transform_indices = @transform_3, window_bounds = array<i64: 1, 64, 320>}]} {
    %c0 = arith.constant 0 : index
    %c0_0 = arith.constant 0 : index
    %0 = vector.load %arg1[%c0, %c0_0] : memref<64x3840xbf16, #tpu.memory_space<vmem>>, vector<64x3840xbf16>
    %c0_1 = arith.constant 0 : index
    %c0_2 = arith.constant 0 : index
    %c0_3 = arith.constant 0 : index
    %1 = vector.load %arg2[%c0_1, %c0_2, %c0_3] : memref<1x3840x320xbf16, #tpu.memory_space<vmem>>, vector<1x3840x320xbf16>
    %2 = vector.shape_cast %1 : vector<1x3840x320xbf16> to vector<3840x320xbf16>
    %cst = arith.constant dense<0.000000e+00> : vector<64x320xf32>
    %3 = tpu.matmul %0, %2, %cst {dimension_numbers = #tpu.dot_dimension_numbers<[1], [0], [0], [1], [0, 0, 1, 1], [], []>} : vector<64x3840xbf16>, vector<3840x320xbf16>, vector<64x320xf32> -> vector<64x320xf32>
    %cst_4 = arith.constant dense<0.000000e+00> : vector<320xf32>
    %4 = vector.multi_reduction <add>, %3, %cst_4 [0] : vector<64x320xf32> to vector<320xf32>
    %5 = vector.shape_cast %4 : vector<320xf32> to vector<1x320xf32>
    %cst_5 = arith.constant 0.0204081628 : f32
    %6 = vector.broadcast %cst_5 : f32 to vector<1x320xf32>
    %7 = arith.mulf %5, %6 : vector<1x320xf32>
    %8 = tpu.iota {dimensions = array<i32: 0>} : vector<64x1xi32>
    %c49_i32 = arith.constant 49 : i32
    %9 = vector.broadcast %c49_i32 : i32 to vector<64x1xi32>
    %10 = arith.cmpi slt, %8, %9 : vector<64x1xi32>
    %11 = vector.broadcast %7 : vector<1x320xf32> to vector<64x320xf32>
    %12 = arith.subf %3, %11 : vector<64x320xf32>
    %cst_6 = arith.constant 0.000000e+00 : f32
    %13 = vector.shape_cast %10 : vector<64x1xi1> to vector<64x1xi1>
    %14 = vector.broadcast %13 : vector<64x1xi1> to vector<64x320xi1>
    %15 = vector.broadcast %cst_6 : f32 to vector<64x320xf32>
    %16 = arith.select %14, %12, %15 : vector<64x320xi1>, vector<64x320xf32>
    %17 = arith.mulf %16, %16 : vector<64x320xf32>
    %cst_7 = arith.constant dense<0.000000e+00> : vector<320xf32>
    %18 = vector.multi_reduction <add>, %17, %cst_7 [0] : vector<64x320xf32> to vector<320xf32>
    %19 = vector.shape_cast %18 : vector<320xf32> to vector<1x320xf32>
    %cst_8 = arith.constant 0.0204081628 : f32
    %20 = vector.broadcast %cst_8 : f32 to vector<1x320xf32>
    %21 = arith.mulf %19, %20 : vector<1x320xf32>
    %c0_9 = arith.constant 0 : index
    %c0_10 = arith.constant 0 : index
    %c0_11 = arith.constant 0 : index
    %22 = vector.load %arg3[%c0_9, %c0_10, %c0_11] : memref<1x2x320xf32, #tpu.memory_space<vmem>>, vector<1x1x320xf32>
    %23 = vector.shape_cast %22 : vector<1x1x320xf32> to vector<1x320xf32>
    %c0_12 = arith.constant 0 : index
    %c1 = arith.constant 1 : index
    %c0_13 = arith.constant 0 : index
    %24 = vector.load %arg3[%c0_12, %c1, %c0_13] : memref<1x2x320xf32, #tpu.memory_space<vmem>>, vector<1x1x320xf32>
    %25 = vector.shape_cast %24 : vector<1x1x320xf32> to vector<1x320xf32>
    %cst_14 = arith.constant 1.000000e-03 : f32
    %26 = vector.broadcast %cst_14 : f32 to vector<1x320xf32>
    %27 = arith.addf %21, %26 : vector<1x320xf32>
    %28 = math.rsqrt %27 : vector<1x320xf32>
    %29 = arith.mulf %28, %23 : vector<1x320xf32>
    %30 = arith.mulf %7, %29 : vector<1x320xf32>
    %31 = arith.subf %25, %30 : vector<1x320xf32>
    %32 = vector.broadcast %29 : vector<1x320xf32> to vector<64x320xf32>
    %33 = arith.mulf %3, %32 : vector<64x320xf32>
    %34 = vector.broadcast %31 : vector<1x320xf32> to vector<64x320xf32>
    %35 = arith.addf %33, %34 : vector<64x320xf32>
    %c0_15 = arith.constant 0 : index
    %c0_16 = arith.constant 0 : index
    %c0_17 = arith.constant 0 : index
    %36 = vector.load %arg4[%c0_15, %c0_16, %c0_17] : memref<1x64x320xf32, #tpu.memory_space<vmem>>, vector<1x64x320xf32>
    %37 = vector.shape_cast %36 : vector<1x64x320xf32> to vector<64x320xf32>
    %38 = vector.shape_cast %35 : vector<64x320xf32> to vector<1x64x320xf32>
    tpu.vector_store %arg4[%c0_15, %c0_16, %c0_17], %38 {strides = array<i32>} : memref<1x64x320xf32, #tpu.memory_space<vmem>>, vector<1x64x320xf32>,
    return
  }
  func.func @transform_0(%arg0: i32) -> (i32, i32) {
    %c0_i32 = arith.constant 0 : i32
    %c0_i32_0 = arith.constant 0 : i32
    %c0_i32_1 = arith.constant 0 : i32
    return %c0_i32, %c0_i32_0 : i32, i32
  }
  func.func @transform_1(%arg0: i32) -> (i32, i32, i32) {
    %c0_i32 = arith.constant 0 : i32
    %c0_i32_0 = arith.constant 0 : i32
    %c0_i32_1 = arith.constant 0 : i32
    return %arg0, %c0_i32, %c0_i32_0 : i32, i32, i32
  }
  func.func @transform_2(%arg0: i32) -> (i32, i32, i32) {
    %c0_i32 = arith.constant 0 : i32
    %c0_i32_0 = arith.constant 0 : i32
    %c0_i32_1 = arith.constant 0 : i32
    return %arg0, %c0_i32, %c0_i32_0 : i32, i32, i32
  }
  func.func @transform_3(%arg0: i32) -> (i32, i32, i32) {
    %c0_i32 = arith.constant 0 : i32
    %c0_i32_0 = arith.constant 0 : i32
    %c0_i32_1 = arith.constant 0 : i32
    return %arg0, %c0_i32, %c0_i32_0 : i32, i32, i32
  }
}

</mosaic_0001>

<bundles_post_ra>
// kernel: tpu_custom_call.1
= control target key start
LH: loop header
LB: loop body
LE: loop exit
PB: predicated region body
PF: predicated region fallthrough
CT: control target
= control target key end

     0   :  { %8 = vsyncpa [#allocation3], 0  ;;  %s13325_s0 = inlined_call_operand.vmem [shape: bf16[64,3840], index: 0, kind: input, shape index: {}]   ;;  %s13326_s1 = inlined_call_operand.vmem [shape: bf16[2,3840,320], index: 1, kind: input, shape index: {}]   ;;  %s13327_s2 = inlined_call_operand.vmem [shape: f32[2,2,320], index: 2, kind: input, shape index: {}]   ;;  %s13328_s3 = inlined_call_operand.hbm [shape: f32[2,64,320], index: 3, kind: output, shape index: {}]  }
   0x1   :  { %10 = vsyncpa [#allocation3 + $0x1], 0  ;;  %s11300_s12 = smov 0   ;;  %s11302_s13 = smov 0  }
   0x2   :  { %s11304_s14 = smov 0   ;;  %s11306_s15 = smov 0  }
   0x3 LB: > { %s11321_s16 = sadd.s32 4294967295, %s11274_s15   ;;  %s8233_s17 = sadd.s32 4294967294, %s11274_s15   ;;  %s11274_s15 = sphi %s11306_s15, %s13334_s15   ;;  %s11270_s14 = sphi %s11304_s14, %s13333_s14   ;;  %s11266_s13 = sphi %s11302_s13, %s13332_s13   ;;  %s11262_s12 = sphi %s11300_s12, %s13331_s12  }
   0x4   : > { %s11325_s18 = sadd.s32 1, %s11274_s15   ;;  %s96_s19 = sadd.s32 1, %s11270_s14 }
   0x5   : > { %s93_s20 = ssub.s32 %s11274_s15, %s11325_s18  ;;  %p106_p0 = scmp.ne.s32.totalorder %s11270_s14, %s11266_s13 }
   0x6   : > { %p94_p1 = scmp.eq.s32.totalorder %s93_s20, 0  ;;  %p107_p2 = scmp.eq.s32.totalorder %s11321_s16, 1 }
   0x7   : > { %p112_p3 = scmp.ne.s32.totalorder %s11266_s13, %s11262_s12  ;;  %p113_p4 = scmp.eq.s32.totalorder %s8233_s17, 1 }
   0x8   : > { %s11336_s21 = scalar_select %p94_p1, %s11270_s14, %s96_s19  }
   0x9   : > { %p11338_p5 = por %p107_p2, %p106_p0  ;;  %p11342_p6 = por %p113_p4, %p112_p3 }
   0xa   : > { %p8236_p7 = scmp.ge.s32.totalorder %s11274_s15, 1  ;;  %p150_p8 = scmp.lt.s32.totalorder %s11274_s15, 3 }
   0xc   : > { %p151_p9 = pnand %p8236_p7, %p150_p8 }
   0xd   : > { %p179_p10 = scmp.lt.s32.totalorder (!%p151_p9), %s11321_s16, 1  ;;  %v10067_v0 = vld [vmem:[%s13325_s0 + $0x4] ss:$120 sps:$4 sm:$0xff] (!%p151_p9)   ;;  %vm7806_vm0 = vcmask (!%p151_p9), 523264   ;;  %s9926_s8 = smul.u32 (!%p151_p9), 3072, %s11321_s16 }
   0xe   : > { %154 = sbr.rel (%p151_p9) target bundleno = 1106 (0x452), region = 32  ;;  %v10073_v1 = vld [vmem:[%s13325_s0 + $0x24] ss:$120 sps:$4 sm:$0xff] (!%p151_p9)   ;;  %5742 = vmatprep.mubr.bf16.mxu1 (!%p151_p9), %v10067_v0  ;;  %s11277_s24 = smov (!%p151_p9), [#allocation2]  }
   0xf   : > { %6034 = vmatprep.mubr.bf16.mxu0 (!%p151_p9), %v10073_v1  ;;  %s13262_s19 = scalar_lea.hbm (!%p151_p9), %s13328_s3, %s9926_s8  ;;  %s11216_s25 = sshll.u32 (!%p151_p9), %s11277_s24, 4  ;;  %s11217_s25 = int_to_ptr.vmem [resolvable:$false] %s11216_s25 }
  0x10   : > { %s11218_s27 = scalar_lea.vmem (!%p151_p9), %s11217_s25, 6144 }
  0x15   : > { %s11353_s26 = scalar_select %p179_p10, %s11321_s16, 1 }
  0x17   : > { %s9924_s29 = smul.u32 5760, %s11353_s26 }
  0x19   : > { %s11362_s5 = scalar_lea.vmem %s13326_s1, %s9924_s29 }
  0x1a   : > { %v9969_v2 = vld [vmem:[%s11362_s5 + $0x4] ss:$12 sps:$4 sm:$0xff]   ;;  %v9973_v4 = vld [vmem:[%s11362_s5] ss:$12 sps:$4 sm:$0xff]   ;;  %v9975_v6 = vld [vmem:[%s11362_s5 + $0x1c] ss:$12 sps:$4 sm:$0xff]  }
  0x1b   : > { %v9971_v3 = vld [vmem:[%s11362_s5 + $0x604] ss:$12 sps:$4 sm:$0xff]   ;;  %5710 = vmatprep.subr.bf16.mxu1 %v9969_v2  ;;  %v9974_v5 = vld [vmem:[%s11362_s5 + $0x600] ss:$12 sps:$4 sm:$0xff]   ;;  %v9977_v7 = vld [vmem:[%s11362_s5 + $0x61c] ss:$12 sps:$4 sm:$0xff]  }
  0x1c   : > { %6002 = vmatprep.subr.bf16.mxu0 %v9971_v3  ;;  %5711 = vmatpush1.bf16.msra.mxu1 %v9973_v4  ;;  %v9979_v8 = vld [vmem:[%s11362_s5 + $0x18] ss:$12 sps:$4 sm:$0xff]   ;;  %v9981_v10 = vld [vmem:[%s11362_s5 + $0x34] ss:$12 sps:$4 sm:$0xff]   ;;  %v9985_v12 = vld [vmem:[%s11362_s5 + $0x30] ss:$12 sps:$4 sm:$0xff]  }
  0x1d   : > { %6003 = vmatpush1.bf16.msra.mxu0 %v9974_v5  ;;  %5712 = vmatprep.subr.bf16.mxu1 %v9975_v6  ;;  %v9980_v9 = vld [vmem:[%s11362_s5 + $0x618] ss:$12 sps:$4 sm:$0xff]   ;;  %v9983_v11 = vld [vmem:[%s11362_s5 + $0x634] ss:$12 sps:$4 sm:$0xff]   ;;  %v9986_v13 = vld [vmem:[%s11362_s5 + $0x630] ss:$12 sps:$4 sm:$0xff]  }
  0x1e   : > { %6004 = vmatprep.subr.bf16.mxu0 %v9977_v7  ;;  %v9987_v14 = vld [vmem:[%s11362_s5 + $0x4c] ss:$12 sps:$4 sm:$0xff]   ;;  %v9991_v16 = vld [vmem:[%s11362_s5 + $0x48] ss:$12 sps:$4 sm:$0xff]   ;;  %v9993_v18 = vld [vmem:[%s11362_s5 + $0x64] ss:$12 sps:$4 sm:$0xff]  }
  0x1f   : > { %v9989_v15 = vld [vmem:[%s11362_s5 + $0x64c] ss:$12 sps:$4 sm:$0xff]   ;;  %v9992_v17 = vld [vmem:[%s11362_s5 + $0x648] ss:$12 sps:$4 sm:$0xff]   ;;  %v9995_v19 = vld [vmem:[%s11362_s5 + $0x664] ss:$12 sps:$4 sm:$0xff]  }
  0x20   : > { %5713 = vmatpush1.bf16.msra.mxu1 %v9979_v8  ;;  %v9997_v20 = vld [vmem:[%s11362_s5 + $0x60] ss:$12 sps:$4 sm:$0xff]   ;;  %v9999_v22 = vld [vmem:[%s11362_s5 + $0x7c] ss:$12 sps:$4 sm:$0xff]   ;;  %v10003_v24 = vld [vmem:[%s11362_s5 + $0x78] ss:$12 sps:$4 sm:$0xff]  }
  0x21   : > { %6005 = vmatpush1.bf16.msra.mxu0 %v9980_v9  ;;  %5714 = vmatprep.subr.bf16.mxu1 %v9981_v10  ;;  %v9998_v21 = vld [vmem:[%s11362_s5 + $0x660] ss:$12 sps:$4 sm:$0xff]   ;;  %v10001_v23 = vld [vmem:[%s11362_s5 + $0x67c] ss:$12 sps:$4 sm:$0xff]   ;;  %v10004_v25 = vld [vmem:[%s11362_s5 + $0x678] ss:$12 sps:$4 sm:$0xff]  }
  0x22   : > { %6006 = vmatprep.subr.bf16.mxu0 %v9983_v11  ;;  %v10005_v26 = vld [vmem:[%s11362_s5 + $0x94] ss:$12 sps:$4 sm:$0xff]   ;;  %v10009_v28 = vld [vmem:[%s11362_s5 + $0x90] ss:$12 sps:$4 sm:$0xff]   ;;  %v10011_v30 = vld [vmem:[%s11362_s5 + $0xac] ss:$12 sps:$4 sm:$0xff]  }
  0x23   : > { %v10007_v27 = vld [vmem:[%s11362_s5 + $0x694] ss:$12 sps:$4 sm:$0xff]   ;;  %v10010_v29 = vld [vmem:[%s11362_s5 + $0x690] ss:$12 sps:$4 sm:$0xff]   ;;  %v10013_v31 = vld [vmem:[%s11362_s5 + $0x6ac] ss:$12 sps:$4 sm:$0xff]  }
  0x24   : > { %5715 = vmatpush1.bf16.msra.mxu1 %v9985_v12  ;;  %v10015_v32 = vld [vmem:[%s11362_s5 + $0xa8] ss:$12 sps:$4 sm:$0xff]   ;;  %v10017_v34 = vld [vmem:[%s11362_s5 + $0xc4] ss:$12 sps:$4 sm:$0xff]   ;;  %v10021_v36 = vld [vmem:[%s11362_s5 + $0xc0] ss:$12 sps:$4 sm:$0xff]  }
  0x25   : > { %6007 = vmatpush1.bf16.msra.mxu0 %v9986_v13  ;;  %5716 = vmatprep.subr.bf16.mxu1 %v9987_v14  ;;  %v10016_v33 = vld [vmem:[%s11362_s5 + $0x6a8] ss:$12 sps:$4 sm:$0xff]   ;;  %v10019_v35 = vld [vmem:[%s11362_s5 + $0x6c4] ss:$12 sps:$4 sm:$0xff]   ;;  %v10022_v37 = vld [vmem:[%s11362_s5 + $0x6c0] ss:$12 sps:$4 sm:$0xff]  }
  0x26   : > { %6008 = vmatprep.subr.bf16.mxu0 %v9989_v15  ;;  %v10023_v38 = vld [vmem:[%s11362_s5 + $0xdc] ss:$12 sps:$4 sm:$0xff]   ;;  %v10027_v40 = vld [vmem:[%s11362_s5 + $0xd8] ss:$12 sps:$4 sm:$0xff]   ;;  %v10029_v42 = vld [vmem:[%s11362_s5 + $0xf4] ss:$12 sps:$4 sm:$0xff]  }
  0x27   : > { %v10025_v39 = vld [vmem:[%s11362_s5 + $0x6dc] ss:$12 sps:$4 sm:$0xff]   ;;  %v10028_v41 = vld [vmem:[%s11362_s5 + $0x6d8] ss:$12 sps:$4 sm:$0xff]   ;;  %v10031_v43 = vld [vmem:[%s11362_s5 + $0x6f4] ss:$12 sps:$4 sm:$0xff]  }
  0x28   : > { %5717 = vmatpush1.bf16.msra.mxu1 %v9991_v16  ;;  %v10033_v44 = vld [vmem:[%s11362_s5 + $0xf0] ss:$12 sps:$4 sm:$0xff]   ;;  %v10035_v46 = vld [vmem:[%s11362_s5 + $0x10c] ss:$12 sps:$4 sm:$0xff]   ;;  %v10039_v48 = vld [vmem:[%s11362_s5 + $0x108] ss:$12 sps:$4 sm:$0xff]  }
  0x29   : > { %6009 = vmatpush1.bf16.msra.mxu0 %v9992_v17  ;;  %5718 = vmatprep.subr.bf16.mxu1 %v9993_v18  ;;  %v10034_v45 = vld [vmem:[%s11362_s5 + $0x6f0] ss:$12 sps:$4 sm:$0xff]   ;;  %v10037_v47 = vld [vmem:[%s11362_s5 + $0x70c] ss:$12 sps:$4 sm:$0xff]   ;;  %v10040_v49 = vld [vmem:[%s11362_s5 + $0x708] ss:$12 sps:$4 sm:$0xff]  }
  0x2a   : > { %6010 = vmatprep.subr.bf16.mxu0 %v9995_v19  ;;  %v10041_v50 = vld [vmem:[%s11362_s5 + $0x124] ss:$12 sps:$4 sm:$0xff]   ;;  %v10045_v52 = vld [vmem:[%s11362_s5 + $0x120] ss:$12 sps:$4 sm:$0xff]   ;;  %v10047_v54 = vld [vmem:[%s11362_s5 + $0x13c] ss:$12 sps:$4 sm:$0xff]  }
  0x2b   : > { %v10043_v51 = vld [vmem:[%s11362_s5 + $0x724] ss:$12 sps:$4 sm:$0xff]   ;;  %v10046_v53 = vld [vmem:[%s11362_s5 + $0x720] ss:$12 sps:$4 sm:$0xff]   ;;  %v10049_v55 = vld [vmem:[%s11362_s5 + $0x73c] ss:$12 sps:$4 sm:$0xff]  }
  0x2c   : > { %5719 = vmatpush1.bf16.msra.mxu1 %v9997_v20  ;;  %v10051_v56 = vld [vmem:[%s11362_s5 + $0x138] ss:$12 sps:$4 sm:$0xff]   ;;  %v10053_v58 = vld [vmem:[%s11362_s5 + $0x154] ss:$12 sps:$4 sm:$0xff]   ;;  %v10057_v60 = vld [vmem:[%s11362_s5 + $0x150] ss:$12 sps:$4 sm:$0xff]  }
  0x2d   : > { %6011 = vmatpush1.bf16.msra.mxu0 %v9998_v21  ;;  %5720 = vmatprep.subr.bf16.mxu1 %v9999_v22  ;;  %v10052_v57 = vld [vmem:[%s11362_s5 + $0x738] ss:$12 sps:$4 sm:$0xff]   ;;  %v10055_v59 = vld [vmem:[%s11362_s5 + $0x754] ss:$12 sps:$4 sm:$0xff]   ;;  %v10058_v61 = vld [vmem:[%s11362_s5 + $0x750] ss:$12 sps:$4 sm:$0xff]  }
  0x2e   : > { %6012 = vmatprep.subr.bf16.mxu0 %v10001_v23  ;;  %v10059_v62 = vld [vmem:[%s11362_s5 + $0x16c] ss:$12 sps:$4 sm:$0xff]   ;;  %v10063_v0 = vld [vmem:[%s11362_s5 + $0x168] ss:$12 sps:$4 sm:$0xff]   ;;  %v10070_v2 = vld [vmem:[%s11362_s5 + $0x184] ss:$12 sps:$4 sm:$0xff]  }
  0x2f   : > { %v10061_v63 = vld [vmem:[%s11362_s5 + $0x76c] ss:$12 sps:$4 sm:$0xff]   ;;  %v10064_v1 = vld [vmem:[%s11362_s5 + $0x768] ss:$12 sps:$4 sm:$0xff]   ;;  %v10076_v3 = vld [vmem:[%s11362_s5 + $0x784] ss:$12 sps:$4 sm:$0xff]  }
  0x30   : > { %5721 = vmatpush1.bf16.msra.mxu1 %v10003_v24  ;;  %v10065_v4 = vld [vmem:[%s13325_s0] ss:$120 sps:$4 sm:$0xff]   ;;  %v10079_v8 = vld [vmem:[%s11362_s5 + $0x19c] ss:$12 sps:$4 sm:$0xff]   ;;  %v10131_v10 = vld [vmem:[%s13325_s0 + $0xf4] ss:$120 sps:$4 sm:$0xff]  }
  0x31   : > { %6013 = vmatpush1.bf16.msra.mxu0 %v10004_v25  ;;  %5722 = vmatprep.subr.bf16.mxu1 %v10005_v26  ;;  %v10071_v5 = vld [vmem:[%s13325_s0 + $0x20] ss:$120 sps:$4 sm:$0xff]   ;;  %v10082_v9 = vld [vmem:[%s11362_s5 + $0x79c] ss:$12 sps:$4 sm:$0xff]   ;;  %v10136_v11 = vld [vmem:[%s13325_s0 + $0x114] ss:$120 sps:$4 sm:$0xff]  }
  0x32   : > { %6014 = vmatprep.subr.bf16.mxu0 %v10007_v27  ;;  %v10068_v6 = vld [vmem:[%s11362_s5 + $0x180] ss:$12 sps:$4 sm:$0xff]   ;;  %v10077_v12 = vld [vmem:[%s11362_s5 + $0x198] ss:$12 sps:$4 sm:$0xff]   ;;  %v10141_v16 = vld [vmem:[%s13325_s0 + $0xf0] ss:$120 sps:$4 sm:$0xff]  }
  0x33   : > { %v10074_v7 = vld [vmem:[%s11362_s5 + $0x780] ss:$12 sps:$4 sm:$0xff]   ;;  %v10080_v13 = vld [vmem:[%s11362_s5 + $0x798] ss:$12 sps:$4 sm:$0xff]   ;;  %v10142_v17 = vld [vmem:[%s13325_s0 + $0x110] ss:$120 sps:$4 sm:$0xff]  }
  0x34   : > { %5723 = vmatpush1.bf16.msra.mxu1 %v10009_v28  ;;  %v10085_v14 = vld [vmem:[%s11362_s5 + $0x1b4] ss:$12 sps:$4 sm:$0xff]   ;;  %v10083_v18 = vld [vmem:[%s11362_s5 + $0x1b0] ss:$12 sps:$4 sm:$0xff]   ;;  %v10091_v20 = vld [vmem:[%s11362_s5 + $0x1cc] ss:$12 sps:$4 sm:$0xff]  }
  0x35   : > { %6015 = vmatpush1.bf16.msra.mxu0 %v10010_v29  ;;  %5724 = vmatprep.subr.bf16.mxu1 %v10011_v30  ;;  %v10088_v15 = vld [vmem:[%s11362_s5 + $0x7b4] ss:$12 sps:$4 sm:$0xff]   ;;  %v10086_v19 = vld [vmem:[%s11362_s5 + $0x7b0] ss:$12 sps:$4 sm:$0xff]   ;;  %v10094_v21 = vld [vmem:[%s11362_s5 + $0x7cc] ss:$12 sps:$4 sm:$0xff]  }
  0x36   : > { %6016 = vmatprep.subr.bf16.mxu0 %v10013_v31  ;;  %v10149_v22 = vld [vmem:[%s13325_s0 + $0x1e4] ss:$120 sps:$4 sm:$0xff]   ;;  %v10089_v23 = vld [vmem:[%s11362_s5 + $0x1c8] ss:$12 sps:$4 sm:$0xff]   ;;  %v10095_v28 = vld [vmem:[%s11362_s5 + $0x1e0] ss:$12 sps:$4 sm:$0xff]  }
  0x37   : > { %v10092_v24 = vld [vmem:[%s11362_s5 + $0x7c8] ss:$12 sps:$4 sm:$0xff]   ;;  %v10154_v25 = vld [vmem:[%s13325_s0 + $0x204] ss:$120 sps:$4 sm:$0xff]   ;;  %v10159_v29 = vld [vmem:[%s13325_s0 + $0x1e0] ss:$120 sps:$4 sm:$0xff]  }
  0x38   : > { %5725 = vmatpush1.bf16.msra.mxu1 %v10015_v32  ;;  %v10097_v26 = vld [vmem:[%s11362_s5 + $0x1e4] ss:$12 sps:$4 sm:$0xff]   ;;  %v10160_v30 = vld [vmem:[%s13325_s0 + $0x200] ss:$120 sps:$4 sm:$0xff]   ;;  %v10103_v32 = vld [vmem:[%s11362_s5 + $0x1fc] ss:$12 sps:$4 sm:$0xff]  }
  0x39   : > { %6017 = vmatpush1.bf16.msra.mxu0 %v10016_v33  ;;  %5726 = vmatprep.subr.bf16.mxu1 %v10017_v34  ;;  %v10100_v27 = vld [vmem:[%s11362_s5 + $0x7e4] ss:$12 sps:$4 sm:$0xff]   ;;  %v10098_v31 = vld [vmem:[%s11362_s5 + $0x7e0] ss:$12 sps:$4 sm:$0xff]   ;;  %v10106_v33 = vld [vmem:[%s11362_s5 + $0x7fc] ss:$12 sps:$4 sm:$0xff]  }
  0x3a   : > { %6018 = vmatprep.subr.bf16.mxu0 %v10019_v35  ;;  %v10101_v34 = vld [vmem:[%s11362_s5 + $0x1f8] ss:$12 sps:$4 sm:$0xff]   ;;  %v10167_v35 = vld [vmem:[%s13325_s0 + $0x2d4] ss:$120 sps:$4 sm:$0xff]  }
  0x3c   : > { %5727 = vmatpush1.bf16.msra.mxu1 %v10021_v36  ;;  %v10104_v36 = vld [vmem:[%s11362_s5 + $0x7f8] ss:$12 sps:$4 sm:$0xff]  }
  0x3d   : > { %6019 = vmatpush1.bf16.msra.mxu0 %v10022_v37  ;;  %5728 = vmatprep.subr.bf16.mxu1 %v10023_v38  ;;  %v10172_v37 = vld [vmem:[%s13325_s0 + $0x2f4] ss:$120 sps:$4 sm:$0xff]  }
  0x3e   : > { %6020 = vmatprep.subr.bf16.mxu0 %v10025_v39  ;;  %v10109_v38 = vld [vmem:[%s11362_s5 + $0x214] ss:$12 sps:$4 sm:$0xff]  }
  0x3f   : > { %v10112_v39 = vld [vmem:[%s11362_s5 + $0x814] ss:$12 sps:$4 sm:$0xff]  }
  0x40   : > { %5729 = vmatpush1.bf16.msra.mxu1 %v10027_v40  ;;  %v10107_v40 = vld [vmem:[%s11362_s5 + $0x210] ss:$12 sps:$4 sm:$0xff]  }
  0x41   : > { %6021 = vmatpush1.bf16.msra.mxu0 %v10028_v41  ;;  %5730 = vmatprep.subr.bf16.mxu1 %v10029_v42  ;;  %v10177_v41 = vld [vmem:[%s13325_s0 + $0x2d0] ss:$120 sps:$4 sm:$0xff]  }
  0x42   : > { %6022 = vmatprep.subr.bf16.mxu0 %v10031_v43  ;;  %v10178_v42 = vld [vmem:[%s13325_s0 + $0x2f0] ss:$120 sps:$4 sm:$0xff]  }
  0x43   : > { %v10110_v43 = vld [vmem:[%s11362_s5 + $0x810] ss:$12 sps:$4 sm:$0xff]  }
  0x44   : > { %5731 = vmatpush1.bf16.msra.mxu1 %v10033_v44  ;;  %v10115_v44 = vld [vmem:[%s11362_s5 + $0x22c] ss:$12 sps:$4 sm:$0xff]  }
  0x45   : > { %6023 = vmatpush1.bf16.msra.mxu0 %v10034_v45  ;;  %5732 = vmatprep.subr.bf16.mxu1 %v10035_v46  ;;  %v10118_v45 = vld [vmem:[%s11362_s5 + $0x82c] ss:$12 sps:$4 sm:$0xff]  }
  0x46   : > { %6024 = vmatprep.subr.bf16.mxu0 %v10037_v47  ;;  %v10187_v46 = vld [vmem:[%s13325_s0 + $0xc] ss:$120 sps:$4 sm:$0xff]   ;;  %v10113_v47 = vld [vmem:[%s11362_s5 + $0x228] ss:$12 sps:$4 sm:$0xff]  }
  0x48   : > { %5733 = vmatpush1.bf16.msra.mxu1 %v10039_v48  ;;  %v10116_v48 = vld [vmem:[%s11362_s5 + $0x828] ss:$12 sps:$4 sm:$0xff]  }
  0x49   : > { %6025 = vmatpush1.bf16.msra.mxu0 %v10040_v49  ;;  %5734 = vmatprep.subr.bf16.mxu1 %v10041_v50  ;;  %v10121_v49 = vld [vmem:[%s11362_s5 + $0x244] ss:$12 sps:$4 sm:$0xff]  }
  0x4a   : > { %6026 = vmatprep.subr.bf16.mxu0 %v10043_v51  ;;  %v10193_v50 = vld [vmem:[%s13325_s0 + $0x2c] ss:$120 sps:$4 sm:$0xff]  }
  0x4b   : > { %v10124_v51 = vld [vmem:[%s11362_s5 + $0x844] ss:$12 sps:$4 sm:$0xff]  }
  0x4c   : > { %5735 = vmatpush1.bf16.msra.mxu1 %v10045_v52  ;;  %v10119_v52 = vld [vmem:[%s11362_s5 + $0x240] ss:$12 sps:$4 sm:$0xff]  }
  0x4d   : > { %6027 = vmatpush1.bf16.msra.mxu0 %v10046_v53  ;;  %5736 = vmatprep.subr.bf16.mxu1 %v10047_v54  ;;  %v10122_v53 = vld [vmem:[%s11362_s5 + $0x840] ss:$12 sps:$4 sm:$0xff]   ;;  %v10127_v54 = vld [vmem:[%s11362_s5 + $0x25c] ss:$12 sps:$4 sm:$0xff]  }
  0x4e   : > { %6028 = vmatprep.subr.bf16.mxu0 %v10049_v55  ;;  %v10130_v55 = vld [vmem:[%s11362_s5 + $0x85c] ss:$12 sps:$4 sm:$0xff]  }
  0x50   : > { %5737 = vmatpush1.bf16.msra.mxu1 %v10051_v56  ;;  %v10125_v56 = vld [vmem:[%s11362_s5 + $0x258] ss:$12 sps:$4 sm:$0xff]  }
  0x51   : > { %6029 = vmatpush1.bf16.msra.mxu0 %v10052_v57  ;;  %5738 = vmatprep.subr.bf16.mxu1 %v10053_v58  ;;  %v10128_v57 = vld [vmem:[%s11362_s5 + $0x858] ss:$12 sps:$4 sm:$0xff]   ;;  %v10135_v58 = vld [vmem:[%s11362_s5 + $0x274] ss:$12 sps:$4 sm:$0xff]  }
  0x52   : > { %6030 = vmatprep.subr.bf16.mxu0 %v10055_v59  ;;  %v10140_v59 = vld [vmem:[%s11362_s5 + $0x874] ss:$12 sps:$4 sm:$0xff]  }
  0x54   : > { %5739 = vmatpush1.bf16.msra.mxu1 %v10057_v60  ;;  %v10133_v60 = vld [vmem:[%s11362_s5 + $0x270] ss:$12 sps:$4 sm:$0xff]  }
  0x55   : > { %6031 = vmatpush1.bf16.msra.mxu0 %v10058_v61  ;;  %5740 = vmatprep.subr.bf16.mxu1 %v10059_v62  ;;  %v10138_v61 = vld [vmem:[%s11362_s5 + $0x870] ss:$12 sps:$4 sm:$0xff]   ;;  %v10145_v62 = vld [vmem:[%s11362_s5 + $0x28c] ss:$12 sps:$4 sm:$0xff]  }
  0x56   : > { %6032 = vmatprep.subr.bf16.mxu0 %v10061_v63  ;;  %v10148_v63 = vld [vmem:[%s11362_s5 + $0x88c] ss:$12 sps:$4 sm:$0xff]  }
  0x58   : > { %5741 = vmatpush1.bf16.msra.mxu1 %v10063_v0  ;;  %v10143_v0 = vld [vmem:[%s11362_s5 + $0x288] ss:$12 sps:$4 sm:$0xff]  }
  0x59   : > { %6033 = vmatpush1.bf16.msra.mxu0 %v10064_v1  ;;  %5783 = vmatprep.subr.bf16.mxu1 %v10070_v2  ;;  %v10146_v1 = vld [vmem:[%s11362_s5 + $0x888] ss:$12 sps:$4 sm:$0xff]   ;;  %v10153_v2 = vld [vmem:[%s11362_s5 + $0x2a4] ss:$12 sps:$4 sm:$0xff]  }
  0x5a   : > { %6075 = vmatprep.subr.bf16.mxu0 %v10076_v3  ;;  %v10158_v3 = vld [vmem:[%s11362_s5 + $0x8a4] ss:$12 sps:$4 sm:$0xff]  }
  0x5b   : > { %5743 = vmatmul.mubr.bf16.vlgmr.msra.gmra.mrb[0].mxu1 %v10065_v4  ;;  %v10151_v4 = vld [vmem:[%s11362_s5 + $0x2a0] ss:$12 sps:$4 sm:$0xff]  }
  0x5c   : > { %6035 = vmatmul.mubr.bf16.vlgmr.msra.gmra.mrb[0].mxu0 %v10071_v5  ;;  %5784 = vmatpush1.bf16.msra.mxu1 %v10068_v6  ;;  %v10156_v5 = vld [vmem:[%s11362_s5 + $0x8a0] ss:$12 sps:$4 sm:$0xff]   ;;  %v10163_v6 = vld [vmem:[%s11362_s5 + $0x2bc] ss:$12 sps:$4 sm:$0xff]  }
  0x5d   : > { %6076 = vmatpush1.bf16.msra.mxu0 %v10074_v7  ;;  %5785 = vmatprep.subr.bf16.mxu1 %v10079_v8  ;;  %v10166_v7 = vld [vmem:[%s11362_s5 + $0x8bc] ss:$12 sps:$4 sm:$0xff]   ;;  %v10161_v8 = vld [vmem:[%s11362_s5 + $0x2b8] ss:$12 sps:$4 sm:$0xff]  }
  0x5e   : > { %6077 = vmatprep.subr.bf16.mxu0 %v10082_v9  ;;  %5752 = vmatprep.mubr.bf16.mxu1 %v10131_v10  ;;  %v10164_v9 = vld [vmem:[%s11362_s5 + $0x8b8] ss:$12 sps:$4 sm:$0xff]   ;;  %v10171_v10 = vld [vmem:[%s11362_s5 + $0x2d4] ss:$12 sps:$4 sm:$0xff]  }
  0x5f   : > { %6044 = vmatprep.mubr.bf16.mxu0 %v10136_v11  ;;  %v10176_v11 = vld [vmem:[%s11362_s5 + $0x8d4] ss:$12 sps:$4 sm:$0xff]  }
  0x60   : > { %5786 = vmatpush1.bf16.msra.mxu1 %v10077_v12  ;;  %v10169_v12 = vld [vmem:[%s11362_s5 + $0x2d0] ss:$12 sps:$4 sm:$0xff]  }
  0x61   : > { %6078 = vmatpush1.bf16.msra.mxu0 %v10080_v13  ;;  %5787 = vmatprep.subr.bf16.mxu1 %v10085_v14  ;;  %v10174_v13 = vld [vmem:[%s11362_s5 + $0x8d0] ss:$12 sps:$4 sm:$0xff]   ;;  %v10181_v14 = vld [vmem:[%s11362_s5 + $0x2ec] ss:$12 sps:$4 sm:$0xff]  }
  0x62   : > { %6079 = vmatprep.subr.bf16.mxu0 %v10088_v15  ;;  %v10184_v15 = vld [vmem:[%s11362_s5 + $0x8ec] ss:$12 sps:$4 sm:$0xff]  }
  0x63   : > { %5753 = vmatmul.mubr.bf16.gmra.mrb[4].mxu1 %v10141_v16  ;;  %v10179_v16 = vld [vmem:[%s11362_s5 + $0x2e8] ss:$12 sps:$4 sm:$0xff]  }
  0x64   : > { %6045 = vmatmul.mubr.bf16.gmra.mrb[4].mxu0 %v10142_v17  ;;  %5788 = vmatpush1.bf16.msra.mxu1 %v10083_v18  ;;  %v10182_v17 = vld [vmem:[%s11362_s5 + $0x8e8] ss:$12 sps:$4 sm:$0xff]   ;;  %v10190_v18 = vld [vmem:[%s11362_s5 + $0x304] ss:$12 sps:$4 sm:$0xff]  }
  0x65   : > { %6080 = vmatpush1.bf16.msra.mxu0 %v10086_v19  ;;  %5789 = vmatprep.subr.bf16.mxu1 %v10091_v20  ;;  %v10185_v19 = vld [vmem:[%s13325_s0 + $0x8] ss:$120 sps:$4 sm:$0xff]   ;;  %v10196_v20 = vld [vmem:[%s11362_s5 + $0x904] ss:$12 sps:$4 sm:$0xff]  }
  0x66   : > { %6081 = vmatprep.subr.bf16.mxu0 %v10094_v21  ;;  %5762 = vmatprep.mubr.bf16.mxu1 %v10149_v22  ;;  %v10188_v21 = vld [vmem:[%s11362_s5 + $0x300] ss:$12 sps:$4 sm:$0xff]  }
  0x67   : > { %6054 = vmatprep.mubr.bf16.mxu0 %v10154_v25  ;;  %v10191_v22 = vld [vmem:[%s13325_s0 + $0x28] ss:$120 sps:$4 sm:$0xff]  }
  0x68   : > { %5790 = vmatpush1.bf16.msra.mxu1 %v10089_v23  ;;  %v10194_v23 = vld [vmem:[%s11362_s5 + $0x900] ss:$12 sps:$4 sm:$0xff]   ;;  %v10202_v25 = vld [vmem:[%s11362_s5 + $0x91c] ss:$12 sps:$4 sm:$0xff]  }
  0x69   : > { %6082 = vmatpush1.bf16.msra.mxu0 %v10092_v24  ;;  %5791 = vmatprep.subr.bf16.mxu1 %v10097_v26  ;;  %v10199_v24 = vld [vmem:[%s11362_s5 + $0x31c] ss:$12 sps:$4 sm:$0xff]  }
  0x6a   : > { %6083 = vmatprep.subr.bf16.mxu0 %v10100_v27  ;;  %v10251_v26 = vld [vmem:[%s13325_s0 + $0xfc] ss:$120 sps:$4 sm:$0xff]  }
  0x6b   : > { %5763 = vmatmul.mubr.bf16.gmra.mrb[8].mxu1 %v10159_v29  ;;  %v10256_v27 = vld [vmem:[%s13325_s0 + $0x11c] ss:$120 sps:$4 sm:$0xff]   ;;  %v10200_v29 = vld [vmem:[%s11362_s5 + $0x918] ss:$12 sps:$4 sm:$0xff]  }
  0x6c   : > { %6055 = vmatmul.mubr.bf16.gmra.mrb[8].mxu0 %v10160_v30  ;;  %5792 = vmatpush1.bf16.msra.mxu1 %v10095_v28  ;;  %v10197_v28 = vld [vmem:[%s11362_s5 + $0x318] ss:$12 sps:$4 sm:$0xff]   ;;  %v10205_v30 = vld [vmem:[%s11362_s5 + $0x334] ss:$12 sps:$4 sm:$0xff]  }
  0x6d   : > { %6084 = vmatpush1.bf16.msra.mxu0 %v10098_v31  ;;  %5793 = vmatprep.subr.bf16.mxu1 %v10103_v32  ;;  %v10208_v31 = vld [vmem:[%s11362_s5 + $0x934] ss:$12 sps:$4 sm:$0xff]   ;;  %v10203_v32 = vld [vmem:[%s11362_s5 + $0x330] ss:$12 sps:$4 sm:$0xff]  }
  0x6e   : > { %6085 = vmatprep.subr.bf16.mxu0 %v10106_v33  ;;  %5772 = vmatprep.mubr.bf16.mxu1 %v10167_v35  ;;  %v10261_v33 = vld [vmem:[%s13325_s0 + $0xf8] ss:$120 sps:$4 sm:$0xff]  }
  0x6f   : > { %6064 = vmatprep.mubr.bf16.mxu0 %v10172_v37  ;;  %v10206_v35 = vld [vmem:[%s11362_s5 + $0x930] ss:$12 sps:$4 sm:$0xff]   ;;  %v10214_v37 = vld [vmem:[%s11362_s5 + $0x94c] ss:$12 sps:$4 sm:$0xff]  }
  0x70   : > { %5794 = vmatpush1.bf16.msra.mxu1 %v10101_v34  ;;  %v10262_v34 = vld [vmem:[%s13325_s0 + $0x118] ss:$120 sps:$4 sm:$0xff]  }
  0x71   : > { %6086 = vmatpush1.bf16.msra.mxu0 %v10104_v36  ;;  %5795 = vmatprep.subr.bf16.mxu1 %v10109_v38  ;;  %v10211_v36 = vld [vmem:[%s11362_s5 + $0x34c] ss:$12 sps:$4 sm:$0xff]  }
  0x72   : > { %6087 = vmatprep.subr.bf16.mxu0 %v10112_v39  ;;  %v10269_v38 = vld [vmem:[%s13325_s0 + $0x1ec] ss:$120 sps:$4 sm:$0xff]  }
  0x73   : > { %5773 = vmatmul.mubr.bf16.gmra.mrb[12].mxu1 %v10177_v41  ;;  %v10274_v39 = vld [vmem:[%s13325_s0 + $0x20c] ss:$120 sps:$4 sm:$0xff]   ;;  %v10212_v41 = vld [vmem:[%s11362_s5 + $0x948] ss:$12 sps:$4 sm:$0xff]  }
  0x74   : > { %6065 = vmatmul.mubr.bf16.gmra.mrb[12].mxu0 %v10178_v42  ;;  %5796 = vmatpush1.bf16.msra.mxu1 %v10107_v40  ;;  %v10209_v40 = vld [vmem:[%s11362_s5 + $0x348] ss:$12 sps:$4 sm:$0xff]   ;;  %v10217_v42 = vld [vmem:[%s11362_s5 + $0x364] ss:$12 sps:$4 sm:$0xff]  }
  0x75   : > { %6088 = vmatpush1.bf16.msra.mxu0 %v10110_v43  ;;  %5797 = vmatprep.subr.bf16.mxu1 %v10115_v44  ;;  %v10220_v43 = vld [vmem:[%s11362_s5 + $0x964] ss:$12 sps:$4 sm:$0xff]   ;;  %v10215_v44 = vld [vmem:[%s11362_s5 + $0x360] ss:$12 sps:$4 sm:$0xff]  }
  0x76   : > { %6089 = vmatprep.subr.bf16.mxu0 %v10118_v45  ;;  %5815 = vmatprep.mubr.bf16.mxu1 %v10187_v46  ;;  %v10218_v45 = vld [vmem:[%s11362_s5 + $0x960] ss:$12 sps:$4 sm:$0xff]  }
  0x77   : > { %6107 = vmatprep.mubr.bf16.mxu0 %v10193_v50  ;;  %v10279_v46 = vld [vmem:[%s13325_s0 + $0x1e8] ss:$120 sps:$4 sm:$0xff]   ;;  %v10287_v50 = vld [vmem:[%s13325_s0 + $0x2dc] ss:$120 sps:$4 sm:$0xff]  }
  0x78   : > { %5798 = vmatpush1.bf16.msra.mxu1 %v10113_v47  ;;  %v10280_v47 = vld [vmem:[%s13325_s0 + $0x208] ss:$120 sps:$4 sm:$0xff]  }
  0x79   : > { %6090 = vmatpush1.bf16.msra.mxu0 %v10116_v48  ;;  %5799 = vmatprep.subr.bf16.mxu1 %v10121_v49  ;;  %v10223_v48 = vld [vmem:[%s11362_s5 + $0x37c] ss:$12 sps:$4 sm:$0xff]  }
  0x7a   : > { %6091 = vmatprep.subr.bf16.mxu0 %v10124_v51  ;;  %v10226_v49 = vld [vmem:[%s11362_s5 + $0x97c] ss:$12 sps:$4 sm:$0xff]  }
  0x7b   : > { %v10292_v51 = vld [vmem:[%s13325_s0 + $0x2fc] ss:$120 sps:$4 sm:$0xff]  }
  0x7c   : > { %5800 = vmatpush1.bf16.msra.mxu1 %v10119_v52  ;;  %v10221_v52 = vld [vmem:[%s11362_s5 + $0x378] ss:$12 sps:$4 sm:$0xff]  }
  0x7d   : > { %6092 = vmatpush1.bf16.msra.mxu0 %v10122_v53  ;;  %5801 = vmatprep.subr.bf16.mxu1 %v10127_v54  ;;  %v10224_v53 = vld [vmem:[%s11362_s5 + $0x978] ss:$12 sps:$4 sm:$0xff]   ;;  %v10229_v54 = vld [vmem:[%s11362_s5 + $0x394] ss:$12 sps:$4 sm:$0xff]  }
  0x7e   : > { %6093 = vmatprep.subr.bf16.mxu0 %v10130_v55  ;;  %v10232_v55 = vld [vmem:[%s11362_s5 + $0x994] ss:$12 sps:$4 sm:$0xff]  }
  0x80   : > { %5802 = vmatpush1.bf16.msra.mxu1 %v10125_v56  ;;  %v10227_v56 = vld [vmem:[%s11362_s5 + $0x390] ss:$12 sps:$4 sm:$0xff]  }
  0x81   : > { %6094 = vmatpush1.bf16.msra.mxu0 %v10128_v57  ;;  %5803 = vmatprep.subr.bf16.mxu1 %v10135_v58  ;;  %v10230_v57 = vld [vmem:[%s11362_s5 + $0x990] ss:$12 sps:$4 sm:$0xff]  }
  0x82   : > { %6095 = vmatprep.subr.bf16.mxu0 %v10140_v59  ;;  %v10297_v58 = vld [vmem:[%s13325_s0 + $0x2d8] ss:$120 sps:$4 sm:$0xff]  }
  0x83   : > { %v10298_v59 = vld [vmem:[%s13325_s0 + $0x2f8] ss:$120 sps:$4 sm:$0xff]  }
  0x84   : > { %5804 = vmatpush1.bf16.msra.mxu1 %v10133_v60  ;;  %v10235_v60 = vld [vmem:[%s11362_s5 + $0x3ac] ss:$12 sps:$4 sm:$0xff]  }
  0x85   : > { %6096 = vmatpush1.bf16.msra.mxu0 %v10138_v61  ;;  %5805 = vmatprep.subr.bf16.mxu1 %v10145_v62  ;;  %v10238_v61 = vld [vmem:[%s11362_s5 + $0x9ac] ss:$12 sps:$4 sm:$0xff]  }
  0x86   : > { %6097 = vmatprep.subr.bf16.mxu0 %v10148_v63  ;;  %v10307_v62 = vld [vmem:[%s13325_s0 + $0x14] ss:$120 sps:$4 sm:$0xff]  }
  0x87   : > { %v10313_v63 = vld [vmem:[%s13325_s0 + $0x34] ss:$120 sps:$4 sm:$0xff]  }
  0x88   : > { %5806 = vmatpush1.bf16.msra.mxu1 %v10143_v0  ;;  %v10233_v0 = vld [vmem:[%s11362_s5 + $0x3a8] ss:$12 sps:$4 sm:$0xff]  }
  0x89   : > { %6098 = vmatpush1.bf16.msra.mxu0 %v10146_v1  ;;  %5807 = vmatprep.subr.bf16.mxu1 %v10153_v2  ;;  %v10236_v1 = vld [vmem:[%s11362_s5 + $0x9a8] ss:$12 sps:$4 sm:$0xff]   ;;  %v10241_v2 = vld [vmem:[%s11362_s5 + $0x3c4] ss:$12 sps:$4 sm:$0xff]  }
  0x8a   : > { %6099 = vmatprep.subr.bf16.mxu0 %v10158_v3  ;;  %v10244_v3 = vld [vmem:[%s11362_s5 + $0x9c4] ss:$12 sps:$4 sm:$0xff]  }
  0x8c   : > { %5808 = vmatpush1.bf16.msra.mxu1 %v10151_v4  ;;  %v10239_v4 = vld [vmem:[%s11362_s5 + $0x3c0] ss:$12 sps:$4 sm:$0xff]  }
  0x8d   : > { %6100 = vmatpush1.bf16.msra.mxu0 %v10156_v5  ;;  %5809 = vmatprep.subr.bf16.mxu1 %v10163_v6  ;;  %v10242_v5 = vld [vmem:[%s11362_s5 + $0x9c0] ss:$12 sps:$4 sm:$0xff]   ;;  %v10247_v6 = vld [vmem:[%s11362_s5 + $0x3dc] ss:$12 sps:$4 sm:$0xff]  }
  0x8e   : > { %6101 = vmatprep.subr.bf16.mxu0 %v10166_v7  ;;  %v10250_v7 = vld [vmem:[%s11362_s5 + $0x9dc] ss:$12 sps:$4 sm:$0xff]  }
  0x90   : > { %5810 = vmatpush1.bf16.msra.mxu1 %v10161_v8  ;;  %v10245_v8 = vld [vmem:[%s11362_s5 + $0x3d8] ss:$12 sps:$4 sm:$0xff]  }
  0x91   : > { %6102 = vmatpush1.bf16.msra.mxu0 %v10164_v9  ;;  %5811 = vmatprep.subr.bf16.mxu1 %v10171_v10  ;;  %v10248_v9 = vld [vmem:[%s11362_s5 + $0x9d8] ss:$12 sps:$4 sm:$0xff]   ;;  %v10255_v10 = vld [vmem:[%s11362_s5 + $0x3f4] ss:$12 sps:$4 sm:$0xff]  }
  0x92   : > { %6103 = vmatprep.subr.bf16.mxu0 %v10176_v11  ;;  %v10260_v11 = vld [vmem:[%s11362_s5 + $0x9f4] ss:$12 sps:$4 sm:$0xff]  }
  0x94   : > { %5812 = vmatpush1.bf16.msra.mxu1 %v10169_v12  ;;  %v10253_v12 = vld [vmem:[%s11362_s5 + $0x3f0] ss:$12 sps:$4 sm:$0xff]  }
  0x95   : > { %6104 = vmatpush1.bf16.msra.mxu0 %v10174_v13  ;;  %5813 = vmatprep.subr.bf16.mxu1 %v10181_v14  ;;  %v10258_v13 = vld [vmem:[%s11362_s5 + $0x9f0] ss:$12 sps:$4 sm:$0xff]   ;;  %v10265_v14 = vld [vmem:[%s11362_s5 + $0x40c] ss:$12 sps:$4 sm:$0xff]  }
  0x96   : > { %6105 = vmatprep.subr.bf16.mxu0 %v10184_v15  ;;  %v10268_v15 = vld [vmem:[%s11362_s5 + $0xa0c] ss:$12 sps:$4 sm:$0xff]  }
  0x98   : > { %5814 = vmatpush1.bf16.msra.mxu1 %v10179_v16  ;;  %v10263_v16 = vld [vmem:[%s11362_s5 + $0x408] ss:$12 sps:$4 sm:$0xff]  }
  0x99   : > { %6106 = vmatpush1.bf16.msra.mxu0 %v10182_v17  ;;  %5856 = vmatprep.subr.bf16.mxu1 %v10190_v18  ;;  %v10266_v17 = vld [vmem:[%s11362_s5 + $0xa08] ss:$12 sps:$4 sm:$0xff]   ;;  %v10273_v18 = vld [vmem:[%s11362_s5 + $0x424] ss:$12 sps:$4 sm:$0xff]  }
  0x9a   : > { %6148 = vmatprep.subr.bf16.mxu0 %v10196_v20  ;;  %v10271_v20 = vld [vmem:[%s11362_s5 + $0x420] ss:$12 sps:$4 sm:$0xff]  }
  0x9b   : > { %5816 = vmatmul.mubr.bf16.vlgmr.msra.gmra.mrb[0].mxu1 %v10185_v19  ;;  %v10278_v19 = vld [vmem:[%s11362_s5 + $0xa24] ss:$12 sps:$4 sm:$0xff]  }
  0x9c   : > { %6108 = vmatmul.mubr.bf16.vlgmr.msra.gmra.mrb[0].mxu0 %v10191_v22  ;;  %5857 = vmatpush1.bf16.msra.mxu1 %v10188_v21  ;;  %v10276_v21 = vld [vmem:[%s11362_s5 + $0xa20] ss:$12 sps:$4 sm:$0xff]   ;;  %v10283_v22 = vld [vmem:[%s11362_s5 + $0x43c] ss:$12 sps:$4 sm:$0xff]  }
  0x9d   : > { %6149 = vmatpush1.bf16.msra.mxu0 %v10194_v23  ;;  %5858 = vmatprep.subr.bf16.mxu1 %v10199_v24  ;;  %v10286_v23 = vld [vmem:[%s11362_s5 + $0xa3c] ss:$12 sps:$4 sm:$0xff]   ;;  %v10281_v24 = vld [vmem:[%s11362_s5 + $0x438] ss:$12 sps:$4 sm:$0xff]  }
  0x9e   : > { %6150 = vmatprep.subr.bf16.mxu0 %v10202_v25  ;;  %5825 = vmatprep.mubr.bf16.mxu1 %v10251_v26  ;;  %v10284_v25 = vld [vmem:[%s11362_s5 + $0xa38] ss:$12 sps:$4 sm:$0xff]   ;;  %v10291_v26 = vld [vmem:[%s11362_s5 + $0x454] ss:$12 sps:$4 sm:$0xff]  }
  0x9f   : > { %6117 = vmatprep.mubr.bf16.mxu0 %v10256_v27  ;;  %v10296_v27 = vld [vmem:[%s11362_s5 + $0xa54] ss:$12 sps:$4 sm:$0xff]  }
  0xa0   : > { %5859 = vmatpush1.bf16.msra.mxu1 %v10197_v28  ;;  %v10289_v28 = vld [vmem:[%s11362_s5 + $0x450] ss:$12 sps:$4 sm:$0xff]  }
  0xa1   : > { %6151 = vmatpush1.bf16.msra.mxu0 %v10200_v29  ;;  %5860 = vmatprep.subr.bf16.mxu1 %v10205_v30  ;;  %v10294_v29 = vld [vmem:[%s11362_s5 + $0xa50] ss:$12 sps:$4 sm:$0xff]   ;;  %v10301_v30 = vld [vmem:[%s11362_s5 + $0x46c] ss:$12 sps:$4 sm:$0xff]  }
  0xa2   : > { %6152 = vmatprep.subr.bf16.mxu0 %v10208_v31  ;;  %v10304_v31 = vld [vmem:[%s11362_s5 + $0xa6c] ss:$12 sps:$4 sm:$0xff]  }
  0xa3   : > { %5826 = vmatmul.mubr.bf16.gmra.mrb[4].mxu1 %v10261_v33  ;;  %v10302_v33 = vld [vmem:[%s11362_s5 + $0xa68] ss:$12 sps:$4 sm:$0xff]  }
  0xa4   : > { %6118 = vmatmul.mubr.bf16.gmra.mrb[4].mxu0 %v10262_v34  ;;  %5861 = vmatpush1.bf16.msra.mxu1 %v10203_v32  ;;  %v10299_v32 = vld [vmem:[%s11362_s5 + $0x468] ss:$12 sps:$4 sm:$0xff]   ;;  %v10310_v34 = vld [vmem:[%s11362_s5 + $0x484] ss:$12 sps:$4 sm:$0xff]  }
  0xa5   : > { %6153 = vmatpush1.bf16.msra.mxu0 %v10206_v35  ;;  %5862 = vmatprep.subr.bf16.mxu1 %v10211_v36  ;;  %v10305_v35 = vld [vmem:[%s13325_s0 + $0x10] ss:$120 sps:$4 sm:$0xff]  }
  0xa6   : > { %6154 = vmatprep.subr.bf16.mxu0 %v10214_v37  ;;  %5835 = vmatprep.mubr.bf16.mxu1 %v10269_v38  ;;  %v10316_v36 = vld [vmem:[%s11362_s5 + $0xa84] ss:$12 sps:$4 sm:$0xff]   ;;  %v10308_v37 = vld [vmem:[%s11362_s5 + $0x480] ss:$12 sps:$4 sm:$0xff]  }
  0xa7   : > { %6127 = vmatprep.mubr.bf16.mxu0 %v10274_v39  ;;  %v10311_v38 = vld [vmem:[%s13325_s0 + $0x30] ss:$120 sps:$4 sm:$0xff]   ;;  %v10314_v39 = vld [vmem:[%s11362_s5 + $0xa80] ss:$12 sps:$4 sm:$0xff]  }
  0xa8   : > { %5863 = vmatpush1.bf16.msra.mxu1 %v10209_v40  ;;  %v10319_v40 = vld [vmem:[%s11362_s5 + $0x49c] ss:$12 sps:$4 sm:$0xff]  }
  0xa9   : > { %6155 = vmatpush1.bf16.msra.mxu0 %v10212_v41  ;;  %5864 = vmatprep.subr.bf16.mxu1 %v10217_v42  ;;  %v10322_v41 = vld [vmem:[%s11362_s5 + $0xa9c] ss:$12 sps:$4 sm:$0xff]  }
  0xaa   : > { %6156 = vmatprep.subr.bf16.mxu0 %v10220_v43  ;;  %v10371_v42 = vld [vmem:[%s13325_s0 + $0x104] ss:$120 sps:$4 sm:$0xff]  }
  0xab   : > { %5836 = vmatmul.mubr.bf16.gmra.mrb[8].mxu1 %v10279_v46  ;;  %v10377_v43 = vld [vmem:[%s13325_s0 + $0x124] ss:$120 sps:$4 sm:$0xff]   ;;  %v10325_v46 = vld [vmem:[%s11362_s5 + $0x4b4] ss:$12 sps:$4 sm:$0xff]  }
  0xac   : > { %6128 = vmatmul.mubr.bf16.gmra.mrb[8].mxu0 %v10280_v47  ;;  %5865 = vmatpush1.bf16.msra.mxu1 %v10215_v44  ;;  %v10317_v44 = vld [vmem:[%s11362_s5 + $0x498] ss:$12 sps:$4 sm:$0xff]   ;;  %v10328_v47 = vld [vmem:[%s11362_s5 + $0xab4] ss:$12 sps:$4 sm:$0xff]  }
  0xad   : > { %6157 = vmatpush1.bf16.msra.mxu0 %v10218_v45  ;;  %5866 = vmatprep.subr.bf16.mxu1 %v10223_v48  ;;  %v10320_v45 = vld [vmem:[%s11362_s5 + $0xa98] ss:$12 sps:$4 sm:$0xff]   ;;  %v10323_v48 = vld [vmem:[%s11362_s5 + $0x4b0] ss:$12 sps:$4 sm:$0xff]  }
  0xae   : > { %6158 = vmatprep.subr.bf16.mxu0 %v10226_v49  ;;  %5845 = vmatprep.mubr.bf16.mxu1 %v10287_v50  ;;  %v10326_v49 = vld [vmem:[%s11362_s5 + $0xab0] ss:$12 sps:$4 sm:$0xff]   ;;  %v10373_v50 = vld [vmem:[%s13325_s0 + $0x100] ss:$120 sps:$4 sm:$0xff]  }
  0xaf   : > { %6137 = vmatprep.mubr.bf16.mxu0 %v10292_v51  ;;  %v10382_v51 = vld [vmem:[%s13325_s0 + $0x120] ss:$120 sps:$4 sm:$0xff]  }
  0xb0   : > { %5867 = vmatpush1.bf16.msra.mxu1 %v10221_v52  ;;  %v10331_v52 = vld [vmem:[%s11362_s5 + $0x4cc] ss:$12 sps:$4 sm:$0xff]  }
  0xb1   : > { %6159 = vmatpush1.bf16.msra.mxu0 %v10224_v53  ;;  %5868 = vmatprep.subr.bf16.mxu1 %v10229_v54  ;;  %v10334_v53 = vld [vmem:[%s11362_s5 + $0xacc] ss:$12 sps:$4 sm:$0xff]   ;;  %v10329_v54 = vld [vmem:[%s11362_s5 + $0x4c8] ss:$12 sps:$4 sm:$0xff]  }
  0xb2   : > { %6160 = vmatprep.subr.bf16.mxu0 %v10232_v55  ;;  %v10389_v55 = vld [vmem:[%s13325_s0 + $0x1f4] ss:$120 sps:$4 sm:$0xff]  }
  0xb3   : > { %5846 = vmatmul.mubr.bf16.gmra.mrb[12].mxu1 %v10297_v58  ;;  %v10337_v58 = vld [vmem:[%s11362_s5 + $0x4e4] ss:$12 sps:$4 sm:$0xff]  }
  0xb4   : > { %6138 = vmatmul.mubr.bf16.gmra.mrb[12].mxu0 %v10298_v59  ;;  %5869 = vmatpush1.bf16.msra.mxu1 %v10227_v56  ;;  %v10395_v56 = vld [vmem:[%s13325_s0 + $0x214] ss:$120 sps:$4 sm:$0xff]   ;;  %v10340_v59 = vld [vmem:[%s11362_s5 + $0xae4] ss:$12 sps:$4 sm:$0xff]  }
  0xb5   : > { %6161 = vmatpush1.bf16.msra.mxu0 %v10230_v57  ;;  %5870 = vmatprep.subr.bf16.mxu1 %v10235_v60  ;;  %v10332_v57 = vld [vmem:[%s11362_s5 + $0xac8] ss:$12 sps:$4 sm:$0xff]   ;;  %v10335_v60 = vld [vmem:[%s11362_s5 + $0x4e0] ss:$12 sps:$4 sm:$0xff]  }
  0xb6   : > { %6162 = vmatprep.subr.bf16.mxu0 %v10238_v61  ;;  %5888 = vmatprep.mubr.bf16.mxu1 %v10307_v62  ;;  %v10338_v61 = vld [vmem:[%s11362_s5 + $0xae0] ss:$12 sps:$4 sm:$0xff]   ;;  %v10391_v62 = vld [vmem:[%s13325_s0 + $0x1f0] ss:$120 sps:$4 sm:$0xff]  }
  0xb7   : > { %6180 = vmatprep.mubr.bf16.mxu0 %v10313_v63  ;;  %v10400_v63 = vld [vmem:[%s13325_s0 + $0x210] ss:$120 sps:$4 sm:$0xff]  }
  0xb8   : > { %5871 = vmatpush1.bf16.msra.mxu1 %v10233_v0  ;;  %v10343_v0 = vld [vmem:[%s11362_s5 + $0x4fc] ss:$12 sps:$4 sm:$0xff]  }
  0xb9   : > { %6163 = vmatpush1.bf16.msra.mxu0 %v10236_v1  ;;  %5872 = vmatprep.subr.bf16.mxu1 %v10241_v2  ;;  %v10346_v1 = vld [vmem:[%s11362_s5 + $0xafc] ss:$12 sps:$4 sm:$0xff]   ;;  %v10341_v2 = vld [vmem:[%s11362_s5 + $0x4f8] ss:$12 sps:$4 sm:$0xff]  }
  0xba   : > { %6164 = vmatprep.subr.bf16.mxu0 %v10244_v3  ;;  %v10407_v3 = vld [vmem:[%s13325_s0 + $0x2e4] ss:$120 sps:$4 sm:$0xff]  }
  0xbc   : > { %5873 = vmatpush1.bf16.msra.mxu1 %v10239_v4  ;;  %v10413_v4 = vld [vmem:[%s13325_s0 + $0x304] ss:$120 sps:$4 sm:$0xff]  }
  0xbd   : > { %6165 = vmatpush1.bf16.msra.mxu0 %v10242_v5  ;;  %5874 = vmatprep.subr.bf16.mxu1 %v10247_v6  ;;  %v10344_v5 = vld [vmem:[%s11362_s5 + $0xaf8] ss:$12 sps:$4 sm:$0xff]   ;;  %v10349_v6 = vld [vmem:[%s11362_s5 + $0x514] ss:$12 sps:$4 sm:$0xff]  }
  0xbe   : > { %6166 = vmatprep.subr.bf16.mxu0 %v10250_v7  ;;  %v10352_v7 = vld [vmem:[%s11362_s5 + $0xb14] ss:$12 sps:$4 sm:$0xff]  }
  0xc0   : > { %5875 = vmatpush1.bf16.msra.mxu1 %v10245_v8  ;;  %v10347_v8 = vld [vmem:[%s11362_s5 + $0x510] ss:$12 sps:$4 sm:$0xff]  }
  0xc1   : > { %6167 = vmatpush1.bf16.msra.mxu0 %v10248_v9  ;;  %5876 = vmatprep.subr.bf16.mxu1 %v10255_v10  ;;  %v10350_v9 = vld [vmem:[%s11362_s5 + $0xb10] ss:$12 sps:$4 sm:$0xff]   ;;  %v10409_v10 = vld [vmem:[%s13325_s0 + $0x2e0] ss:$120 sps:$4 sm:$0xff]  }
  0xc2   : > { %6168 = vmatprep.subr.bf16.mxu0 %v10260_v11  ;;  %v10418_v11 = vld [vmem:[%s13325_s0 + $0x300] ss:$120 sps:$4 sm:$0xff]  }
  0xc4   : > { %5877 = vmatpush1.bf16.msra.mxu1 %v10253_v12  ;;  %v10355_v12 = vld [vmem:[%s11362_s5 + $0x52c] ss:$12 sps:$4 sm:$0xff]  }
  0xc5   : > { %6169 = vmatpush1.bf16.msra.mxu0 %v10258_v13  ;;  %5878 = vmatprep.subr.bf16.mxu1 %v10265_v14  ;;  %v10358_v13 = vld [vmem:[%s11362_s5 + $0xb2c] ss:$12 sps:$4 sm:$0xff]   ;;  %v10353_v14 = vld [vmem:[%s11362_s5 + $0x528] ss:$12 sps:$4 sm:$0xff]  }
  0xc6   : > { %6170 = vmatprep.subr.bf16.mxu0 %v10268_v15  ;;  %v10427_v15 = vld [vmem:[%s13325_s0 + $0x1c] ss:$120 sps:$4 sm:$0xff]  }
  0xc8   : > { %5879 = vmatpush1.bf16.msra.mxu1 %v10263_v16  ;;  %v10430_v16 = vld [vmem:[%s13325_s0 + $0x3c] ss:$120 sps:$4 sm:$0xff]  }
  0xc9   : > { %6171 = vmatpush1.bf16.msra.mxu0 %v10266_v17  ;;  %5880 = vmatprep.subr.bf16.mxu1 %v10273_v18  ;;  %v10356_v17 = vld [vmem:[%s11362_s5 + $0xb28] ss:$12 sps:$4 sm:$0xff]   ;;  %v10361_v18 = vld [vmem:[%s11362_s5 + $0x544] ss:$12 sps:$4 sm:$0xff]  }
  0xca   : > { %6172 = vmatprep.subr.bf16.mxu0 %v10278_v19  ;;  %v10364_v19 = vld [vmem:[%s11362_s5 + $0xb44] ss:$12 sps:$4 sm:$0xff]  }
  0xcc   : > { %5881 = vmatpush1.bf16.msra.mxu1 %v10271_v20  ;;  %v10359_v20 = vld [vmem:[%s11362_s5 + $0x540] ss:$12 sps:$4 sm:$0xff]  }
  0xcd   : > { %6173 = vmatpush1.bf16.msra.mxu0 %v10276_v21  ;;  %5882 = vmatprep.subr.bf16.mxu1 %v10283_v22  ;;  %v10362_v21 = vld [vmem:[%s11362_s5 + $0xb40] ss:$12 sps:$4 sm:$0xff]   ;;  %v10367_v22 = vld [vmem:[%s11362_s5 + $0x55c] ss:$12 sps:$4 sm:$0xff]  }
  0xce   : > { %6174 = vmatprep.subr.bf16.mxu0 %v10286_v23  ;;  %v10370_v23 = vld [vmem:[%s11362_s5 + $0xb5c] ss:$12 sps:$4 sm:$0xff]  }
  0xd0   : > { %5883 = vmatpush1.bf16.msra.mxu1 %v10281_v24  ;;  %v10365_v24 = vld [vmem:[%s11362_s5 + $0x558] ss:$12 sps:$4 sm:$0xff]  }
  0xd1   : > { %6175 = vmatpush1.bf16.msra.mxu0 %v10284_v25  ;;  %5884 = vmatprep.subr.bf16.mxu1 %v10291_v26  ;;  %v10368_v25 = vld [vmem:[%s11362_s5 + $0xb58] ss:$12 sps:$4 sm:$0xff]   ;;  %v10376_v26 = vld [vmem:[%s11362_s5 + $0x574] ss:$12 sps:$4 sm:$0xff]  }
  0xd2   : > { %6176 = vmatprep.subr.bf16.mxu0 %v10296_v27  ;;  %v10381_v27 = vld [vmem:[%s11362_s5 + $0xb74] ss:$12 sps:$4 sm:$0xff]  }
  0xd4   : > { %5885 = vmatpush1.bf16.msra.mxu1 %v10289_v28  ;;  %v10374_v28 = vld [vmem:[%s11362_s5 + $0x570] ss:$12 sps:$4 sm:$0xff]  }
  0xd5   : > { %6177 = vmatpush1.bf16.msra.mxu0 %v10294_v29  ;;  %5886 = vmatprep.subr.bf16.mxu1 %v10301_v30  ;;  %v10379_v29 = vld [vmem:[%s11362_s5 + $0xb70] ss:$12 sps:$4 sm:$0xff]   ;;  %v10385_v30 = vld [vmem:[%s11362_s5 + $0x58c] ss:$12 sps:$4 sm:$0xff]  }
  0xd6   : > { %6178 = vmatprep.subr.bf16.mxu0 %v10304_v31  ;;  %v10388_v31 = vld [vmem:[%s11362_s5 + $0xb8c] ss:$12 sps:$4 sm:$0xff]  }
  0xd8   : > { %5887 = vmatpush1.bf16.msra.mxu1 %v10299_v32  ;;  %v10383_v32 = vld [vmem:[%s11362_s5 + $0x588] ss:$12 sps:$4 sm:$0xff]  }
  0xd9   : > { %6179 = vmatpush1.bf16.msra.mxu0 %v10302_v33  ;;  %5929 = vmatprep.subr.bf16.mxu1 %v10310_v34  ;;  %v10386_v33 = vld [vmem:[%s11362_s5 + $0xb88] ss:$12 sps:$4 sm:$0xff]   ;;  %v10394_v34 = vld [vmem:[%s11362_s5 + $0x5a4] ss:$12 sps:$4 sm:$0xff]  }
  0xda   : > { %6221 = vmatprep.subr.bf16.mxu0 %v10316_v36  ;;  %v10392_v36 = vld [vmem:[%s11362_s5 + $0x5a0] ss:$12 sps:$4 sm:$0xff]  }
  0xdb   : > { %5889 = vmatmul.mubr.bf16.vlgmr.msra.gmra.mrb[0].mxu1 %v10305_v35  ;;  %v10399_v35 = vld [vmem:[%s11362_s5 + $0xba4] ss:$12 sps:$4 sm:$0xff]  }
  0xdc   : > { %6181 = vmatmul.mubr.bf16.vlgmr.msra.gmra.mrb[0].mxu0 %v10311_v38  ;;  %5930 = vmatpush1.bf16.msra.mxu1 %v10308_v37  ;;  %v10397_v37 = vld [vmem:[%s11362_s5 + $0xba0] ss:$12 sps:$4 sm:$0xff]   ;;  %v10403_v38 = vld [vmem:[%s11362_s5 + $0x5bc] ss:$12 sps:$4 sm:$0xff]  }
  0xdd   : > { %6222 = vmatpush1.bf16.msra.mxu0 %v10314_v39  ;;  %5931 = vmatprep.subr.bf16.mxu1 %v10319_v40  ;;  %v10406_v39 = vld [vmem:[%s11362_s5 + $0xbbc] ss:$12 sps:$4 sm:$0xff]   ;;  %v10401_v40 = vld [vmem:[%s11362_s5 + $0x5b8] ss:$12 sps:$4 sm:$0xff]  }
  0xde   : > { %6223 = vmatprep.subr.bf16.mxu0 %v10322_v41  ;;  %5898 = vmatprep.mubr.bf16.mxu1 %v10371_v42  ;;  %v10404_v41 = vld [vmem:[%s11362_s5 + $0xbb8] ss:$12 sps:$4 sm:$0xff]   ;;  %v10412_v42 = vld [vmem:[%s11362_s5 + $0x5d4] ss:$12 sps:$4 sm:$0xff]  }
  0xdf   : > { %6190 = vmatprep.mubr.bf16.mxu0 %v10377_v43  ;;  %v10417_v43 = vld [vmem:[%s11362_s5 + $0xbd4] ss:$12 sps:$4 sm:$0xff]  }
  0xe0   : > { %5932 = vmatpush1.bf16.msra.mxu1 %v10317_v44  ;;  %v10410_v44 = vld [vmem:[%s11362_s5 + $0x5d0] ss:$12 sps:$4 sm:$0xff]  }
  0xe1   : > { %6224 = vmatpush1.bf16.msra.mxu0 %v10320_v45  ;;  %5933 = vmatprep.subr.bf16.mxu1 %v10325_v46  ;;  %v10415_v45 = vld [vmem:[%s11362_s5 + $0xbd0] ss:$12 sps:$4 sm:$0xff]   ;;  %v10421_v46 = vld [vmem:[%s11362_s5 + $0x5ec] ss:$12 sps:$4 sm:$0xff]  }
  0xe2   : > { %6225 = vmatprep.subr.bf16.mxu0 %v10328_v47  ;;  %v10424_v47 = vld [vmem:[%s11362_s5 + $0xbec] ss:$12 sps:$4 sm:$0xff]  }
  0xe3   : > { %5899 = vmatmul.mubr.bf16.gmra.mrb[4].mxu1 %v10373_v50  ;;  %v10425_v50 = vld [vmem:[%s13325_s0 + $0x18] ss:$120 sps:$4 sm:$0xff]  }
  0xe4   : > { %6191 = vmatmul.mubr.bf16.gmra.mrb[4].mxu0 %v10382_v51  ;;  %5934 = vmatpush1.bf16.msra.mxu1 %v10323_v48  ;;  %v10419_v48 = vld [vmem:[%s11362_s5 + $0x5e8] ss:$12 sps:$4 sm:$0xff]   ;;  %v10428_v51 = vld [vmem:[%s13325_s0 + $0x38] ss:$120 sps:$4 sm:$0xff]  }
  0xe5   : > { %6226 = vmatpush1.bf16.msra.mxu0 %v10326_v49  ;;  %5935 = vmatprep.subr.bf16.mxu1 %v10331_v52  ;;  %v10422_v49 = vld [vmem:[%s11362_s5 + $0xbe8] ss:$12 sps:$4 sm:$0xff]   ;;  %v10433_v52 = vld [vmem:[%s11362_s5 + $0xc04] ss:$12 sps:$4 sm:$0xff]  }
  0xe6   : > { %6227 = vmatprep.subr.bf16.mxu0 %v10334_v53  ;;  %5908 = vmatprep.mubr.bf16.mxu1 %v10389_v55  ;;  %v10434_v53 = vld [vmem:[%s11362_s5 + $0xc8] ss:$12 sps:$4 sm:$0xff]  }
  0xe7   : > { %6200 = vmatprep.mubr.bf16.mxu0 %v10395_v56  ;;  %v10435_v55 = vld [vmem:[%s11362_s5 + $0x8] ss:$12 sps:$4 sm:$0xff]  }
  0xe8   : > { %5936 = vmatpush1.bf16.msra.mxu1 %v10329_v54  ;;  %v10431_v54 = vld [vmem:[%s11362_s5 + $0xc00] ss:$12 sps:$4 sm:$0xff]   ;;  %v10438_v56 = vld [vmem:[%s11362_s5 + $0xc1c] ss:$12 sps:$4 sm:$0xff]  }
  0xe9   : > { %6228 = vmatpush1.bf16.msra.mxu0 %v10332_v57  ;;  %5937 = vmatprep.subr.bf16.mxu1 %v10337_v58  ;;  %v10439_v57 = vld [vmem:[%s11362_s5 + $0xe0] ss:$12 sps:$4 sm:$0xff]  }
  0xea   : > { %6229 = vmatprep.subr.bf16.mxu0 %v10340_v59  ;;  %v10441_v58 = vld [vmem:[%s13325_s0 + $0x10c] ss:$120 sps:$4 sm:$0xff]  }
  0xeb   : > { %5909 = vmatmul.mubr.bf16.gmra.mrb[8].mxu1 %v10391_v62  ;;  %v10490_v59 = vld [vmem:[%s13325_s0 + $0x12c] ss:$120 sps:$4 sm:$0xff]   ;;  %v10446_v62 = vld [vmem:[%s11362_s5 + $0xc34] ss:$12 sps:$4 sm:$0xff]  }
  0xec   : > { %6201 = vmatmul.mubr.bf16.gmra.mrb[8].mxu0 %v10400_v63  ;;  %5938 = vmatpush1.bf16.msra.mxu1 %v10335_v60  ;;  %v10436_v60 = vld [vmem:[%s11362_s5 + $0xc18] ss:$12 sps:$4 sm:$0xff]   ;;  %v10443_v63 = vld [vmem:[%s13325_s0 + $0x108] ss:$120 sps:$4 sm:$0xff]  }
  0xed   : > { %6230 = vmatpush1.bf16.msra.mxu0 %v10338_v61  ;;  %5939 = vmatprep.subr.bf16.mxu1 %v10343_v0  ;;  %v10440_v61 = vld [vmem:[%s11362_s5 + $0x20] ss:$12 sps:$4 sm:$0xff]   ;;  %v10447_v0 = vld [vmem:[%s11362_s5 + $0xf8] ss:$12 sps:$4 sm:$0xff]  }
  0xee   : > { %6231 = vmatprep.subr.bf16.mxu0 %v10346_v1  ;;  %5918 = vmatprep.mubr.bf16.mxu1 %v10407_v3  ;;  %v10444_v1 = vld [vmem:[%s11362_s5 + $0xc30] ss:$12 sps:$4 sm:$0xff]   ;;  %v10496_v3 = vld [vmem:[%s13325_s0 + $0x128] ss:$120 sps:$4 sm:$0xff]  }
  0xef   : > { %6210 = vmatprep.mubr.bf16.mxu0 %v10413_v4  ;;  %v10451_v4 = vld [vmem:[%s11362_s5 + $0xc4c] ss:$12 sps:$4 sm:$0xff]  }
  0xf0   : > { %5940 = vmatpush1.bf16.msra.mxu1 %v10341_v2  ;;  %v10448_v2 = vld [vmem:[%s11362_s5 + $0x38] ss:$12 sps:$4 sm:$0xff]  }
  0xf1   : > { %6232 = vmatpush1.bf16.msra.mxu0 %v10344_v5  ;;  %5941 = vmatprep.subr.bf16.mxu1 %v10349_v6  ;;  %v10452_v5 = vld [vmem:[%s11362_s5 + $0x110] ss:$12 sps:$4 sm:$0xff]  }
  0xf2   : > { %6233 = vmatprep.subr.bf16.mxu0 %v10352_v7  ;;  %v10454_v6 = vld [vmem:[%s13325_s0 + $0x1fc] ss:$120 sps:$4 sm:$0xff]  }
  0xf3   : > { %5919 = vmatmul.mubr.bf16.gmra.mrb[12].mxu1 %v10409_v10  ;;  %v10503_v7 = vld [vmem:[%s13325_s0 + $0x21c] ss:$120 sps:$4 sm:$0xff]   ;;  %v10459_v10 = vld [vmem:[%s11362_s5 + $0xc64] ss:$12 sps:$4 sm:$0xff]  }
  0xf4   : > { %6211 = vmatmul.mubr.bf16.gmra.mrb[12].mxu0 %v10418_v11  ;;  %5942 = vmatpush1.bf16.msra.mxu1 %v10347_v8  ;;  %v10449_v8 = vld [vmem:[%s11362_s5 + $0xc48] ss:$12 sps:$4 sm:$0xff]   ;;  %v10456_v11 = vld [vmem:[%s13325_s0 + $0x1f8] ss:$120 sps:$4 sm:$0xff]  }
  0xf5   : > { %6234 = vmatpush1.bf16.msra.mxu0 %v10350_v9  ;;  %5943 = vmatprep.subr.bf16.mxu1 %v10355_v12  ;;  %v10453_v9 = vld [vmem:[%s11362_s5 + $0x50] ss:$12 sps:$4 sm:$0xff]   ;;  %v10460_v12 = vld [vmem:[%s11362_s5 + $0x128] ss:$12 sps:$4 sm:$0xff]  }
  0xf6   : > { %6235 = vmatprep.subr.bf16.mxu0 %v10358_v13  ;;  %5961 = vmatprep.mubr.bf16.mxu1 %v10427_v15  ;;  %v10457_v13 = vld [vmem:[%s11362_s5 + $0xc60] ss:$12 sps:$4 sm:$0xff]   ;;  %v10464_v15 = vld [vmem:[%s11362_s5 + $0xc7c] ss:$12 sps:$4 sm:$0xff]  }
  0xf7   : > { %6253 = vmatprep.mubr.bf16.mxu0 %v10430_v16  ;;  %v10509_v16 = vld [vmem:[%s13325_s0 + $0x218] ss:$120 sps:$4 sm:$0xff]  }
  0xf8   : > { %5944 = vmatpush1.bf16.msra.mxu1 %v10353_v14  ;;  %v10461_v14 = vld [vmem:[%s11362_s5 + $0x68] ss:$12 sps:$4 sm:$0xff]  }
  0xf9   : > { %6236 = vmatpush1.bf16.msra.mxu0 %v10356_v17  ;;  %5945 = vmatprep.subr.bf16.mxu1 %v10361_v18  ;;  %v10465_v17 = vld [vmem:[%s11362_s5 + $0x140] ss:$12 sps:$4 sm:$0xff]  }
  0xfa   : > { %6237 = vmatprep.subr.bf16.mxu0 %v10364_v19  ;;  %v10467_v18 = vld [vmem:[%s13325_s0 + $0x2ec] ss:$120 sps:$4 sm:$0xff]  }
  0xfb   : > { %v10516_v19 = vld [vmem:[%s13325_s0 + $0x30c] ss:$120 sps:$4 sm:$0xff]  }
  0xfc   : > { %5946 = vmatpush1.bf16.msra.mxu1 %v10359_v20  ;;  %v10462_v20 = vld [vmem:[%s11362_s5 + $0xc78] ss:$12 sps:$4 sm:$0xff]  }
  0xfd   : > { %6238 = vmatpush1.bf16.msra.mxu0 %v10362_v21  ;;  %5947 = vmatprep.subr.bf16.mxu1 %v10367_v22  ;;  %v10466_v21 = vld [vmem:[%s11362_s5 + $0x80] ss:$12 sps:$4 sm:$0xff]  }
  0xfe   : > { %6239 = vmatprep.subr.bf16.mxu0 %v10370_v23  ;;  %v10472_v22 = vld [vmem:[%s11362_s5 + $0xc94] ss:$12 sps:$4 sm:$0xff]  }
  0xff   : > { %v10469_v23 = vld [vmem:[%s13325_s0 + $0x2e8] ss:$120 sps:$4 sm:$0xff]  }
 0x100   : > { %5948 = vmatpush1.bf16.msra.mxu1 %v10365_v24  ;;  %v10473_v24 = vld [vmem:[%s11362_s5 + $0x158] ss:$12 sps:$4 sm:$0xff]  }
 0x101   : > { %6240 = vmatpush1.bf16.msra.mxu0 %v10368_v25  ;;  %5949 = vmatprep.subr.bf16.mxu1 %v10376_v26  ;;  %v10470_v25 = vld [vmem:[%s11362_s5 + $0xc90] ss:$12 sps:$4 sm:$0xff]   ;;  %v10474_v26 = vld [vmem:[%s11362_s5 + $0x98] ss:$12 sps:$4 sm:$0xff]  }
 0x102   : > { %6241 = vmatprep.subr.bf16.mxu0 %v10381_v27  ;;  %v10522_v27 = vld [vmem:[%s13325_s0 + $0x308] ss:$120 sps:$4 sm:$0xff]  }
 0x104   : > { %5950 = vmatpush1.bf16.msra.mxu1 %v10374_v28  ;;  %v10477_v28 = vld [vmem:[%s11362_s5 + $0xcac] ss:$12 sps:$4 sm:$0xff]  }
 0x105   : > { %6242 = vmatpush1.bf16.msra.mxu0 %v10379_v29  ;;  %5951 = vmatprep.subr.bf16.mxu1 %v10385_v30  ;;  %v10478_v29 = vld [vmem:[%s11362_s5 + $0x170] ss:$12 sps:$4 sm:$0xff]  }
 0x106   : > { %6243 = vmatprep.subr.bf16.mxu0 %v10388_v31  ;;  %v10531_v30 = vld [vmem:[%s13325_s0 + $0x44] ss:$120 sps:$4 sm:$0xff]   ;;  %v10475_v31 = vld [vmem:[%s11362_s5 + $0xca8] ss:$12 sps:$4 sm:$0xff]  }
 0x108   : > { %5952 = vmatpush1.bf16.msra.mxu1 %v10383_v32  ;;  %v10479_v32 = vld [vmem:[%s11362_s5 + $0xb0] ss:$12 sps:$4 sm:$0xff]  }
 0x109   : > { %6244 = vmatpush1.bf16.msra.mxu0 %v10386_v33  ;;  %5953 = vmatprep.subr.bf16.mxu1 %v10394_v34  ;;  %v10482_v33 = vld [vmem:[%s11362_s5 + $0xcc4] ss:$12 sps:$4 sm:$0xff]   ;;  %v10483_v34 = vld [vmem:[%s11362_s5 + $0x248] ss:$12 sps:$4 sm:$0xff]  }
 0x10a   : > { %6245 = vmatprep.subr.bf16.mxu0 %v10399_v35  ;;  %v11115_v35 = vld [vmem:[%s13325_s0 + $0x4] ss:$120 sps:$4 sm:$0xff]  }
 0x10c   : > { %5954 = vmatpush1.bf16.msra.mxu1 %v10392_v36  ;;  %v10480_v36 = vld [vmem:[%s11362_s5 + $0xcc0] ss:$12 sps:$4 sm:$0xff]  }
 0x10d   : > { %6246 = vmatpush1.bf16.msra.mxu0 %v10397_v37  ;;  %5955 = vmatprep.subr.bf16.mxu1 %v10403_v38  ;;  %v10484_v37 = vld [vmem:[%s11362_s5 + $0x188] ss:$12 sps:$4 sm:$0xff]  }
 0x10e   : > { %6247 = vmatprep.subr.bf16.mxu0 %v10406_v39  ;;  %v10487_v38 = vld [vmem:[%s11362_s5 + $0xcdc] ss:$12 sps:$4 sm:$0xff]   ;;  %v10488_v39 = vld [vmem:[%s11362_s5 + $0x260] ss:$12 sps:$4 sm:$0xff]  }
 0x110   : > { %5956 = vmatpush1.bf16.msra.mxu1 %v10401_v40  ;;  %v10485_v40 = vld [vmem:[%s11362_s5 + $0xcd8] ss:$12 sps:$4 sm:$0xff]  }
 0x111   : > { %6248 = vmatpush1.bf16.msra.mxu0 %v10404_v41  ;;  %5957 = vmatprep.subr.bf16.mxu1 %v10412_v42  ;;  %v11116_v41 = vld [vmem:[%s13325_s0] ss:$120 sps:$4 sm:$0xff]  }
 0x112   : > { %6249 = vmatprep.subr.bf16.mxu0 %v10417_v43  ;;  %v10489_v42 = vld [vmem:[%s11362_s5 + $0x1a0] ss:$12 sps:$4 sm:$0xff]  }
 0x113   : > { %v10494_v43 = vld [vmem:[%s11362_s5 + $0xcf4] ss:$12 sps:$4 sm:$0xff]  }
 0x114   : > { %5958 = vmatpush1.bf16.msra.mxu1 %v10410_v44  ;;  %v10495_v44 = vld [vmem:[%s11362_s5 + $0x278] ss:$12 sps:$4 sm:$0xff]  }
 0x115   : > { %6250 = vmatpush1.bf16.msra.mxu0 %v10415_v45  ;;  %5959 = vmatprep.subr.bf16.mxu1 %v10421_v46  ;;  %v11117_v45 = vld [vmem:[%s13325_s0 + $0xf4] ss:$120 sps:$4 sm:$0xff]   ;;  %v10492_v46 = vld [vmem:[%s11362_s5 + $0xcf0] ss:$12 sps:$4 sm:$0xff]  }
 0x116   : > { %6251 = vmatprep.subr.bf16.mxu0 %v10424_v47  ;;  %v10497_v47 = vld [vmem:[%s11362_s5 + $0x1b8] ss:$12 sps:$4 sm:$0xff]  }
 0x118   : > { %5960 = vmatpush1.bf16.msra.mxu1 %v10419_v48  ;;  %v10500_v48 = vld [vmem:[%s11362_s5 + $0xd0c] ss:$12 sps:$4 sm:$0xff]  }
 0x119   : > { %6252 = vmatpush1.bf16.msra.mxu0 %v10422_v49  ;;  %9083 = vmatprep.subr.bf16.mxu1 %v10434_v53  ;;  %v10501_v49 = vld [vmem:[%s11362_s5 + $0x290] ss:$12 sps:$4 sm:$0xff]  }
 0x11a   : > { %6294 = vmatprep.subr.bf16.mxu0 %v10433_v52  ;;  %v10502_v52 = vld [vmem:[%s11362_s5 + $0x1d0] ss:$12 sps:$4 sm:$0xff]  }
 0x11b   : > { %5962 = vmatmul.mubr.bf16.vlgmr.msra.gmra.mrb[0].mxu1 %v10425_v50  ;;  %v10498_v50 = vld [vmem:[%s11362_s5 + $0xd08] ss:$12 sps:$4 sm:$0xff]   ;;  %v10507_v53 = vld [vmem:[%s11362_s5 + $0xd24] ss:$12 sps:$4 sm:$0xff]  }
 0x11c   : > { %6254 = vmatmul.mubr.bf16.vlgmr.msra.gmra.mrb[0].mxu0 %v10428_v51  ;;  %9084 = vmatpush3.bf16.msra.mxu1 %v10435_v55  ;;  %v11118_v51 = vld [vmem:[%s13325_s0 + $0xf0] ss:$120 sps:$4 sm:$0xff]   ;;  %v11119_v55 = vld [vmem:[%s13325_s0 + $0x1e4] ss:$120 sps:$4 sm:$0xff]  }
 0x11d   : > { %6295 = vmatpush1.bf16.msra.mxu0 %v10431_v54  ;;  %9085 = vmatprep.subr.bf16.mxu1 %v10439_v57  ;;  %v10508_v54 = vld [vmem:[%s11362_s5 + $0x2a8] ss:$12 sps:$4 sm:$0xff]  }
 0x11e   : > { %6296 = vmatprep.subr.bf16.mxu0 %v10438_v56  ;;  %5971 = vmatprep.mubr.bf16.mxu1 %v10441_v58  ;;  %v10505_v56 = vld [vmem:[%s11362_s5 + $0xd20] ss:$12 sps:$4 sm:$0xff]   ;;  %v10510_v57 = vld [vmem:[%s11362_s5 + $0x1e8] ss:$12 sps:$4 sm:$0xff]  }
 0x11f   : > { %6263 = vmatprep.mubr.bf16.mxu0 %v10490_v59  ;;  %v10513_v58 = vld [vmem:[%s11362_s5 + $0xd3c] ss:$12 sps:$4 sm:$0xff]   ;;  %v10514_v59 = vld [vmem:[%s11362_s5 + $0x2c0] ss:$12 sps:$4 sm:$0xff]  }
 0x120   : > { %9086 = vmatpush3.bf16.msra.mxu1 %v10440_v61  ;;  %v11120_v61 = vld [vmem:[%s13325_s0 + $0x1e0] ss:$120 sps:$4 sm:$0xff]  }
 0x121   : > { %6297 = vmatpush1.bf16.msra.mxu0 %v10436_v60  ;;  %9087 = vmatprep.subr.bf16.mxu1 %v10447_v0  ;;  %v10511_v60 = vld [vmem:[%s11362_s5 + $0xd38] ss:$12 sps:$4 sm:$0xff]  }
 0x122   : > { %6298 = vmatprep.subr.bf16.mxu0 %v10446_v62  ;;  %v10515_v62 = vld [vmem:[%s11362_s5 + $0x200] ss:$12 sps:$4 sm:$0xff]   ;;  %v10521_v0 = vld [vmem:[%s11362_s5 + $0x2d8] ss:$12 sps:$4 sm:$0xff]  }
 0x123   : > { %5972 = vmatmul.mubr.bf16.gmra.mrb[4].mxu1 %v10443_v63  ;;  %v10520_v63 = vld [vmem:[%s11362_s5 + $0xd54] ss:$12 sps:$4 sm:$0xff]  }
 0x124   : > { %6264 = vmatmul.mubr.bf16.gmra.mrb[4].mxu0 %v10496_v3  ;;  %9088 = vmatpush3.bf16.msra.mxu1 %v10448_v2  ;;  %v10518_v2 = vld [vmem:[%s11362_s5 + $0xd50] ss:$12 sps:$4 sm:$0xff]   ;;  %v10523_v3 = vld [vmem:[%s11362_s5 + $0x218] ss:$12 sps:$4 sm:$0xff]  }
 0x125   : > { %6299 = vmatpush1.bf16.msra.mxu0 %v10444_v1  ;;  %9089 = vmatprep.subr.bf16.mxu1 %v10452_v5  ;;  %v11121_v1 = vld [vmem:[%s13325_s0 + $0x2d4] ss:$120 sps:$4 sm:$0xff]   ;;  %v10527_v5 = vld [vmem:[%s11362_s5 + $0x2f0] ss:$12 sps:$4 sm:$0xff]  }
 0x126   : > { %6300 = vmatprep.subr.bf16.mxu0 %v10451_v4  ;;  %5981 = vmatprep.mubr.bf16.mxu1 %v10454_v6  ;;  %v10526_v4 = vld [vmem:[%s11362_s5 + $0xd6c] ss:$12 sps:$4 sm:$0xff]   ;;  %v10524_v6 = vld [vmem:[%s11362_s5 + $0xd68] ss:$12 sps:$4 sm:$0xff]  }
 0x127   : > { %6273 = vmatprep.mubr.bf16.mxu0 %v10503_v7  ;;  %v11122_v7 = vld [vmem:[%s13325_s0 + $0x2d0] ss:$120 sps:$4 sm:$0xff]  }
 0x128   : > { %9090 = vmatpush3.bf16.msra.mxu1 %v10453_v9  ;;  %v10534_v9 = vld [vmem:[%s11362_s5 + $0xd84] ss:$12 sps:$4 sm:$0xff]  }
 0x129   : > { %6301 = vmatpush1.bf16.msra.mxu0 %v10449_v8  ;;  %9091 = vmatprep.subr.bf16.mxu1 %v10460_v12  ;;  %v10528_v8 = vld [vmem:[%s11362_s5 + $0x230] ss:$12 sps:$4 sm:$0xff]   ;;  %v10529_v12 = vld [vmem:[%s13325_s0 + $0x40] ss:$120 sps:$4 sm:$0xff]  }
 0x12a   : > { %6302 = vmatprep.subr.bf16.mxu0 %v10459_v10  ;;  %v10535_v10 = vld [vmem:[%s11362_s5 + $0x3c8] ss:$12 sps:$4 sm:$0xff]  }
 0x12b   : > { %5982 = vmatmul.mubr.bf16.gmra.mrb[8].mxu1 %v10456_v11  ;;  %v11123_v11 = vld [vmem:[%s13325_s0 + $0xc] ss:$120 sps:$4 sm:$0xff]  }
 0x12c   : > { %6274 = vmatmul.mubr.bf16.gmra.mrb[8].mxu0 %v10509_v16  ;;  %9092 = vmatpush3.bf16.msra.mxu1 %v10461_v14  ;;  %v10536_v14 = vld [vmem:[%s11362_s5 + $0x308] ss:$12 sps:$4 sm:$0xff]   ;;  %v10540_v16 = vld [vmem:[%s11362_s5 + $0x3e0] ss:$12 sps:$4 sm:$0xff]  }
 0x12d   : > { %6303 = vmatpush1.bf16.msra.mxu0 %v10457_v13  ;;  %9093 = vmatprep.subr.bf16.mxu1 %v10465_v17  ;;  %v10532_v13 = vld [vmem:[%s11362_s5 + $0xd80] ss:$12 sps:$4 sm:$0xff]   ;;  %v10537_v17 = vld [vmem:[%s11362_s5 + $0xd98] ss:$12 sps:$4 sm:$0xff]  }
 0x12e   : > { %6304 = vmatprep.subr.bf16.mxu0 %v10464_v15  ;;  %5991 = vmatprep.mubr.bf16.mxu1 %v10467_v18  ;;  %v10539_v15 = vld [vmem:[%s11362_s5 + $0xd9c] ss:$12 sps:$4 sm:$0xff]   ;;  %v10582_v18 = vld [vmem:[%s13325_s0 + $0x134] ss:$120 sps:$4 sm:$0xff]  }
 0x12f   : > { %6283 = vmatprep.mubr.bf16.mxu0 %v10516_v19  ;;  %v11124_v19 = vld [vmem:[%s13325_s0 + $0x8] ss:$120 sps:$4 sm:$0xff]  }
 0x130   : > { %9094 = vmatpush3.bf16.msra.mxu1 %v10466_v21  ;;  %v10544_v21 = vld [vmem:[%s11362_s5 + $0xdb4] ss:$12 sps:$4 sm:$0xff]  }
 0x131   : > { %6305 = vmatpush1.bf16.msra.mxu0 %v10462_v20  ;;  %9095 = vmatprep.subr.bf16.mxu1 %v10473_v24  ;;  %v10541_v20 = vld [vmem:[%s11362_s5 + $0x320] ss:$12 sps:$4 sm:$0xff]   ;;  %v10542_v24 = vld [vmem:[%s11362_s5 + $0xdb0] ss:$12 sps:$4 sm:$0xff]  }
 0x132   : > { %6306 = vmatprep.subr.bf16.mxu0 %v10472_v22  ;;  %v10545_v22 = vld [vmem:[%s11362_s5 + $0x3f8] ss:$12 sps:$4 sm:$0xff]  }
 0x133   : > { %5992 = vmatmul.mubr.bf16.gmra.mrb[12].mxu1 %v10469_v23  ;;  %v11125_v23 = vld [vmem:[%s13325_s0 + $0xfc] ss:$120 sps:$4 sm:$0xff]  }
 0x134   : > { %6284 = vmatmul.mubr.bf16.gmra.mrb[12].mxu0 %v10522_v27  ;;  %9096 = vmatpush3.bf16.msra.mxu1 %v10474_v26  ;;  %v10588_v26 = vld [vmem:[%s13325_s0 + $0x130] ss:$120 sps:$4 sm:$0xff]   ;;  %v10549_v27 = vld [vmem:[%s11362_s5 + $0xdcc] ss:$12 sps:$4 sm:$0xff]  }
 0x135   : > { %6307 = vmatpush1.bf16.msra.mxu0 %v10470_v25  ;;  %9097 = vmatprep.subr.bf16.mxu1 %v10478_v29  ;;  %v10546_v25 = vld [vmem:[%s11362_s5 + $0x338] ss:$12 sps:$4 sm:$0xff]   ;;  %v10547_v29 = vld [vmem:[%s11362_s5 + $0xdc8] ss:$12 sps:$4 sm:$0xff]  }
 0x136   : > { %6308 = vmatprep.subr.bf16.mxu0 %v10477_v28  ;;  %6837 = vmatprep.mubr.bf16.mxu1 %v11115_v35  ;;  %v10550_v28 = vld [vmem:[%s11362_s5 + $0x410] ss:$12 sps:$4 sm:$0xff]   ;;  %v11127_v35 = vld [vmem:[%s13325_s0 + $0x1ec] ss:$120 sps:$4 sm:$0xff]  }
 0x137   : > { %6326 = vmatprep.mubr.bf16.mxu0 %v10531_v30  ;;  %v10595_v30 = vld [vmem:[%s13325_s0 + $0x224] ss:$120 sps:$4 sm:$0xff]  }
 0x138   : > { %9098 = vmatpush3.bf16.msra.mxu1 %v10479_v32  ;;  %v10551_v32 = vld [vmem:[%s11362_s5 + $0x350] ss:$12 sps:$4 sm:$0xff]  }
 0x139   : > { %6309 = vmatpush1.bf16.msra.mxu0 %v10475_v31  ;;  %9123 = vmatprep.subr.bf16.mxu1 %v10483_v34  ;;  %v11126_v31 = vld [vmem:[%s13325_s0 + $0xf8] ss:$120 sps:$4 sm:$0xff]   ;;  %v10555_v34 = vld [vmem:[%s11362_s5 + $0x428] ss:$12 sps:$4 sm:$0xff]  }
 0x13a   : > { %6310 = vmatprep.subr.bf16.mxu0 %v10482_v33  ;;  %v10554_v33 = vld [vmem:[%s11362_s5 + $0xde4] ss:$12 sps:$4 sm:$0xff]  }
 0x13b   : > { %6838 = vmatmul.mubr.bf16.vlgmr.msra.gmra.mrb[16].mxu1 %v11116_v41  ;;  %v10608_v41 = vld [vmem:[%s13325_s0 + $0x314] ss:$120 sps:$4 sm:$0xff]  }
 0x13c   : > { %9124 = vmatpush3.bf16.msra.mxu1 %v10484_v37  ;;  %6845 = vmatprep.mubr.bf16.mxu1 %v11117_v45  ;;  %v10601_v37 = vld [vmem:[%s13325_s0 + $0x220] ss:$120 sps:$4 sm:$0xff]  }
 0x13d   : > { %6311 = vmatpush1.bf16.msra.mxu0 %v10480_v36  ;;  %9125 = vmatprep.subr.bf16.mxu1 %v10488_v39  ;;  %v10552_v36 = vld [vmem:[%s11362_s5 + $0xde0] ss:$12 sps:$4 sm:$0xff]   ;;  %v10559_v39 = vld [vmem:[%s11362_s5 + $0xdfc] ss:$12 sps:$4 sm:$0xff]  }
 0x13e   : > { %6312 = vmatprep.subr.bf16.mxu0 %v10487_v38  ;;  %v10556_v38 = vld [vmem:[%s11362_s5 + $0x368] ss:$12 sps:$4 sm:$0xff]  }
 0x13f   : > { %v10564_v45 = vld [vmem:[%s11362_s5 + $0xe14] ss:$12 sps:$4 sm:$0xff]  }
 0x140   : > { %9126 = vmatpush3.bf16.msra.mxu1 %v10489_v42  ;;  %v11128_v42 = vld [vmem:[%s13325_s0 + $0x1e8] ss:$120 sps:$4 sm:$0xff]  }
 0x141   : > { %6313 = vmatpush1.bf16.msra.mxu0 %v10485_v40  ;;  %9127 = vmatprep.subr.bf16.mxu1 %v10495_v44  ;;  %v10560_v40 = vld [vmem:[%s11362_s5 + $0x440] ss:$12 sps:$4 sm:$0xff]  }
 0x142   : > { %6314 = vmatprep.subr.bf16.mxu0 %v10494_v43  ;;  %v10557_v43 = vld [vmem:[%s11362_s5 + $0xdf8] ss:$12 sps:$4 sm:$0xff]   ;;  %v10561_v44 = vld [vmem:[%s11362_s5 + $0x380] ss:$12 sps:$4 sm:$0xff]  }
 0x143   : > { %6846 = vmatmul.mubr.bf16.gmra.mrb[20].mxu1 %v11118_v51  ;;  %v10569_v51 = vld [vmem:[%s11362_s5 + $0xe2c] ss:$12 sps:$4 sm:$0xff]  }
 0x144   : > { %9128 = vmatpush3.bf16.msra.mxu1 %v10497_v47  ;;  %6853 = vmatprep.mubr.bf16.mxu1 %v11119_v55  ;;  %v11129_v47 = vld [vmem:[%s13325_s0 + $0x2dc] ss:$120 sps:$4 sm:$0xff]  }
 0x145   : > { %6315 = vmatpush1.bf16.msra.mxu0 %v10492_v46  ;;  %9129 = vmatprep.subr.bf16.mxu1 %v10501_v49  ;;  %v10565_v46 = vld [vmem:[%s11362_s5 + $0x458] ss:$12 sps:$4 sm:$0xff]   ;;  %v10567_v55 = vld [vmem:[%s11362_s5 + $0xe28] ss:$12 sps:$4 sm:$0xff]  }
 0x146   : > { %6316 = vmatprep.subr.bf16.mxu0 %v10500_v48  ;;  %v10562_v48 = vld [vmem:[%s11362_s5 + $0xe10] ss:$12 sps:$4 sm:$0xff]   ;;  %v10566_v49 = vld [vmem:[%s11362_s5 + $0x398] ss:$12 sps:$4 sm:$0xff]  }
 0x148   : > { %9130 = vmatpush3.bf16.msra.mxu1 %v10502_v52  ;;  %v10570_v52 = vld [vmem:[%s11362_s5 + $0x470] ss:$12 sps:$4 sm:$0xff]  }
 0x149   : > { %6317 = vmatpush1.bf16.msra.mxu0 %v10498_v50  ;;  %9131 = vmatprep.subr.bf16.mxu1 %v10508_v54  ;;  %v10614_v50 = vld [vmem:[%s13325_s0 + $0x310] ss:$120 sps:$4 sm:$0xff]  }
 0x14a   : > { %6318 = vmatprep.subr.bf16.mxu0 %v10507_v53  ;;  %v10623_v53 = vld [vmem:[%s13325_s0 + $0x4c] ss:$120 sps:$4 sm:$0xff]   ;;  %v11130_v54 = vld [vmem:[%s13325_s0 + $0x2d8] ss:$120 sps:$4 sm:$0xff]  }
 0x14b   : > { %6854 = vmatmul.mubr.bf16.gmra.mrb[24].mxu1 %v11120_v61  ;;  %v10576_v61 = vld [vmem:[%s11362_s5 + $0x488] ss:$12 sps:$4 sm:$0xff]  }
 0x14c   : > { %9132 = vmatpush3.bf16.msra.mxu1 %v10510_v57  ;;  %6861 = vmatprep.mubr.bf16.mxu1 %v11121_v1  ;;  %v10574_v57 = vld [vmem:[%s11362_s5 + $0xe44] ss:$12 sps:$4 sm:$0xff]  }
 0x14d   : > { %6319 = vmatpush1.bf16.msra.mxu0 %v10505_v56  ;;  %9133 = vmatprep.subr.bf16.mxu1 %v10514_v59  ;;  %v10571_v56 = vld [vmem:[%s11362_s5 + $0x3b0] ss:$12 sps:$4 sm:$0xff]   ;;  %v11131_v59 = vld [vmem:[%s13325_s0 + $0x14] ss:$120 sps:$4 sm:$0xff]   ;;  %v10577_v1 = vld [vmem:[%s11362_s5 + $0xe58] ss:$12 sps:$4 sm:$0xff]  }
 0x14e   : > { %6320 = vmatprep.subr.bf16.mxu0 %v10513_v58  ;;  %v10575_v58 = vld [vmem:[%s11362_s5 + $0x548] ss:$12 sps:$4 sm:$0xff]  }
 0x150   : > { %9134 = vmatpush3.bf16.msra.mxu1 %v10515_v62  ;;  %v10579_v62 = vld [vmem:[%s11362_s5 + $0xe5c] ss:$12 sps:$4 sm:$0xff]  }
 0x151   : > { %6321 = vmatpush1.bf16.msra.mxu0 %v10511_v60  ;;  %9135 = vmatprep.subr.bf16.mxu1 %v10521_v0  ;;  %v10572_v60 = vld [vmem:[%s11362_s5 + $0xe40] ss:$12 sps:$4 sm:$0xff]   ;;  %v11132_v0 = vld [vmem:[%s13325_s0 + $0x10] ss:$120 sps:$4 sm:$0xff]  }
 0x152   : > { %6322 = vmatprep.subr.bf16.mxu0 %v10520_v63  ;;  %v10580_v63 = vld [vmem:[%s11362_s5 + $0x560] ss:$12 sps:$4 sm:$0xff]  }
 0x153   : > { %6862 = vmatmul.mubr.bf16.gmra.mrb[28].mxu1 %v11122_v7  ;;  %v10589_v7 = vld [vmem:[%s11362_s5 + $0x4b8] ss:$12 sps:$4 sm:$0xff]  }
 0x154   : > { %9136 = vmatpush3.bf16.msra.mxu1 %v10523_v3  ;;  %6902 = vmatprep.mubr.bf16.mxu1 %v11123_v11  ;;  %v10586_v3 = vld [vmem:[%s11362_s5 + $0xe74] ss:$12 sps:$4 sm:$0xff]  }
 0x155   : > { %6323 = vmatpush1.bf16.msra.mxu0 %v10518_v2  ;;  %9137 = vmatprep.subr.bf16.mxu1 %v10527_v5  ;;  %v10581_v2 = vld [vmem:[%s11362_s5 + $0x4a0] ss:$12 sps:$4 sm:$0xff]   ;;  %v11133_v5 = vld [vmem:[%s13325_s0 + $0x104] ss:$120 sps:$4 sm:$0xff]   ;;  %v10590_v11 = vld [vmem:[%s11362_s5 + $0xe88] ss:$12 sps:$4 sm:$0xff]  }
 0x156   : > { %6324 = vmatprep.subr.bf16.mxu0 %v10526_v4  ;;  %v10587_v4 = vld [vmem:[%s11362_s5 + $0x578] ss:$12 sps:$4 sm:$0xff]  }
 0x158   : > { %9138 = vmatpush3.bf16.msra.mxu1 %v10528_v8  ;;  %v10592_v8 = vld [vmem:[%s11362_s5 + $0xe8c] ss:$12 sps:$4 sm:$0xff]  }
 0x159   : > { %6325 = vmatpush1.bf16.msra.mxu0 %v10524_v6  ;;  %9163 = vmatprep.subr.bf16.mxu1 %v10535_v10  ;;  %v10584_v6 = vld [vmem:[%s11362_s5 + $0xe70] ss:$12 sps:$4 sm:$0xff]   ;;  %v11134_v10 = vld [vmem:[%s13325_s0 + $0x100] ss:$120 sps:$4 sm:$0xff]  }
 0x15a   : > { %6367 = vmatprep.subr.bf16.mxu0 %v10534_v9  ;;  %v10593_v9 = vld [vmem:[%s11362_s5 + $0x590] ss:$12 sps:$4 sm:$0xff]  }
 0x15b   : > { %6903 = vmatmul.mubr.bf16.vlgmr.msra.gmra.mrb[32].mxu1 %v11124_v19  ;;  %v10606_v19 = vld [vmem:[%s11362_s5 + $0x5c0] ss:$12 sps:$4 sm:$0xff]  }
 0x15c   : > { %6327 = vmatmul.mubr.bf16.vlgmr.msra.gmra.mrb[0].mxu0 %v10529_v12  ;;  %9164 = vmatpush3.bf16.msra.mxu1 %v10536_v14  ;;  %v10594_v12 = vld [vmem:[%s11362_s5 + $0x4d0] ss:$12 sps:$4 sm:$0xff]   ;;  %v10600_v14 = vld [vmem:[%s11362_s5 + $0x5a8] ss:$12 sps:$4 sm:$0xff]  }
 0x15d   : > { %6368 = vmatpush1.bf16.msra.mxu0 %v10532_v13  ;;  %9165 = vmatprep.subr.bf16.mxu1 %v10540_v16  ;;  %v10599_v13 = vld [vmem:[%s11362_s5 + $0xea4] ss:$12 sps:$4 sm:$0xff]   ;;  %v10597_v16 = vld [vmem:[%s11362_s5 + $0xea0] ss:$12 sps:$4 sm:$0xff]  }
 0x15e   : > { %6369 = vmatprep.subr.bf16.mxu0 %v10539_v15  ;;  %6910 = vmatprep.mubr.bf16.mxu1 %v11125_v23  ;;  %v11135_v15 = vld [vmem:[%s13325_s0 + $0x1f4] ss:$120 sps:$4 sm:$0xff]  }
 0x15f   : > { %6336 = vmatprep.mubr.bf16.mxu0 %v10582_v18  ;;  %v10605_v18 = vld [vmem:[%s11362_s5 + $0xebc] ss:$12 sps:$4 sm:$0xff]   ;;  %v10612_v23 = vld [vmem:[%s11362_s5 + $0xed4] ss:$12 sps:$4 sm:$0xff]  }
 0x160   : > { %9166 = vmatpush3.bf16.msra.mxu1 %v10541_v20  ;;  %v11136_v20 = vld [vmem:[%s13325_s0 + $0x1f0] ss:$120 sps:$4 sm:$0xff]  }
 0x161   : > { %6370 = vmatpush1.bf16.msra.mxu0 %v10537_v17  ;;  %9167 = vmatprep.subr.bf16.mxu1 %v10545_v22  ;;  %v10602_v17 = vld [vmem:[%s11362_s5 + $0x4e8] ss:$12 sps:$4 sm:$0xff]   ;;  %v10607_v22 = vld [vmem:[%s11362_s5 + $0x500] ss:$12 sps:$4 sm:$0xff]  }
 0x162   : > { %6371 = vmatprep.subr.bf16.mxu0 %v10544_v21  ;;  %v10603_v21 = vld [vmem:[%s11362_s5 + $0xeb8] ss:$12 sps:$4 sm:$0xff]  }
 0x163   : > { %6911 = vmatmul.mubr.bf16.gmra.mrb[36].mxu1 %v11126_v31  ;;  %v10616_v31 = vld [vmem:[%s11362_s5 + $0xee8] ss:$12 sps:$4 sm:$0xff]  }
 0x164   : > { %6337 = vmatmul.mubr.bf16.gmra.mrb[4].mxu0 %v10588_v26  ;;  %9168 = vmatpush3.bf16.msra.mxu1 %v10546_v25  ;;  %v11137_v25 = vld [vmem:[%s13325_s0 + $0x2e4] ss:$120 sps:$4 sm:$0xff]  }
 0x165   : > { %6372 = vmatpush1.bf16.msra.mxu0 %v10542_v24  ;;  %9169 = vmatprep.subr.bf16.mxu1 %v10550_v28  ;;  %v10613_v24 = vld [vmem:[%s11362_s5 + $0x5d8] ss:$12 sps:$4 sm:$0xff]   ;;  %v10610_v26 = vld [vmem:[%s11362_s5 + $0xed0] ss:$12 sps:$4 sm:$0xff]  }
 0x166   : > { %6373 = vmatprep.subr.bf16.mxu0 %v10549_v27  ;;  %6918 = vmatprep.mubr.bf16.mxu1 %v11127_v35  ;;  %v10615_v27 = vld [vmem:[%s11362_s5 + $0x518] ss:$12 sps:$4 sm:$0xff]   ;;  %v11139_v35 = vld [vmem:[%s13325_s0 + $0x1c] ss:$120 sps:$4 sm:$0xff]  }
 0x167   : > { %6346 = vmatprep.mubr.bf16.mxu0 %v10595_v30  ;;  %v10618_v28 = vld [vmem:[%s11362_s5 + $0xeec] ss:$12 sps:$4 sm:$0xff]  }
 0x168   : > { %9170 = vmatpush3.bf16.msra.mxu1 %v10551_v32  ;;  %v11138_v30 = vld [vmem:[%s13325_s0 + $0x2e0] ss:$120 sps:$4 sm:$0xff]   ;;  %v10620_v32 = vld [vmem:[%s11362_s5 + $0x530] ss:$12 sps:$4 sm:$0xff]  }
 0x169   : > { %6374 = vmatpush1.bf16.msra.mxu0 %v10547_v29  ;;  %9171 = vmatprep.subr.bf16.mxu1 %v10555_v34  ;;  %v10619_v29 = vld [vmem:[%s11362_s5 + $0x5f0] ss:$12 sps:$4 sm:$0xff]   ;;  %v10627_v34 = vld [vmem:[%s11362_s5 + $0x6c8] ss:$12 sps:$4 sm:$0xff]  }
 0x16a   : > { %6375 = vmatprep.subr.bf16.mxu0 %v10554_v33  ;;  %v10626_v33 = vld [vmem:[%s11362_s5 + $0xf04] ss:$12 sps:$4 sm:$0xff]  }
 0x16b   : > { %6919 = vmatmul.mubr.bf16.gmra.mrb[40].mxu1 %v11128_v42  ;;  %v11140_v42 = vld [vmem:[%s13325_s0 + $0x18] ss:$120 sps:$4 sm:$0xff]  }
 0x16c   : > { %6347 = vmatmul.mubr.bf16.gmra.mrb[8].mxu0 %v10601_v37  ;;  %9172 = vmatpush3.bf16.msra.mxu1 %v10556_v38  ;;  %v10624_v37 = vld [vmem:[%s11362_s5 + $0xf00] ss:$12 sps:$4 sm:$0xff]   ;;  %v10628_v38 = vld [vmem:[%s11362_s5 + $0x608] ss:$12 sps:$4 sm:$0xff]  }
 0x16d   : > { %6376 = vmatpush1.bf16.msra.mxu0 %v10552_v36  ;;  %9173 = vmatprep.subr.bf16.mxu1 %v10560_v40  ;;  %v10621_v36 = vld [vmem:[%s13325_s0 + $0x48] ss:$120 sps:$4 sm:$0xff]  }
 0x16e   : > { %6377 = vmatprep.subr.bf16.mxu0 %v10559_v39  ;;  %6926 = vmatprep.mubr.bf16.mxu1 %v11129_v47  ;;  %v10631_v39 = vld [vmem:[%s11362_s5 + $0xf1c] ss:$12 sps:$4 sm:$0xff]   ;;  %v10632_v40 = vld [vmem:[%s11362_s5 + $0x6e0] ss:$12 sps:$4 sm:$0xff]  }
 0x16f   : > { %6356 = vmatprep.mubr.bf16.mxu0 %v10608_v41  ;;  %v10674_v41 = vld [vmem:[%s13325_s0 + $0x13c] ss:$120 sps:$4 sm:$0xff]   ;;  %v11141_v47 = vld [vmem:[%s13325_s0 + $0x10c] ss:$120 sps:$4 sm:$0xff]  }
 0x170   : > { %9174 = vmatpush3.bf16.msra.mxu1 %v10561_v44  ;;  %v10633_v44 = vld [vmem:[%s11362_s5 + $0x620] ss:$12 sps:$4 sm:$0xff]  }
 0x171   : > { %6378 = vmatpush1.bf16.msra.mxu0 %v10557_v43  ;;  %9175 = vmatprep.subr.bf16.mxu1 %v10565_v46  ;;  %v10629_v43 = vld [vmem:[%s11362_s5 + $0xf18] ss:$12 sps:$4 sm:$0xff]  }
 0x172   : > { %6379 = vmatprep.subr.bf16.mxu0 %v10564_v45  ;;  %v10636_v45 = vld [vmem:[%s11362_s5 + $0xf34] ss:$12 sps:$4 sm:$0xff]   ;;  %v10637_v46 = vld [vmem:[%s11362_s5 + $0x6f8] ss:$12 sps:$4 sm:$0xff]  }
 0x173   : > { %6927 = vmatmul.mubr.bf16.gmra.mrb[44].mxu1 %v11130_v54  ;;  %v10687_v54 = vld [vmem:[%s13325_s0 + $0x22c] ss:$120 sps:$4 sm:$0xff]  }
 0x174   : > { %6357 = vmatmul.mubr.bf16.gmra.mrb[12].mxu0 %v10614_v50  ;;  %9176 = vmatpush3.bf16.msra.mxu1 %v10566_v49  ;;  %v10680_v49 = vld [vmem:[%s13325_s0 + $0x138] ss:$120 sps:$4 sm:$0xff]  }
 0x175   : > { %6380 = vmatpush1.bf16.msra.mxu0 %v10562_v48  ;;  %9177 = vmatprep.subr.bf16.mxu1 %v10570_v52  ;;  %v10634_v48 = vld [vmem:[%s11362_s5 + $0xf30] ss:$12 sps:$4 sm:$0xff]   ;;  %v10638_v50 = vld [vmem:[%s11362_s5 + $0x638] ss:$12 sps:$4 sm:$0xff]  }
 0x176   : > { %6381 = vmatprep.subr.bf16.mxu0 %v10569_v51  ;;  %6967 = vmatprep.mubr.bf16.mxu1 %v11131_v59  ;;  %v10641_v51 = vld [vmem:[%s11362_s5 + $0xf4c] ss:$12 sps:$4 sm:$0xff]   ;;  %v10642_v52 = vld [vmem:[%s11362_s5 + $0x710] ss:$12 sps:$4 sm:$0xff]  }
 0x177   : > { %6399 = vmatprep.mubr.bf16.mxu0 %v10623_v53  ;;  %v10639_v53 = vld [vmem:[%s11362_s5 + $0xf48] ss:$12 sps:$4 sm:$0xff]  }
 0x178   : > { %9178 = vmatpush3.bf16.msra.mxu1 %v10571_v56  ;;  %v10643_v56 = vld [vmem:[%s11362_s5 + $0x650] ss:$12 sps:$4 sm:$0xff]  }
 0x179   : > { %6382 = vmatpush1.bf16.msra.mxu0 %v10567_v55  ;;  %9203 = vmatprep.subr.bf16.mxu1 %v10575_v58  ;;  %v11142_v55 = vld [vmem:[%s13325_s0 + $0x108] ss:$120 sps:$4 sm:$0xff]   ;;  %v11143_v59 = vld [vmem:[%s13325_s0 + $0x1fc] ss:$120 sps:$4 sm:$0xff]  }
 0x17a   : > { %6383 = vmatprep.subr.bf16.mxu0 %v10574_v57  ;;  %v10646_v57 = vld [vmem:[%s11362_s5 + $0xf64] ss:$12 sps:$4 sm:$0xff]   ;;  %v10647_v58 = vld [vmem:[%s11362_s5 + $0x728] ss:$12 sps:$4 sm:$0xff]  }
 0x17b   : > { %6968 = vmatmul.mubr.bf16.vlgmr.msra.gmra.mrb[48].mxu1 %v11132_v0  ;;  %v10652_v0 = vld [vmem:[%s11362_s5 + $0x740] ss:$12 sps:$4 sm:$0xff]  }
 0x17c   : > { %9204 = vmatpush3.bf16.msra.mxu1 %v10576_v61  ;;  %6975 = vmatprep.mubr.bf16.mxu1 %v11133_v5  ;;  %v10648_v61 = vld [vmem:[%s11362_s5 + $0x668] ss:$12 sps:$4 sm:$0xff]  }
 0x17d   : > { %6384 = vmatpush1.bf16.msra.mxu0 %v10572_v60  ;;  %9205 = vmatprep.subr.bf16.mxu1 %v10580_v63  ;;  %v10644_v60 = vld [vmem:[%s11362_s5 + $0xf60] ss:$12 sps:$4 sm:$0xff]   ;;  %v10651_v63 = vld [vmem:[%s11362_s5 + $0xf7c] ss:$12 sps:$4 sm:$0xff]  }
 0x17e   : > { %6385 = vmatprep.subr.bf16.mxu0 %v10579_v62  ;;  %v10693_v62 = vld [vmem:[%s13325_s0 + $0x228] ss:$120 sps:$4 sm:$0xff]  }
 0x17f   : > { %v10656_v5 = vld [vmem:[%s11362_s5 + $0xf94] ss:$12 sps:$4 sm:$0xff]  }
 0x180   : > { %9206 = vmatpush3.bf16.msra.mxu1 %v10581_v2  ;;  %v10700_v2 = vld [vmem:[%s13325_s0 + $0x31c] ss:$120 sps:$4 sm:$0xff]  }
 0x181   : > { %6386 = vmatpush1.bf16.msra.mxu0 %v10577_v1  ;;  %9207 = vmatprep.subr.bf16.mxu1 %v10587_v4  ;;  %v10649_v1 = vld [vmem:[%s11362_s5 + $0xf78] ss:$12 sps:$4 sm:$0xff]   ;;  %v10653_v4 = vld [vmem:[%s11362_s5 + $0x680] ss:$12 sps:$4 sm:$0xff]  }
 0x182   : > { %6387 = vmatprep.subr.bf16.mxu0 %v10586_v3  ;;  %v11144_v3 = vld [vmem:[%s13325_s0 + $0x1f8] ss:$120 sps:$4 sm:$0xff]  }
 0x183   : > { %6976 = vmatmul.mubr.bf16.gmra.mrb[52].mxu1 %v11134_v10  ;;  %v10658_v10 = vld [vmem:[%s11362_s5 + $0x698] ss:$12 sps:$4 sm:$0xff]  }
 0x184   : > { %9208 = vmatpush3.bf16.msra.mxu1 %v10589_v7  ;;  %6983 = vmatprep.mubr.bf16.mxu1 %v11135_v15  ;;  %v11145_v7 = vld [vmem:[%s13325_s0 + $0x2ec] ss:$120 sps:$4 sm:$0xff]   ;;  %v10659_v15 = vld [vmem:[%s11362_s5 + $0xfa8] ss:$12 sps:$4 sm:$0xff]  }
 0x185   : > { %6388 = vmatpush1.bf16.msra.mxu0 %v10584_v6  ;;  %9209 = vmatprep.subr.bf16.mxu1 %v10593_v9  ;;  %v10657_v6 = vld [vmem:[%s11362_s5 + $0x758] ss:$12 sps:$4 sm:$0xff]  }
 0x186   : > { %6389 = vmatprep.subr.bf16.mxu0 %v10592_v8  ;;  %v10654_v8 = vld [vmem:[%s11362_s5 + $0xf90] ss:$12 sps:$4 sm:$0xff]  }
 0x187   : > { %v10706_v9 = vld [vmem:[%s13325_s0 + $0x318] ss:$120 sps:$4 sm:$0xff]  }
 0x188   : > { %9210 = vmatpush3.bf16.msra.mxu1 %v10594_v12  ;;  %v10662_v12 = vld [vmem:[%s11362_s5 + $0x770] ss:$12 sps:$4 sm:$0xff]  }
 0x189   : > { %6390 = vmatpush1.bf16.msra.mxu0 %v10590_v11  ;;  %9211 = vmatprep.subr.bf16.mxu1 %v10600_v14  ;;  %v10661_v11 = vld [vmem:[%s11362_s5 + $0xfac] ss:$12 sps:$4 sm:$0xff]   ;;  %v11146_v14 = vld [vmem:[%s13325_s0 + $0x2e8] ss:$120 sps:$4 sm:$0xff]  }
 0x18a   : > { %6391 = vmatprep.subr.bf16.mxu0 %v10599_v13  ;;  %v10715_v13 = vld [vmem:[%s13325_s0 + $0x54] ss:$120 sps:$4 sm:$0xff]  }
 0x18b   : > { %6984 = vmatmul.mubr.bf16.gmra.mrb[56].mxu1 %v11136_v20  ;;  %v10664_v20 = vld [vmem:[%s11362_s5 + $0xfc0] ss:$12 sps:$4 sm:$0xff]  }
 0x18c   : > { %9212 = vmatpush3.bf16.msra.mxu1 %v10602_v17  ;;  %6991 = vmatprep.mubr.bf16.mxu1 %v11137_v25  ;;  %v10666_v17 = vld [vmem:[%s11362_s5 + $0xfc4] ss:$12 sps:$4 sm:$0xff]  }
 0x18d   : > { %6392 = vmatpush1.bf16.msra.mxu0 %v10597_v16  ;;  %9213 = vmatprep.subr.bf16.mxu1 %v10606_v19  ;;  %v10663_v16 = vld [vmem:[%s11362_s5 + $0x6b0] ss:$12 sps:$4 sm:$0xff]   ;;  %v10669_v25 = vld [vmem:[%s11362_s5 + $0xfd8] ss:$12 sps:$4 sm:$0xff]  }
 0x18e   : > { %6393 = vmatprep.subr.bf16.mxu0 %v10605_v18  ;;  %v10667_v18 = vld [vmem:[%s11362_s5 + $0x848] ss:$12 sps:$4 sm:$0xff]   ;;  %v11147_v19 = vld [vmem:[%s13325_s0 + $0x24] ss:$120 sps:$4 sm:$0xff]  }
 0x190   : > { %9214 = vmatpush3.bf16.msra.mxu1 %v10607_v22  ;;  %v10671_v22 = vld [vmem:[%s11362_s5 + $0xfdc] ss:$12 sps:$4 sm:$0xff]  }
 0x191   : > { %6394 = vmatpush1.bf16.msra.mxu0 %v10603_v21  ;;  %9215 = vmatprep.subr.bf16.mxu1 %v10613_v24  ;;  %v10668_v21 = vld [vmem:[%s11362_s5 + $0x788] ss:$12 sps:$4 sm:$0xff]   ;;  %v11148_v24 = vld [vmem:[%s13325_s0 + $0x20] ss:$120 sps:$4 sm:$0xff]  }
 0x192   : > { %6395 = vmatprep.subr.bf16.mxu0 %v10612_v23  ;;  %v10672_v23 = vld [vmem:[%s11362_s5 + $0x860] ss:$12 sps:$4 sm:$0xff]  }
 0x193   : > { %6992 = vmatmul.mubr.bf16.gmra.mrb[60].mxu1 %v11138_v30  ;;  %v10676_v30 = vld [vmem:[%s11362_s5 + $0xff0] ss:$12 sps:$4 sm:$0xff]  }
 0x194   : > { %9216 = vmatpush3.bf16.msra.mxu1 %v10615_v27  ;;  %7032 = vmatprep.mubr.bf16.mxu1 %v11139_v35  ;;  %v10678_v27 = vld [vmem:[%s11362_s5 + $0xff4] ss:$12 sps:$4 sm:$0xff]  }
 0x195   : > { %6396 = vmatpush1.bf16.msra.mxu0 %v10610_v26  ;;  %9217 = vmatprep.subr.bf16.mxu1 %v10619_v29  ;;  %v10673_v26 = vld [vmem:[%s11362_s5 + $0x7a0] ss:$12 sps:$4 sm:$0xff]   ;;  %v10682_v35 = vld [vmem:[%s11362_s5 + $0x1008] ss:$12 sps:$4 sm:$0xff]  }
 0x196   : > { %6397 = vmatprep.subr.bf16.mxu0 %v10618_v28  ;;  %v10679_v28 = vld [vmem:[%s11362_s5 + $0x878] ss:$12 sps:$4 sm:$0xff]   ;;  %v11149_v29 = vld [vmem:[%s13325_s0 + $0x114] ss:$120 sps:$4 sm:$0xff]  }
 0x198   : > { %9218 = vmatpush3.bf16.msra.mxu1 %v10620_v32  ;;  %v10684_v32 = vld [vmem:[%s11362_s5 + $0x100c] ss:$12 sps:$4 sm:$0xff]  }
 0x199   : > { %6398 = vmatpush1.bf16.msra.mxu0 %v10616_v31  ;;  %9243 = vmatprep.subr.bf16.mxu1 %v10627_v34  ;;  %v10681_v31 = vld [vmem:[%s11362_s5 + $0x7b8] ss:$12 sps:$4 sm:$0xff]   ;;  %v11150_v34 = vld [vmem:[%s13325_s0 + $0x110] ss:$120 sps:$4 sm:$0xff]  }
 0x19a   : > { %6440 = vmatprep.subr.bf16.mxu0 %v10626_v33  ;;  %v10685_v33 = vld [vmem:[%s11362_s5 + $0x890] ss:$12 sps:$4 sm:$0xff]  }
 0x19b   : > { %7033 = vmatmul.mubr.bf16.vlgmr.msra.gmra.mrb[64].mxu1 %v11140_v42  ;;  %v10697_v42 = vld [vmem:[%s11362_s5 + $0x103c] ss:$12 sps:$4 sm:$0xff]  }
 0x19c   : > { %6400 = vmatmul.mubr.bf16.vlgmr.msra.gmra.mrb[0].mxu0 %v10621_v36  ;;  %9244 = vmatpush3.bf16.msra.mxu1 %v10628_v38  ;;  %v10686_v36 = vld [vmem:[%s11362_s5 + $0x7d0] ss:$12 sps:$4 sm:$0xff]   ;;  %v10692_v38 = vld [vmem:[%s11362_s5 + $0x8a8] ss:$12 sps:$4 sm:$0xff]  }
 0x19d   : > { %6441 = vmatpush1.bf16.msra.mxu0 %v10624_v37  ;;  %9245 = vmatprep.subr.bf16.mxu1 %v10632_v40  ;;  %v10691_v37 = vld [vmem:[%s11362_s5 + $0x1024] ss:$12 sps:$4 sm:$0xff]   ;;  %v10689_v40 = vld [vmem:[%s11362_s5 + $0x1020] ss:$12 sps:$4 sm:$0xff]  }
 0x19e   : > { %6442 = vmatprep.subr.bf16.mxu0 %v10631_v39  ;;  %7040 = vmatprep.mubr.bf16.mxu1 %v11141_v47  ;;  %v11151_v39 = vld [vmem:[%s13325_s0 + $0x204] ss:$120 sps:$4 sm:$0xff]   ;;  %v10704_v47 = vld [vmem:[%s11362_s5 + $0x1054] ss:$12 sps:$4 sm:$0xff]  }
 0x19f   : > { %6409 = vmatprep.mubr.bf16.mxu0 %v10674_v41  ;;  %v10694_v41 = vld [vmem:[%s11362_s5 + $0x7e8] ss:$12 sps:$4 sm:$0xff]  }
 0x1a0   : > { %9246 = vmatpush3.bf16.msra.mxu1 %v10633_v44  ;;  %v11152_v44 = vld [vmem:[%s13325_s0 + $0x200] ss:$120 sps:$4 sm:$0xff]  }
 0x1a1   : > { %6443 = vmatpush1.bf16.msra.mxu0 %v10629_v43  ;;  %9247 = vmatprep.subr.bf16.mxu1 %v10637_v46  ;;  %v10698_v43 = vld [vmem:[%s11362_s5 + $0x8c0] ss:$12 sps:$4 sm:$0xff]  }
 0x1a2   : > { %6444 = vmatprep.subr.bf16.mxu0 %v10636_v45  ;;  %v10695_v45 = vld [vmem:[%s11362_s5 + $0x1038] ss:$12 sps:$4 sm:$0xff]   ;;  %v10699_v46 = vld [vmem:[%s11362_s5 + $0x800] ss:$12 sps:$4 sm:$0xff]  }
 0x1a3   : > { %7041 = vmatmul.mubr.bf16.gmra.mrb[68].mxu1 %v11142_v55  ;;  %v10708_v55 = vld [vmem:[%s11362_s5 + $0x1068] ss:$12 sps:$4 sm:$0xff]  }
 0x1a4   : > { %6410 = vmatmul.mubr.bf16.gmra.mrb[4].mxu0 %v10680_v49  ;;  %9248 = vmatpush3.bf16.msra.mxu1 %v10638_v50  ;;  %v11153_v49 = vld [vmem:[%s13325_s0 + $0x2f4] ss:$120 sps:$4 sm:$0xff]   ;;  %v10702_v50 = vld [vmem:[%s11362_s5 + $0x1050] ss:$12 sps:$4 sm:$0xff]  }
 0x1a5   : > { %6445 = vmatpush1.bf16.msra.mxu0 %v10634_v48  ;;  %9249 = vmatprep.subr.bf16.mxu1 %v10642_v52  ;;  %v10705_v48 = vld [vmem:[%s11362_s5 + $0x8d8] ss:$12 sps:$4 sm:$0xff]  }
 0x1a6   : > { %6446 = vmatprep.subr.bf16.mxu0 %v10641_v51  ;;  %7048 = vmatprep.mubr.bf16.mxu1 %v11143_v59  ;;  %v10707_v51 = vld [vmem:[%s11362_s5 + $0x818] ss:$12 sps:$4 sm:$0xff]   ;;  %v10719_v59 = vld [vmem:[%s11362_s5 + $0x9c8] ss:$12 sps:$4 sm:$0xff]  }
 0x1a7   : > { %6419 = vmatprep.mubr.bf16.mxu0 %v10687_v54  ;;  %v10710_v52 = vld [vmem:[%s11362_s5 + $0x106c] ss:$12 sps:$4 sm:$0xff]   ;;  %v11154_v54 = vld [vmem:[%s13325_s0 + $0x2f0] ss:$120 sps:$4 sm:$0xff]  }
 0x1a8   : > { %9250 = vmatpush3.bf16.msra.mxu1 %v10643_v56  ;;  %v10712_v56 = vld [vmem:[%s11362_s5 + $0x830] ss:$12 sps:$4 sm:$0xff]  }
 0x1a9   : > { %6447 = vmatpush1.bf16.msra.mxu0 %v10639_v53  ;;  %9251 = vmatprep.subr.bf16.mxu1 %v10647_v58  ;;  %v10711_v53 = vld [vmem:[%s11362_s5 + $0x8f0] ss:$12 sps:$4 sm:$0xff]  }
 0x1aa   : > { %6448 = vmatprep.subr.bf16.mxu0 %v10646_v57  ;;  %v10718_v57 = vld [vmem:[%s11362_s5 + $0x1084] ss:$12 sps:$4 sm:$0xff]  }
 0x1ab   : > { %7049 = vmatmul.mubr.bf16.gmra.mrb[72].mxu1 %v11144_v3  ;;  %v10713_v58 = vld [vmem:[%s13325_s0 + $0x50] ss:$120 sps:$4 sm:$0xff]   ;;  %v10721_v3 = vld [vmem:[%s11362_s5 + $0x1098] ss:$12 sps:$4 sm:$0xff]  }
 0x1ac   : > { %6420 = vmatmul.mubr.bf16.gmra.mrb[8].mxu0 %v10693_v62  ;;  %9252 = vmatpush3.bf16.msra.mxu1 %v10648_v61  ;;  %v10716_v61 = vld [vmem:[%s11362_s5 + $0x1080] ss:$12 sps:$4 sm:$0xff]   ;;  %v10720_v62 = vld [vmem:[%s11362_s5 + $0x908] ss:$12 sps:$4 sm:$0xff]  }
 0x1ad   : > { %6449 = vmatpush1.bf16.msra.mxu0 %v10644_v60  ;;  %9253 = vmatprep.subr.bf16.mxu1 %v10652_v0  ;;  %v11155_v60 = vld [vmem:[%s13325_s0 + $0x2c] ss:$120 sps:$4 sm:$0xff]  }
 0x1ae   : > { %6450 = vmatprep.subr.bf16.mxu0 %v10651_v63  ;;  %7056 = vmatprep.mubr.bf16.mxu1 %v11145_v7  ;;  %v10723_v63 = vld [vmem:[%s11362_s5 + $0x109c] ss:$12 sps:$4 sm:$0xff]   ;;  %v10724_v0 = vld [vmem:[%s11362_s5 + $0x9e0] ss:$12 sps:$4 sm:$0xff]  }
 0x1af   : > { %6429 = vmatprep.mubr.bf16.mxu0 %v10700_v2  ;;  %v11156_v2 = vld [vmem:[%s13325_s0 + $0x28] ss:$120 sps:$4 sm:$0xff]   ;;  %v11157_v7 = vld [vmem:[%s13325_s0 + $0x11c] ss:$120 sps:$4 sm:$0xff]  }
 0x1b0   : > { %9254 = vmatpush3.bf16.msra.mxu1 %v10653_v4  ;;  %v10725_v4 = vld [vmem:[%s11362_s5 + $0x920] ss:$12 sps:$4 sm:$0xff]  }
 0x1b1   : > { %6451 = vmatpush1.bf16.msra.mxu0 %v10649_v1  ;;  %9255 = vmatprep.subr.bf16.mxu1 %v10657_v6  ;;  %v10766_v1 = vld [vmem:[%s13325_s0 + $0x144] ss:$120 sps:$4 sm:$0xff]  }
 0x1b2   : > { %6452 = vmatprep.subr.bf16.mxu0 %v10656_v5  ;;  %v10728_v5 = vld [vmem:[%s11362_s5 + $0x10b4] ss:$12 sps:$4 sm:$0xff]   ;;  %v10729_v6 = vld [vmem:[%s11362_s5 + $0x9f8] ss:$12 sps:$4 sm:$0xff]  }
 0x1b3   : > { %7057 = vmatmul.mubr.bf16.gmra.mrb[76].mxu1 %v11146_v14  ;;  %v11158_v14 = vld [vmem:[%s13325_s0 + $0x118] ss:$120 sps:$4 sm:$0xff]  }
 0x1b4   : > { %6430 = vmatmul.mubr.bf16.gmra.mrb[12].mxu0 %v10706_v9  ;;  %9256 = vmatpush3.bf16.msra.mxu1 %v10658_v10  ;;  %v10730_v9 = vld [vmem:[%s11362_s5 + $0x938] ss:$12 sps:$4 sm:$0xff]  }
 0x1b5   : > { %6453 = vmatpush1.bf16.msra.mxu0 %v10654_v8  ;;  %9257 = vmatprep.subr.bf16.mxu1 %v10662_v12  ;;  %v10726_v8 = vld [vmem:[%s11362_s5 + $0x10b0] ss:$12 sps:$4 sm:$0xff]   ;;  %v10772_v10 = vld [vmem:[%s13325_s0 + $0x140] ss:$120 sps:$4 sm:$0xff]  }
 0x1b6   : > { %6454 = vmatprep.subr.bf16.mxu0 %v10661_v11  ;;  %7097 = vmatprep.mubr.bf16.mxu1 %v11147_v19  ;;  %v10733_v11 = vld [vmem:[%s11362_s5 + $0x10cc] ss:$12 sps:$4 sm:$0xff]   ;;  %v10734_v12 = vld [vmem:[%s11362_s5 + $0xa10] ss:$12 sps:$4 sm:$0xff]  }
 0x1b7   : > { %6472 = vmatprep.mubr.bf16.mxu0 %v10715_v13  ;;  %v10779_v13 = vld [vmem:[%s13325_s0 + $0x234] ss:$120 sps:$4 sm:$0xff]  }
 0x1b8   : > { %9258 = vmatpush3.bf16.msra.mxu1 %v10663_v16  ;;  %v10735_v16 = vld [vmem:[%s11362_s5 + $0x950] ss:$12 sps:$4 sm:$0xff]   ;;  %v11159_v19 = vld [vmem:[%s13325_s0 + $0x20c] ss:$120 sps:$4 sm:$0xff]  }
 0x1b9   : > { %6455 = vmatpush1.bf16.msra.mxu0 %v10659_v15  ;;  %9283 = vmatprep.subr.bf16.mxu1 %v10667_v18  ;;  %v10731_v15 = vld [vmem:[%s11362_s5 + $0x10c8] ss:$12 sps:$4 sm:$0xff]  }
 0x1ba   : > { %6456 = vmatprep.subr.bf16.mxu0 %v10666_v17  ;;  %v10738_v17 = vld [vmem:[%s11362_s5 + $0x10e4] ss:$12 sps:$4 sm:$0xff]   ;;  %v10739_v18 = vld [vmem:[%s11362_s5 + $0xa28] ss:$12 sps:$4 sm:$0xff]  }
 0x1bb   : > { %7098 = vmatmul.mubr.bf16.vlgmr.msra.gmra.mrb[80].mxu1 %v11148_v24  ;;  %v10744_v24 = vld [vmem:[%s11362_s5 + $0xa40] ss:$12 sps:$4 sm:$0xff]  }
 0x1bc   : > { %9284 = vmatpush3.bf16.msra.mxu1 %v10668_v21  ;;  %7105 = vmatprep.mubr.bf16.mxu1 %v11149_v29  ;;  %v10785_v21 = vld [vmem:[%s13325_s0 + $0x230] ss:$120 sps:$4 sm:$0xff]   ;;  %v10748_v29 = vld [vmem:[%s11362_s5 + $0x1114] ss:$12 sps:$4 sm:$0xff]  }
 0x1bd   : > { %6457 = vmatpush1.bf16.msra.mxu0 %v10664_v20  ;;  %9285 = vmatprep.subr.bf16.mxu1 %v10672_v23  ;;  %v10736_v20 = vld [vmem:[%s11362_s5 + $0x10e0] ss:$12 sps:$4 sm:$0xff]   ;;  %v10743_v23 = vld [vmem:[%s11362_s5 + $0x10fc] ss:$12 sps:$4 sm:$0xff]  }
 0x1be   : > { %6458 = vmatprep.subr.bf16.mxu0 %v10671_v22  ;;  %v10740_v22 = vld [vmem:[%s11362_s5 + $0x968] ss:$12 sps:$4 sm:$0xff]  }
 0x1c0   : > { %9286 = vmatpush3.bf16.msra.mxu1 %v10673_v26  ;;  %v10792_v26 = vld [vmem:[%s13325_s0 + $0x324] ss:$120 sps:$4 sm:$0xff]  }
 0x1c1   : > { %6459 = vmatpush1.bf16.msra.mxu0 %v10669_v25  ;;  %9287 = vmatprep.subr.bf16.mxu1 %v10679_v28  ;;  %v10741_v25 = vld [vmem:[%s11362_s5 + $0x10f8] ss:$12 sps:$4 sm:$0xff]   ;;  %v10745_v28 = vld [vmem:[%s11362_s5 + $0x980] ss:$12 sps:$4 sm:$0xff]  }
 0x1c2   : > { %6460 = vmatprep.subr.bf16.mxu0 %v10678_v27  ;;  %v11160_v27 = vld [vmem:[%s13325_s0 + $0x208] ss:$120 sps:$4 sm:$0xff]  }
 0x1c3   : > { %7106 = vmatmul.mubr.bf16.gmra.mrb[84].mxu1 %v11150_v34  ;;  %v10750_v34 = vld [vmem:[%s11362_s5 + $0x998] ss:$12 sps:$4 sm:$0xff]  }
 0x1c4   : > { %9288 = vmatpush3.bf16.msra.mxu1 %v10681_v31  ;;  %7113 = vmatprep.mubr.bf16.mxu1 %v11151_v39  ;;  %v10754_v39 = vld [vmem:[%s11362_s5 + $0xa70] ss:$12 sps:$4 sm:$0xff]  }
 0x1c5   : > { %6461 = vmatpush1.bf16.msra.mxu0 %v10676_v30  ;;  %9289 = vmatprep.subr.bf16.mxu1 %v10685_v33  ;;  %v10749_v30 = vld [vmem:[%s11362_s5 + $0xa58] ss:$12 sps:$4 sm:$0xff]   ;;  %v10746_v33 = vld [vmem:[%s11362_s5 + $0x1110] ss:$12 sps:$4 sm:$0xff]  }
 0x1c6   : > { %6462 = vmatprep.subr.bf16.mxu0 %v10684_v32  ;;  %v11161_v32 = vld [vmem:[%s13325_s0 + $0x2fc] ss:$120 sps:$4 sm:$0xff]  }
 0x1c8   : > { %9290 = vmatpush3.bf16.msra.mxu1 %v10686_v36  ;;  %v10798_v36 = vld [vmem:[%s13325_s0 + $0x320] ss:$120 sps:$4 sm:$0xff]  }
 0x1c9   : > { %6463 = vmatpush1.bf16.msra.mxu0 %v10682_v35  ;;  %9291 = vmatprep.subr.bf16.mxu1 %v10692_v38  ;;  %v10753_v38 = vld [vmem:[%s11362_s5 + $0x112c] ss:$12 sps:$4 sm:$0xff]  }
 0x1ca   : > { %6464 = vmatprep.subr.bf16.mxu0 %v10691_v37 }
 0x1cb   : > { %7114 = vmatmul.mubr.bf16.gmra.mrb[88].mxu1 %v11152_v44  ;;  %v10755_v44 = vld [vmem:[%s11362_s5 + $0x9b0] ss:$12 sps:$4 sm:$0xff]  }
 0x1cc   : > { %9292 = vmatpush3.bf16.msra.mxu1 %v10694_v41  ;;  %7121 = vmatprep.mubr.bf16.mxu1 %v11153_v49  ;;  %v10807_v41 = vld [vmem:[%s13325_s0 + $0x5c] ss:$120 sps:$4 sm:$0xff]   ;;  %v10756_v49 = vld [vmem:[%s11362_s5 + $0x1140] ss:$12 sps:$4 sm:$0xff]  }
 0x1cd   : > { %6465 = vmatpush1.bf16.msra.mxu0 %v10689_v40  ;;  %9293 = vmatprep.subr.bf16.mxu1 %v10698_v43  ;;  %v10751_v43 = vld [vmem:[%s11362_s5 + $0x1128] ss:$12 sps:$4 sm:$0xff]  }
 0x1ce   : > { %6466 = vmatprep.subr.bf16.mxu0 %v10697_v42  ;;  %v11162_v42 = vld [vmem:[%s13325_s0 + $0x2f8] ss:$120 sps:$4 sm:$0xff]  }
 0x1d0   : > { %9294 = vmatpush3.bf16.msra.mxu1 %v10699_v46  ;;  %v10759_v46 = vld [vmem:[%s11362_s5 + $0xb48] ss:$12 sps:$4 sm:$0xff]  }
 0x1d1   : > { %6467 = vmatpush1.bf16.msra.mxu0 %v10695_v45  ;;  %9295 = vmatprep.subr.bf16.mxu1 %v10705_v48  ;;  %v10758_v45 = vld [vmem:[%s11362_s5 + $0x1144] ss:$12 sps:$4 sm:$0xff]   ;;  %v11163_v48 = vld [vmem:[%s13325_s0 + $0x34] ss:$120 sps:$4 sm:$0xff]  }
 0x1d2   : > { %6468 = vmatprep.subr.bf16.mxu0 %v10704_v47 }
 0x1d3   : > { %7122 = vmatmul.mubr.bf16.gmra.mrb[92].mxu1 %v11154_v54  ;;  %v10764_v54 = vld [vmem:[%s11362_s5 + $0xb60] ss:$12 sps:$4 sm:$0xff]  }
 0x1d4   : > { %9296 = vmatpush3.bf16.msra.mxu1 %v10707_v51  ;;  %7162 = vmatprep.mubr.bf16.mxu1 %v11155_v60  ;;  %v10760_v51 = vld [vmem:[%s11362_s5 + $0xa88] ss:$12 sps:$4 sm:$0xff]   ;;  %v10771_v60 = vld [vmem:[%s11362_s5 + $0xb78] ss:$12 sps:$4 sm:$0xff]  }
 0x1d5   : > { %6469 = vmatpush1.bf16.msra.mxu0 %v10702_v50  ;;  %9297 = vmatprep.subr.bf16.mxu1 %v10711_v53  ;;  %v10763_v53 = vld [vmem:[%s11362_s5 + $0x115c] ss:$12 sps:$4 sm:$0xff]  }
 0x1d6   : > { %6470 = vmatprep.subr.bf16.mxu0 %v10710_v52 }
 0x1d8   : > { %9298 = vmatpush3.bf16.msra.mxu1 %v10712_v56  ;;  %v11164_v56 = vld [vmem:[%s13325_s0 + $0x30] ss:$120 sps:$4 sm:$0xff]  }
 0x1d9   : > { %6471 = vmatpush1.bf16.msra.mxu0 %v10708_v55  ;;  %9323 = vmatprep.subr.bf16.mxu1 %v10719_v59  ;;  %v10770_v59 = vld [vmem:[%s11362_s5 + $0x1174] ss:$12 sps:$4 sm:$0xff]  }
 0x1da   : > { %6513 = vmatprep.subr.bf16.mxu0 %v10718_v57  ;;  %v10761_v57 = vld [vmem:[%s11362_s5 + $0x1158] ss:$12 sps:$4 sm:$0xff]  }
 0x1db   : > { %7163 = vmatmul.mubr.bf16.vlgmr.msra.gmra.mrb[96].mxu1 %v11156_v2 }
 0x1dc   : > { %6473 = vmatmul.mubr.bf16.vlgmr.msra.gmra.mrb[0].mxu0 %v10713_v58  ;;  %9324 = vmatpush3.bf16.msra.mxu1 %v10720_v62  ;;  %v10765_v58 = vld [vmem:[%s11362_s5 + $0xaa0] ss:$12 sps:$4 sm:$0xff]   ;;  %v11165_v62 = vld [vmem:[%s13325_s0 + $0x124] ss:$120 sps:$4 sm:$0xff]  }
 0x1dd   : > { %6514 = vmatpush1.bf16.msra.mxu0 %v10716_v61  ;;  %9325 = vmatprep.subr.bf16.mxu1 %v10724_v0 }
 0x1de   : > { %6515 = vmatprep.subr.bf16.mxu0 %v10723_v63  ;;  %7170 = vmatprep.mubr.bf16.mxu1 %v11157_v7  ;;  %v10768_v63 = vld [vmem:[%s11362_s5 + $0x1170] ss:$12 sps:$4 sm:$0xff]   ;;  %v10774_v7 = vld [vmem:[%s11362_s5 + $0x1188] ss:$12 sps:$4 sm:$0xff]  }
 0x1df   : > { %6482 = vmatprep.mubr.bf16.mxu0 %v10766_v1  ;;  %v10773_v1 = vld [vmem:[%s11362_s5 + $0xab8] ss:$12 sps:$4 sm:$0xff]  }
 0x1e0   : > { %9326 = vmatpush3.bf16.msra.mxu1 %v10725_v4  ;;  %v10777_v4 = vld [vmem:[%s11362_s5 + $0xb90] ss:$12 sps:$4 sm:$0xff]  }
 0x1e1   : > { %6516 = vmatpush1.bf16.msra.mxu0 %v10721_v3  ;;  %9327 = vmatprep.subr.bf16.mxu1 %v10729_v6  ;;  %v10776_v3 = vld [vmem:[%s11362_s5 + $0x118c] ss:$12 sps:$4 sm:$0xff]  }
 0x1e2   : > { %6517 = vmatprep.subr.bf16.mxu0 %v10728_v5  ;;  %v11166_v6 = vld [vmem:[%s13325_s0 + $0x120] ss:$120 sps:$4 sm:$0xff]  }
 0x1e3   : > { %7171 = vmatmul.mubr.bf16.gmra.mrb[100].mxu1 %v11158_v14  ;;  %v10781_v14 = vld [vmem:[%s11362_s5 + $0x11a0] ss:$12 sps:$4 sm:$0xff]  }
 0x1e4   : > { %6483 = vmatmul.mubr.bf16.gmra.mrb[4].mxu0 %v10772_v10  ;;  %9328 = vmatpush3.bf16.msra.mxu1 %v10730_v9  ;;  %v10783_v9 = vld [vmem:[%s11362_s5 + $0x11a4] ss:$12 sps:$4 sm:$0xff]   ;;  %v10784_v10 = vld [vmem:[%s11362_s5 + $0xba8] ss:$12 sps:$4 sm:$0xff]  }
 0x1e5   : > { %6518 = vmatpush1.bf16.msra.mxu0 %v10726_v8  ;;  %9329 = vmatprep.subr.bf16.mxu1 %v10734_v12  ;;  %v10778_v8 = vld [vmem:[%s11362_s5 + $0xad0] ss:$12 sps:$4 sm:$0xff]   ;;  %v11167_v12 = vld [vmem:[%s13325_s0 + $0x214] ss:$120 sps:$4 sm:$0xff]  }
 0x1e6   : > { %6519 = vmatprep.subr.bf16.mxu0 %v10733_v11  ;;  %7178 = vmatprep.mubr.bf16.mxu1 %v11159_v19 }
 0x1e7   : > { %6492 = vmatprep.mubr.bf16.mxu0 %v10779_v13 }
 0x1e8   : > { %9330 = vmatpush3.bf16.msra.mxu1 %v10735_v16 }
 0x1e9   : > { %6520 = vmatpush1.bf16.msra.mxu0 %v10731_v15  ;;  %9331 = vmatprep.subr.bf16.mxu1 %v10739_v18  ;;  %v10786_v15 = vld [vmem:[%s11362_s5 + $0xae8] ss:$12 sps:$4 sm:$0xff]   ;;  %v10790_v18 = vld [vmem:[%s11362_s5 + $0xbc0] ss:$12 sps:$4 sm:$0xff]  }
 0x1ea   : > { %6521 = vmatprep.subr.bf16.mxu0 %v10738_v17  ;;  %v10789_v17 = vld [vmem:[%s11362_s5 + $0x11bc] ss:$12 sps:$4 sm:$0xff]  }
 0x1eb   : > { %7179 = vmatmul.mubr.bf16.gmra.mrb[104].mxu1 %v11160_v27 }
 0x1ec   : > { %6493 = vmatmul.mubr.bf16.gmra.mrb[8].mxu0 %v10785_v21  ;;  %9332 = vmatpush3.bf16.msra.mxu1 %v10740_v22  ;;  %v10787_v21 = vld [vmem:[%s11362_s5 + $0x11b8] ss:$12 sps:$4 sm:$0xff]   ;;  %v10791_v22 = vld [vmem:[%s11362_s5 + $0xb00] ss:$12 sps:$4 sm:$0xff]  }
 0x1ed   : > { %6522 = vmatpush1.bf16.msra.mxu0 %v10736_v20  ;;  %9333 = vmatprep.subr.bf16.mxu1 %v10744_v24  ;;  %v11168_v20 = vld [vmem:[%s13325_s0 + $0x210] ss:$120 sps:$4 sm:$0xff]   ;;  %v10797_v24 = vld [vmem:[%s11362_s5 + $0xbd8] ss:$12 sps:$4 sm:$0xff]  }
 0x1ee   : > { %6523 = vmatprep.subr.bf16.mxu0 %v10743_v23  ;;  %v12231_v31 = vpop.f32.mrb[0].mxu1  ;;  %7186 = vmatprep.mubr.bf16.mxu1 %v11161_v32  ;;  %v10796_v23 = vld [vmem:[%s11362_s5 + $0x11d4] ss:$12 sps:$4 sm:$0xff]  }
 0x1ef   : > { %6502 = vmatprep.mubr.bf16.mxu0 %v10792_v26  ;;  %v12238_v35 = vpop.f32.mrb[1].mxu1  ;;  %v10794_v26 = vld [vmem:[%s11362_s5 + $0x11d0] ss:$12 sps:$4 sm:$0xff]  }
 0x1f0   : > { %v12243_v37 = vpop.f32.mrb[2].mxu1  ;;  %9334 = vmatpush3.bf16.msra.mxu1 %v10745_v28  ;;  %v10799_v28 = vld [vmem:[%s11362_s5 + $0xb18] ss:$12 sps:$4 sm:$0xff]  }
 0x1f1   : > { %6524 = vmatpush1.bf16.msra.mxu0 %v10741_v25  ;;  %v12247_v40 = vpop.f32.mrb[3].mxu1  ;;  %9335 = vmatprep.subr.bf16.mxu1 %v10749_v30  ;;  %v11169_v25 = vld [vmem:[%s13325_s0 + $0x304] ss:$120 sps:$4 sm:$0xff]   ;;  %v10802_v30 = vld [vmem:[%s11362_s5 + $0x11ec] ss:$12 sps:$4 sm:$0xff]  }
 0x1f2   : > { %6525 = vmatprep.subr.bf16.mxu0 %v10748_v29 }
 0x1f3   : > { %7187 = vmatmul.mubr.bf16.gmra.mrb[108].mxu1 %v11162_v42  ;;  %v10804_v42 = vld [vmem:[%s11362_s5 + $0xb30] ss:$12 sps:$4 sm:$0xff]  }
 0x1f4   : > { %6503 = vmatmul.mubr.bf16.gmra.mrb[12].mxu0 %v10798_v36  ;;  %9336 = vmatpush3.bf16.msra.mxu1 %v10750_v34  ;;  %v10803_v36 = vld [vmem:[%s11362_s5 + $0xbf0] ss:$12 sps:$4 sm:$0xff]  }
 0x1f5   : > { %6526 = vmatpush1.bf16.msra.mxu0 %v10746_v33  ;;  %9337 = vmatprep.subr.bf16.mxu1 %v10754_v39  ;;  %v11170_v39 = vld [vmem:[%s13325_s0 + $0x300] ss:$120 sps:$4 sm:$0xff]  }
 0x1f6   : > { %6527 = vmatprep.subr.bf16.mxu0 %v10753_v38  ;;  %v12259_v47 = vpop.f32.mrb[4].mxu1  ;;  %7227 = vmatprep.mubr.bf16.mxu1 %v11163_v48  ;;  %v10808_v48 = vld [vmem:[%s11362_s5 + $0x1200] ss:$12 sps:$4 sm:$0xff]  }
 0x1f7   : > { %6545 = vmatprep.mubr.bf16.mxu0 %v10807_v41  ;;  %v12265_v50 = vpop.f32.mrb[5].mxu1  ;;  %v10800_v41 = vld [vmem:[%s11362_s5 + $0x11e8] ss:$12 sps:$4 sm:$0xff]  }
 0x1f8   : > { %v12268_v52 = vpop.f32.mrb[6].mxu1  ;;  %9338 = vmatpush3.bf16.msra.mxu1 %v10755_v44  ;;  %v10810_v44 = vld [vmem:[%s11362_s5 + $0x1204] ss:$12 sps:$4 sm:$0xff]  }
 0x1f9   : > { %6528 = vmatpush1.bf16.msra.mxu0 %v10751_v43  ;;  %v12272_v55 = vpop.f32.mrb[7].mxu1  ;;  %9363 = vmatprep.subr.bf16.mxu1 %v10759_v46  ;;  %v10805_v43 = vld [vmem:[%s13325_s0 + $0x58] ss:$120 sps:$4 sm:$0xff]   ;;  %v11171_v46 = vld [vmem:[%s13325_s0 + $0x3c] ss:$120 sps:$4 sm:$0xff]  }
 0x1fa   : > { %6529 = vmatprep.subr.bf16.mxu0 %v10758_v45  ;;  %v10811_v45 = vld [vmem:[%s11362_s5 + $0xcc8] ss:$12 sps:$4 sm:$0xff]  }
 0x1fb   : > { %7228 = vmatmul.mubr.bf16.vlgmr.msra.gmra.mrb[112].mxu1 %v11164_v56 }
 0x1fc   : > { %9364 = vmatpush3.bf16.msra.mxu1 %v10760_v51  ;;  %7235 = vmatprep.mubr.bf16.mxu1 %v11165_v62  ;;  %v10812_v51 = vld [vmem:[%s11362_s5 + $0xc08] ss:$12 sps:$4 sm:$0xff]   ;;  %v10858_v62 = vld [vmem:[%s13325_s0 + $0x14c] ss:$120 sps:$4 sm:$0xff]  }
 0x1fd   : > { %6530 = vmatpush1.bf16.msra.mxu0 %v10756_v49  ;;  %9365 = vmatprep.subr.bf16.mxu1 %v10764_v54 }
 0x1fe   : > { %6531 = vmatprep.subr.bf16.mxu0 %v10763_v53  ;;  %v12281_v61 = vpop.f32.mrb[8].mxu1 }
 0x1ff   : > { %v12287_v0 = vpop.f32.mrb[9].mxu1 }
 0x200   : > { %v12290_v2 = vpop.f32.mrb[10].mxu1  ;;  %9366 = vmatpush3.bf16.msra.mxu1 %v10765_v58 }
 0x201   : > { %6532 = vmatpush1.bf16.msra.mxu0 %v10761_v57  ;;  %v12294_v5 = vpop.f32.mrb[11].mxu1  ;;  %9367 = vmatprep.subr.bf16.mxu1 %v10771_v60  ;;  %v10815_v57 = vld [vmem:[%s11362_s5 + $0x121c] ss:$12 sps:$4 sm:$0xff]  }
 0x202   : > { %6533 = vmatprep.subr.bf16.mxu0 %v10770_v59  ;;  %v10816_v59 = vld [vmem:[%s11362_s5 + $0xce0] ss:$12 sps:$4 sm:$0xff]  }
 0x203   : > { %7236 = vmatmul.mubr.bf16.gmra.mrb[116].mxu1 %v11166_v6  ;;  %v10821_v6 = vld [vmem:[%s11362_s5 + $0xcf8] ss:$12 sps:$4 sm:$0xff]  }
 0x204   : > { %9368 = vmatpush3.bf16.msra.mxu1 %v10773_v1  ;;  %7243 = vmatprep.mubr.bf16.mxu1 %v11167_v12  ;;  %v10813_v1 = vld [vmem:[%s11362_s5 + $0x1218] ss:$12 sps:$4 sm:$0xff]  }
 0x205   : > { %6534 = vmatpush1.bf16.msra.mxu0 %v10768_v63  ;;  %9369 = vmatprep.subr.bf16.mxu1 %v10777_v4  ;;  %v11172_v63 = vld [vmem:[%s13325_s0 + $0x38] ss:$120 sps:$4 sm:$0xff]   ;;  %v10820_v4 = vld [vmem:[%s11362_s5 + $0x1234] ss:$12 sps:$4 sm:$0xff]  }
 0x206   : > { %6535 = vmatprep.subr.bf16.mxu0 %v10776_v3  ;;  %v12303_v11 = vpop.f32.mrb[12].mxu1  ;;  %v10817_v3 = vld [vmem:[%s11362_s5 + $0xc20] ss:$12 sps:$4 sm:$0xff]  }
 0x207   : > { %v12308_v13 = vpop.f32.mrb[13].mxu1 }
 0x208   : > { %v12312_v16 = vpop.f32.mrb[14].mxu1  ;;  %9370 = vmatpush3.bf16.msra.mxu1 %v10778_v8  ;;  %v10818_v8 = vld [vmem:[%s11362_s5 + $0x1230] ss:$12 sps:$4 sm:$0xff]  }
 0x209   : > { %6536 = vmatpush1.bf16.msra.mxu0 %v10774_v7  ;;  %v12316_v19 = vpop.f32.mrb[15].mxu1  ;;  %9371 = vmatprep.subr.bf16.mxu1 %v10784_v10  ;;  %v11173_v7 = vld [vmem:[%s13325_s0 + $0x12c] ss:$120 sps:$4 sm:$0xff]  }
 0x20a   : > { %6537 = vmatprep.subr.bf16.mxu0 %v10783_v9  ;;  %v10822_v10 = vld [vmem:[%s11362_s5 + $0xc38] ss:$12 sps:$4 sm:$0xff]  }
 0x20b   : > { %7244 = vmatmul.mubr.bf16.gmra.mrb[120].mxu1 %v11168_v20 }
 0x20c   : > { %9372 = vmatpush3.bf16.msra.mxu1 %v10786_v15  ;;  %7251 = vmatprep.mubr.bf16.mxu1 %v11169_v25  ;;  %v10823_v25 = vld [vmem:[%s11362_s5 + $0x1248] ss:$12 sps:$4 sm:$0xff]  }
 0x20d   : > { %6538 = vmatpush1.bf16.msra.mxu0 %v10781_v14  ;;  %9373 = vmatprep.subr.bf16.mxu1 %v10790_v18  ;;  %v10864_v14 = vld [vmem:[%s13325_s0 + $0x148] ss:$120 sps:$4 sm:$0xff]   ;;  %v10825_v18 = vld [vmem:[%s11362_s5 + $0x124c] ss:$12 sps:$4 sm:$0xff]  }
 0x20e   : > { %6539 = vmatprep.subr.bf16.mxu0 %v10789_v17  ;;  %v9099_v27 = vpop.f32.mrb[16].mxu1 }
 0x20f   : > { %v9100_v29 = vpop.f32.mrb[17].mxu1 }
 0x210   : > { %9374 = vmatpush3.bf16.msra.mxu1 %v10791_v22  ;;  %v12331_v32 = vadd.f32 %v9100_v29, %v9099_v27  ;;  %v9102_v33 = vpop.f32.mrb[18].mxu1  ;;  %v10830_v27 = vld [vmem:[%s11362_s5 + $0x1264] ss:$12 sps:$4 sm:$0xff]  }
 0x211   : > { %6540 = vmatpush1.bf16.msra.mxu0 %v10787_v21  ;;  %9375 = vmatprep.subr.bf16.mxu1 %v10797_v24  ;;  %v9103_v34 = vpop.f32.mrb[19].mxu1  ;;  %v10826_v21 = vld [vmem:[%s11362_s5 + $0xd10] ss:$12 sps:$4 sm:$0xff]   ;;  %v11174_v24 = vld [vmem:[%s13325_s0 + $0x128] ss:$120 sps:$4 sm:$0xff]  }
 0x212   : > { %6541 = vmatprep.subr.bf16.mxu0 %v10796_v23  ;;  %v12334_v38 = vadd.f32 %v9103_v34, %v9102_v33  ;;  %v10871_v23 = vld [vmem:[%s13325_s0 + $0x23c] ss:$120 sps:$4 sm:$0xff]   ;;  %v10828_v33 = vld [vmem:[%s11362_s5 + $0x1260] ss:$12 sps:$4 sm:$0xff]  }
 0x213   : > { %7252 = vmatmul.mubr.bf16.gmra.mrb[124].mxu1 %v11170_v39  ;;  %v10832_v34 = vld [vmem:[%s11362_s5 + $0xc68] ss:$12 sps:$4 sm:$0xff]  }
 0x214   : > { %9376 = vmatpush3.bf16.msra.mxu1 %v10799_v28  ;;  %7292 = vmatprep.mubr.bf16.mxu1 %v11171_v46  ;;  %v10831_v28 = vld [vmem:[%s11362_s5 + $0xd28] ss:$12 sps:$4 sm:$0xff]  }
 0x215   : > { %6542 = vmatpush1.bf16.msra.mxu0 %v10794_v26  ;;  %9377 = vmatprep.subr.bf16.mxu1 %v10803_v36  ;;  %v10827_v26 = vld [vmem:[%s11362_s5 + $0xc50] ss:$12 sps:$4 sm:$0xff]  }
 0x216   : > { %6543 = vmatprep.subr.bf16.mxu0 %v10802_v30  ;;  %v9105_v49 = vpop.f32.mrb[20].mxu1  ;;  %v11175_v30 = vld [vmem:[%s13325_s0 + $0x21c] ss:$120 sps:$4 sm:$0xff]   ;;  %v10877_v36 = vld [vmem:[%s13325_s0 + $0x238] ss:$120 sps:$4 sm:$0xff]  }
 0x217   : > { %v9106_v53 = vpop.f32.mrb[21].mxu1 }
 0x218   : > { %9378 = vmatpush3.bf16.msra.mxu1 %v10804_v42  ;;  %v12351_v54 = vadd.f32 %v9106_v53, %v9105_v49  ;;  %v9108_v56 = vpop.f32.mrb[22].mxu1  ;;  %v11176_v49 = vld [vmem:[%s13325_s0 + $0x218] ss:$120 sps:$4 sm:$0xff]   ;;  %v10837_v53 = vld [vmem:[%s11362_s5 + $0xc80] ss:$12 sps:$4 sm:$0xff]  }
 0x219   : > { %6544 = vmatpush1.bf16.msra.mxu0 %v10800_v41  ;;  %9403 = vmatprep.subr.bf16.mxu1 %v10811_v45  ;;  %v9109_v58 = vpop.f32.mrb[23].mxu1  ;;  %v10836_v45 = vld [vmem:[%s11362_s5 + $0xd40] ss:$12 sps:$4 sm:$0xff]  }
 0x21a   : > { %6586 = vmatprep.subr.bf16.mxu0 %v10810_v44  ;;  %v12355_v60 = vadd.f32 %v9109_v58, %v9108_v56  ;;  %v10840_v56 = vld [vmem:[%s11362_s5 + $0x1294] ss:$12 sps:$4 sm:$0xff]  }
 0x21b   : > { %7293 = vmatmul.mubr.bf16.vlgmr.msra.gmra.mrb[128].mxu1 %v11172_v63  ;;  %v10842_v63 = vld [vmem:[%s11362_s5 + $0xc98] ss:$12 sps:$4 sm:$0xff]  }
 0x21c   : > { %6546 = vmatmul.mubr.bf16.vlgmr.msra.gmra.mrb[0].mxu0 %v10805_v43  ;;  %9404 = vmatpush3.bf16.msra.mxu1 %v10812_v51  ;;  %v10835_v43 = vld [vmem:[%s11362_s5 + $0x127c] ss:$12 sps:$4 sm:$0xff]   ;;  %v10833_v51 = vld [vmem:[%s11362_s5 + $0x1278] ss:$12 sps:$4 sm:$0xff]  }
 0x21d   : > { %6587 = vmatpush1.bf16.msra.mxu0 %v10808_v48  ;;  %9405 = vmatprep.subr.bf16.mxu1 %v10816_v59  ;;  %v10884_v48 = vld [vmem:[%s13325_s0 + $0x32c] ss:$120 sps:$4 sm:$0xff]  }
 0x21e   : > { %6588 = vmatprep.subr.bf16.mxu0 %v10815_v57  ;;  %7300 = vmatprep.mubr.bf16.mxu1 %v11173_v7  ;;  %v9111_v9 = vpop.f32.mrb[24].mxu1  ;;  %v10841_v57 = vld [vmem:[%s11362_s5 + $0xd58] ss:$12 sps:$4 sm:$0xff]  }
 0x21f   : > { %6555 = vmatprep.mubr.bf16.mxu0 %v10858_v62  ;;  %v9112_v12 = vpop.f32.mrb[25].mxu1  ;;  %v11177_v59 = vld [vmem:[%s13325_s0 + $0x30c] ss:$120 sps:$4 sm:$0xff]   ;;  %v10838_v62 = vld [vmem:[%s11362_s5 + $0x1290] ss:$12 sps:$4 sm:$0xff]  }
 0x220   : > { %9406 = vmatpush3.bf16.msra.mxu1 %v10817_v3  ;;  %v12375_v15 = vadd.f32 %v9112_v12, %v9111_v9  ;;  %v9114_v17 = vpop.f32.mrb[26].mxu1  ;;  %v10845_v7 = vld [vmem:[%s11362_s5 + $0x12ac] ss:$12 sps:$4 sm:$0xff]   ;;  %v10846_v9 = vld [vmem:[%s11362_s5 + $0xd70] ss:$12 sps:$4 sm:$0xff]  }
 0x221   : > { %6589 = vmatpush1.bf16.msra.mxu0 %v10813_v1  ;;  %9407 = vmatprep.subr.bf16.mxu1 %v10821_v6  ;;  %v9115_v20 = vpop.f32.mrb[27].mxu1  ;;  %v10890_v1 = vld [vmem:[%s13325_s0 + $0x328] ss:$120 sps:$4 sm:$0xff]  }
 0x222   : > { %6590 = vmatprep.subr.bf16.mxu0 %v10820_v4  ;;  %v12379_v22 = vadd.f32 %v9115_v20, %v9114_v17  ;;  %v11178_v17 = vld [vmem:[%s13325_s0 + $0x308] ss:$120 sps:$4 sm:$0xff]  }
 0x223   : > { %7301 = vmatmul.mubr.bf16.gmra.mrb[132].mxu1 %v11174_v24 }
 0x224   : > { %6556 = vmatmul.mubr.bf16.gmra.mrb[4].mxu0 %v10864_v14  ;;  %9408 = vmatpush3.bf16.msra.mxu1 %v10822_v10  ;;  %v10899_v14 = vld [vmem:[%s13325_s0 + $0x64] ss:$120 sps:$4 sm:$0xff]  }
 0x225   : > { %6591 = vmatpush1.bf16.msra.mxu0 %v10818_v8  ;;  %9409 = vmatprep.subr.bf16.mxu1 %v10826_v21  ;;  %v10850_v21 = vld [vmem:[%s11362_s5 + $0x12c4] ss:$12 sps:$4 sm:$0xff]  }
 0x226   : > { %6592 = vmatprep.subr.bf16.mxu0 %v10825_v18  ;;  %v9117_v29 = vpop.f32.mrb[28].mxu1  ;;  %7308 = vmatprep.mubr.bf16.mxu1 %v11175_v30  ;;  %v10843_v18 = vld [vmem:[%s11362_s5 + $0x12a8] ss:$12 sps:$4 sm:$0xff]  }
 0x227   : > { %6565 = vmatprep.mubr.bf16.mxu0 %v10871_v23  ;;  %v9118_v39 = vpop.f32.mrb[29].mxu1  ;;  %v10851_v23 = vld [vmem:[%s11362_s5 + $0xe48] ss:$12 sps:$4 sm:$0xff]  }
 0x228   : > { %9410 = vmatpush3.bf16.msra.mxu1 %v10827_v26  ;;  %v12399_v41 = vadd.f32 %v9118_v39, %v9117_v29  ;;  %v9120_v42 = vpop.f32.mrb[30].mxu1  ;;  %v10848_v26 = vld [vmem:[%s11362_s5 + $0x12c0] ss:$12 sps:$4 sm:$0xff]   ;;  %v10855_v30 = vld [vmem:[%s11362_s5 + $0x12dc] ss:$12 sps:$4 sm:$0xff]  }
 0x229   : > { %6593 = vmatpush1.bf16.msra.mxu0 %v10823_v25  ;;  %9411 = vmatprep.subr.bf16.mxu1 %v10831_v28  ;;  %v9121_v44 = vpop.f32.mrb[31].mxu1  ;;  %v11179_v25 = vld [vmem:[%s13325_s0 + $0x44] ss:$120 sps:$4 sm:$0xff]  }
 0x22a   : > { %6594 = vmatprep.subr.bf16.mxu0 %v10830_v27  ;;  %v12403_v46 = vadd.f32 %v9121_v44, %v9120_v42  ;;  %v10852_v27 = vld [vmem:[%s11362_s5 + $0xd88] ss:$12 sps:$4 sm:$0xff]   ;;  %v11180_v42 = vld [vmem:[%s13325_s0 + $0x40] ss:$120 sps:$4 sm:$0xff]  }
 0x22b   : > { %7309 = vmatmul.mubr.bf16.gmra.mrb[136].mxu1 %v11176_v49 }
 0x22c   : > { %6566 = vmatmul.mubr.bf16.gmra.mrb[8].mxu0 %v10877_v36  ;;  %9412 = vmatpush3.bf16.msra.mxu1 %v10832_v34  ;;  %v10856_v34 = vld [vmem:[%s11362_s5 + $0xe60] ss:$12 sps:$4 sm:$0xff]  }
 0x22d   : > { %6595 = vmatpush1.bf16.msra.mxu0 %v10828_v33  ;;  %9413 = vmatprep.subr.bf16.mxu1 %v10836_v45  ;;  %v10857_v45 = vld [vmem:[%s11362_s5 + $0xda0] ss:$12 sps:$4 sm:$0xff]  }
 0x22e   : > { %6596 = vmatprep.subr.bf16.mxu0 %v10835_v43  ;;  %v9139_v58 = vpop.f32.mrb[32].mxu1  ;;  %7316 = vmatprep.mubr.bf16.mxu1 %v11177_v59  ;;  %v10853_v43 = vld [vmem:[%s11362_s5 + $0x12d8] ss:$12 sps:$4 sm:$0xff]  }
 0x22f   : > { %6575 = vmatprep.mubr.bf16.mxu0 %v10884_v48  ;;  %v9140_v3 = vpop.f32.mrb[33].mxu1  ;;  %v10862_v48 = vld [vmem:[%s11362_s5 + $0x12f4] ss:$12 sps:$4 sm:$0xff]   ;;  %v10868_v59 = vld [vmem:[%s11362_s5 + $0x130c] ss:$12 sps:$4 sm:$0xff]  }
 0x230   : > { %v9141_v4 = vadd.f32 %v9140_v3, %v9139_v58  ;;  %v9142_v6 = vpop.f32.mrb[34].mxu1  ;;  %9414 = vmatpush3.bf16.msra.mxu1 %v10837_v53  ;;  %v10860_v53 = vld [vmem:[%s11362_s5 + $0x12f0] ss:$12 sps:$4 sm:$0xff]  }
 0x231   : > { %6597 = vmatpush1.bf16.msra.mxu0 %v10833_v51  ;;  %v9143_v8 = vpop.f32.mrb[35].mxu1  ;;  %9415 = vmatprep.subr.bf16.mxu1 %v10841_v57  ;;  %v11181_v51 = vld [vmem:[%s13325_s0 + $0x134] ss:$120 sps:$4 sm:$0xff]  }
 0x232   : > { %6598 = vmatprep.subr.bf16.mxu0 %v10840_v56  ;;  %v12426_v10 = vadd.f32 %v9141_v4, %v12331_v32  ;;  %v9144_v12 = vadd.f32 %v9143_v8, %v9142_v6  ;;  %v10847_v32 = vld [vmem:[%s11362_s5 + $0xcb0] ss:$12 sps:$4 sm:$0xff]   ;;  %v10865_v56 = vld [vmem:[%s11362_s5 + $0xdb8] ss:$12 sps:$4 sm:$0xff]   ;;  %v10866_v6 = vld [vmem:[%s11362_s5 + $0x1308] ss:$12 sps:$4 sm:$0xff]  }
 0x233   : > { %7317 = vmatmul.mubr.bf16.gmra.mrb[140].mxu1 %v11178_v17  ;;  %v11182_v4 = vld [vmem:[%s13325_s0 + $0x130] ss:$120 sps:$4 sm:$0xff]   ;;  %v10873_v17 = vld [vmem:[%s11362_s5 + $0x1320] ss:$12 sps:$4 sm:$0xff]  }
 0x234   : > { %6576 = vmatmul.mubr.bf16.gmra.mrb[12].mxu0 %v10890_v1  ;;  %v12436_v20 = vadd.f32 %v9144_v12, %v12334_v38  ;;  %9416 = vmatpush3.bf16.msra.mxu1 %v10842_v63  ;;  %v10869_v63 = vld [vmem:[%s11362_s5 + $0xe90] ss:$12 sps:$4 sm:$0xff]  }
 0x235   : > { %6599 = vmatpush1.bf16.msra.mxu0 %v10838_v62  ;;  %9417 = vmatprep.subr.bf16.mxu1 %v10846_v9  ;;  %v10875_v9 = vld [vmem:[%s11362_s5 + $0x1324] ss:$12 sps:$4 sm:$0xff]  }
 0x236   : > { %6600 = vmatprep.subr.bf16.mxu0 %v10845_v7  ;;  %v9145_v24 = vpop.f32.mrb[36].mxu1  ;;  %7357 = vmatprep.mubr.bf16.mxu1 %v11179_v25  ;;  %v10870_v7 = vld [vmem:[%s11362_s5 + $0xdd0] ss:$12 sps:$4 sm:$0xff]   ;;  %v10882_v25 = vld [vmem:[%s11362_s5 + $0xec0] ss:$12 sps:$4 sm:$0xff]  }
 0x237   : > { %6618 = vmatprep.mubr.bf16.mxu0 %v10899_v14  ;;  %v9146_v38 = vpop.f32.mrb[37].mxu1  ;;  %v11183_v14 = vld [vmem:[%s13325_s0 + $0x224] ss:$120 sps:$4 sm:$0xff]  }
 0x238   : > { %v9147_v28 = vadd.f32 %v9146_v38, %v9145_v24  ;;  %v9148_v29 = vpop.f32.mrb[38].mxu1  ;;  %9418 = vmatpush3.bf16.msra.mxu1 %v10847_v32  ;;  %v11184_v38 = vld [vmem:[%s13325_s0 + $0x220] ss:$120 sps:$4 sm:$0xff]  }
 0x239   : > { %6601 = vmatpush1.bf16.msra.mxu0 %v10843_v18  ;;  %v9149_v33 = vpop.f32.mrb[39].mxu1  ;;  %9443 = vmatprep.subr.bf16.mxu1 %v10851_v23  ;;  %v10878_v18 = vld [vmem:[%s11362_s5 + $0xde8] ss:$12 sps:$4 sm:$0xff]  }
 0x23a   : > { %6602 = vmatprep.subr.bf16.mxu0 %v10850_v21  ;;  %v12449_v36 = vadd.f32 %v9147_v28, %v12351_v54  ;;  %v9150_v39 = vadd.f32 %v9149_v33, %v9148_v29  ;;  %v10863_v54 = vld [vmem:[%s11362_s5 + $0xe78] ss:$12 sps:$4 sm:$0xff]   ;;  %v10881_v23 = vld [vmem:[%s11362_s5 + $0x133c] ss:$12 sps:$4 sm:$0xff]  }
 0x23b   : > { %7358 = vmatmul.mubr.bf16.vlgmr.msra.gmra.mrb[144].mxu1 %v11180_v42  ;;  %v10879_v28 = vld [vmem:[%s11362_s5 + $0x1338] ss:$12 sps:$4 sm:$0xff]   ;;  %v10886_v42 = vld [vmem:[%s11362_s5 + $0x1350] ss:$12 sps:$4 sm:$0xff]  }
 0x23c   : > { %v12456_v44 = vadd.f32 %v9150_v39, %v12355_v60  ;;  %9444 = vmatpush3.bf16.msra.mxu1 %v10852_v27  ;;  %7365 = vmatprep.mubr.bf16.mxu1 %v11181_v51  ;;  %v10889_v33 = vld [vmem:[%s11362_s5 + $0xed8] ss:$12 sps:$4 sm:$0xff]   ;;  %v11185_v39 = vld [vmem:[%s13325_s0 + $0x314] ss:$120 sps:$4 sm:$0xff]   ;;  %v10895_v51 = vld [vmem:[%s11362_s5 + $0xef0] ss:$12 sps:$4 sm:$0xff]  }
 0x23d   : > { %6603 = vmatpush1.bf16.msra.mxu0 %v10848_v26  ;;  %9445 = vmatprep.subr.bf16.mxu1 %v10856_v34 }
 0x23e   : > { %6604 = vmatprep.subr.bf16.mxu0 %v10855_v30  ;;  %v9151_v49 = vpop.f32.mrb[40].mxu1  ;;  %v10883_v30 = vld [vmem:[%s11362_s5 + $0xe00] ss:$12 sps:$4 sm:$0xff]  }
 0x23f   : > { %v9152_v60 = vpop.f32.mrb[41].mxu1 }
 0x240   : > { %v9153_v57 = vadd.f32 %v9152_v60, %v9151_v49  ;;  %v9154_v58 = vpop.f32.mrb[42].mxu1  ;;  %9446 = vmatpush3.bf16.msra.mxu1 %v10857_v45  ;;  %v11186_v60 = vld [vmem:[%s13325_s0 + $0x310] ss:$120 sps:$4 sm:$0xff]  }
 0x241   : > { %6605 = vmatpush1.bf16.msra.mxu0 %v10853_v43  ;;  %v9155_v62 = vpop.f32.mrb[43].mxu1  ;;  %9447 = vmatprep.subr.bf16.mxu1 %v10863_v54  ;;  %v10894_v54 = vld [vmem:[%s11362_s5 + $0x136c] ss:$12 sps:$4 sm:$0xff]  }
 0x242   : > { %6606 = vmatprep.subr.bf16.mxu0 %v10862_v48  ;;  %v12469_v1 = vadd.f32 %v9153_v57, %v12375_v15  ;;  %v9156_v3 = vadd.f32 %v9155_v62, %v9154_v58  ;;  %v10876_v15 = vld [vmem:[%s11362_s5 + $0xea8] ss:$12 sps:$4 sm:$0xff]   ;;  %v10891_v48 = vld [vmem:[%s11362_s5 + $0xe18] ss:$12 sps:$4 sm:$0xff]   ;;  %v10896_v58 = vld [vmem:[%s11362_s5 + $0xe30] ss:$12 sps:$4 sm:$0xff]  }
 0x243   : > { %7366 = vmatmul.mubr.bf16.gmra.mrb[148].mxu1 %v11182_v4  ;;  %v10892_v57 = vld [vmem:[%s11362_s5 + $0x1368] ss:$12 sps:$4 sm:$0xff]   ;;  %v10902_v62 = vld [vmem:[%s11362_s5 + $0x1384] ss:$12 sps:$4 sm:$0xff]  }
 0x244   : > { %v12477_v8 = vadd.f32 %v9156_v3, %v12379_v22  ;;  %9448 = vmatpush3.bf16.msra.mxu1 %v10865_v56  ;;  %7373 = vmatprep.mubr.bf16.mxu1 %v11183_v14  ;;  %v11187_v4 = vld [vmem:[%s13325_s0 + $0x4c] ss:$120 sps:$4 sm:$0xff]  }
 0x245   : > { %6607 = vmatpush1.bf16.msra.mxu0 %v10860_v53  ;;  %9449 = vmatprep.subr.bf16.mxu1 %v10869_v63  ;;  %v10903_v63 = vld [vmem:[%s11362_s5 + $0xfc8] ss:$12 sps:$4 sm:$0xff]  }
 0x246   : > { %6608 = vmatprep.subr.bf16.mxu0 %v10868_v59  ;;  %v9157_v12 = vpop.f32.mrb[44].mxu1 }
 0x247   : > { %v9158_v32 = vpop.f32.mrb[45].mxu1 }
 0x248   : > { %v9159_v22 = vadd.f32 %v9158_v32, %v9157_v12  ;;  %v9160_v21 = vpop.f32.mrb[46].mxu1  ;;  %9450 = vmatpush3.bf16.msra.mxu1 %v10870_v7  ;;  %v10904_v7 = vld [vmem:[%s11362_s5 + $0xf08] ss:$12 sps:$4 sm:$0xff]  }
 0x249   : > { %6609 = vmatpush1.bf16.msra.mxu0 %v10866_v6  ;;  %v9161_v24 = vpop.f32.mrb[47].mxu1  ;;  %9451 = vmatprep.subr.bf16.mxu1 %v10876_v15 }
 0x24a   : > { %6610 = vmatprep.subr.bf16.mxu0 %v10875_v9  ;;  %v12489_v26 = vadd.f32 %v9159_v22, %v12399_v41  ;;  %v9162_v27 = vadd.f32 %v9161_v24, %v9160_v21  ;;  %v10888_v41 = vld [vmem:[%s11362_s5 + $0x1354] ss:$12 sps:$4 sm:$0xff]   ;;  %v10907_v9 = vld [vmem:[%s11362_s5 + $0x139c] ss:$12 sps:$4 sm:$0xff]  }
 0x24b   : > { %7374 = vmatmul.mubr.bf16.gmra.mrb[152].mxu1 %v11184_v38  ;;  %v12539_v22 = vld [vmem:[%s13325_s0 + $0x154] ss:$120 sps:$4 sm:$0xff]   ;;  %v11188_v21 = vld [vmem:[%s13325_s0 + $0x48] ss:$120 sps:$4 sm:$0xff]  }
 0x24c   : > { %v12496_v29 = vadd.f32 %v9162_v27, %v12403_v46  ;;  %9452 = vmatpush3.bf16.msra.mxu1 %v10878_v18  ;;  %7381 = vmatprep.mubr.bf16.mxu1 %v11185_v39  ;;  %v10913_v27 = vld [vmem:[%s11362_s5 + $0xff8] ss:$12 sps:$4 sm:$0xff]  }
 0x24d   : > { %6611 = vmatpush1.bf16.msra.mxu0 %v10873_v17  ;;  %9453 = vmatprep.subr.bf16.mxu1 %v10882_v25  ;;  %v10908_v17 = vld [vmem:[%s11362_s5 + $0xfe0] ss:$12 sps:$4 sm:$0xff]  }
 0x24e   : > { %6612 = vmatprep.subr.bf16.mxu0 %v10881_v23  ;;  %v9179_v34 = vpop.f32.mrb[48].mxu1  ;;  %v10905_v23 = vld [vmem:[%s11362_s5 + $0x1398] ss:$12 sps:$4 sm:$0xff]   ;;  %v10912_v25 = vld [vmem:[%s11362_s5 + $0x13b4] ss:$12 sps:$4 sm:$0xff]  }
 0x24f   : > { %v9180_v46 = vpop.f32.mrb[49].mxu1 }
 0x250   : > { %v9181_v43 = vadd.f32 %v9180_v46, %v9179_v34  ;;  %v9182_v45 = vpop.f32.mrb[50].mxu1  ;;  %9454 = vmatpush3.bf16.msra.mxu1 %v10883_v30  ;;  %v10910_v30 = vld [vmem:[%s11362_s5 + $0x13b0] ss:$12 sps:$4 sm:$0xff]   ;;  %v10917_v46 = vld [vmem:[%s11362_s5 + $0x13cc] ss:$12 sps:$4 sm:$0xff]  }
 0x251   : > { %6613 = vmatpush1.bf16.msra.mxu0 %v10879_v28  ;;  %v9183_v49 = vpop.f32.mrb[51].mxu1  ;;  %9455 = vmatprep.subr.bf16.mxu1 %v10889_v33  ;;  %v11189_v28 = vld [vmem:[%s13325_s0 + $0x13c] ss:$120 sps:$4 sm:$0xff]   ;;  %v12561_v33 = vld [vmem:[%s13325_s0 + $0x150] ss:$120 sps:$4 sm:$0xff]  }
 0x252   : > { %6614 = vmatprep.subr.bf16.mxu0 %v10888_v41  ;;  %v12509_v53 = vadd.f32 %v9181_v43, %v12426_v10  ;;  %v9184_v56 = vadd.f32 %v9183_v49, %v9182_v45  ;;  %v12523_v10 = vld [vmem:[%s13325_s0 + $0x60] ss:$120 sps:$4 sm:$0xff]   ;;  %v10918_v43 = vld [vmem:[%s11362_s5 + $0x1010] ss:$12 sps:$4 sm:$0xff]  }
 0x253   : > { %7382 = vmatmul.mubr.bf16.gmra.mrb[156].mxu1 %v11186_v60  ;;  %v10914_v41 = vld [vmem:[%s11362_s5 + $0xf38] ss:$12 sps:$4 sm:$0xff]  }
 0x254   : > { %v12517_v59 = vadd.f32 %v9184_v56, %v12436_v20  ;;  %9456 = vmatpush3.bf16.msra.mxu1 %v10891_v48  ;;  %7422 = vmatprep.mubr.bf16.mxu1 %v11187_v4  ;;  %v10900_v20 = vld [vmem:[%s11362_s5 + $0x1380] ss:$12 sps:$4 sm:$0xff]   ;;  %v11190_v49 = vld [vmem:[%s13325_s0 + $0x138] ss:$120 sps:$4 sm:$0xff]  }
 0x255   : > { %6615 = vmatpush1.bf16.msra.mxu0 %v10886_v42  ;;  %9457 = vmatprep.subr.bf16.mxu1 %v10895_v51  ;;  %v10919_v56 = vld [vmem:[%s11362_s5 + $0xf50] ss:$12 sps:$4 sm:$0xff]   ;;  %v12593_v4 = vld [vmem:[%s13325_s0 + $0x240] ss:$120 sps:$4 sm:$0xff]  }
 0x256   : > { %6616 = vmatprep.subr.bf16.mxu0 %v10894_v54  ;;  %v9185_v3 = vpop.f32.mrb[52].mxu1  ;;  %v12571_v54 = vld [vmem:[%s13325_s0 + $0x244] ss:$120 sps:$4 sm:$0xff]  }
 0x257   : > { %v9186_v6 = vpop.f32.mrb[53].mxu1  ;;  %v10922_v60 = vld [vmem:[%s11362_s5 + $0x13e4] ss:$12 sps:$4 sm:$0xff]  }
 0x258   : > { %v9187_v15 = vadd.f32 %v9186_v6, %v9185_v3  ;;  %v9188_v12 = vpop.f32.mrb[54].mxu1  ;;  %9458 = vmatpush3.bf16.msra.mxu1 %v10896_v58  ;;  %v10924_v3 = vld [vmem:[%s11362_s5 + $0xf68] ss:$12 sps:$4 sm:$0xff]  }
 0x259   : > { %6617 = vmatpush1.bf16.msra.mxu0 %v10892_v57  ;;  %v9189_v14 = vpop.f32.mrb[55].mxu1  ;;  %9483 = vmatprep.subr.bf16.mxu1 %v10903_v63  ;;  %v10923_v57 = vld [vmem:[%s11362_s5 + $0x1028] ss:$12 sps:$4 sm:$0xff]   ;;  %v10920_v63 = vld [vmem:[%s11362_s5 + $0x13e0] ss:$12 sps:$4 sm:$0xff]  }
 0x25a   : > { %6659 = vmatprep.subr.bf16.mxu0 %v10902_v62  ;;  %v12534_v18 = vadd.f32 %v9187_v15, %v12449_v36  ;;  %v9190_v32 = vadd.f32 %v9189_v14, %v9188_v12  ;;  %v10909_v36 = vld [vmem:[%s11362_s5 + $0xf20] ss:$12 sps:$4 sm:$0xff]  }
 0x25b   : > { %7423 = vmatmul.mubr.bf16.vlgmr.msra.gmra.mrb[160].mxu1 %v11188_v21  ;;  %v11191_v62 = vld [vmem:[%s13325_s0 + $0x22c] ss:$120 sps:$4 sm:$0xff]  }
 0x25c   : > { %6619 = vmatmul.mubr.bf16.vlgmr.msra.gmra.mrb[0].mxu0 %v12523_v10  ;;  %v12547_v24 = vadd.f32 %v9190_v32, %v12456_v44  ;;  %9484 = vmatpush3.bf16.msra.mxu1 %v10904_v7  ;;  %v10928_v15 = vld [vmem:[%s11362_s5 + $0x1040] ss:$12 sps:$4 sm:$0xff]  }
 0x25d   : > { %6660 = vmatpush1.bf16.msra.mxu0 %v10900_v20  ;;  %9485 = vmatprep.subr.bf16.mxu1 %v10908_v17  ;;  %v12603_v17 = vld [vmem:[%s13325_s0 + $0x334] ss:$120 sps:$4 sm:$0xff]   ;;  %v11192_v32 = vld [vmem:[%s13325_s0 + $0x228] ss:$120 sps:$4 sm:$0xff]  }
 0x25e   : > { %6661 = vmatprep.subr.bf16.mxu0 %v10907_v9  ;;  %v9191_v38 = vpop.f32.mrb[56].mxu1  ;;  %7430 = vmatprep.mubr.bf16.mxu1 %v11189_v28  ;;  %v10927_v9 = vld [vmem:[%s11362_s5 + $0x13fc] ss:$12 sps:$4 sm:$0xff]  }
 0x25f   : > { %6628 = vmatprep.mubr.bf16.mxu0 %v12539_v22  ;;  %v9192_v44 = vpop.f32.mrb[57].mxu1  ;;  %v10930_v28 = vld [vmem:[%s11362_s5 + $0x1410] ss:$12 sps:$4 sm:$0xff]  }
 0x260   : > { %v9193_v34 = vadd.f32 %v9192_v44, %v9191_v38  ;;  %v9194_v39 = vpop.f32.mrb[58].mxu1  ;;  %9486 = vmatpush3.bf16.msra.mxu1 %v10909_v36  ;;  %v10932_v36 = vld [vmem:[%s11362_s5 + $0x1414] ss:$12 sps:$4 sm:$0xff]  }
 0x261   : > { %6662 = vmatpush1.bf16.msra.mxu0 %v10905_v23  ;;  %v9195_v42 = vpop.f32.mrb[59].mxu1  ;;  %9487 = vmatprep.subr.bf16.mxu1 %v10913_v27  ;;  %v10929_v23 = vld [vmem:[%s11362_s5 + $0xf80] ss:$12 sps:$4 sm:$0xff]   ;;  %v11193_v38 = vld [vmem:[%s13325_s0 + $0x31c] ss:$120 sps:$4 sm:$0xff]  }
 0x262   : > { %6663 = vmatprep.subr.bf16.mxu0 %v10912_v25  ;;  %v12566_v45 = vadd.f32 %v9193_v34, %v12469_v1  ;;  %v9196_v48 = vadd.f32 %v9195_v42, %v9194_v39  ;;  %v10915_v1 = vld [vmem:[%s11362_s5 + $0x13c8] ss:$12 sps:$4 sm:$0xff]   ;;  %v10933_v25 = vld [vmem:[%s11362_s5 + $0x1058] ss:$12 sps:$4 sm:$0xff]  }
 0x263   : > { %7431 = vmatmul.mubr.bf16.gmra.mrb[164].mxu1 %v11190_v49  ;;  %v10937_v42 = vld [vmem:[%s11362_s5 + $0x142c] ss:$12 sps:$4 sm:$0xff]  }
 0x264   : > { %6629 = vmatmul.mubr.bf16.gmra.mrb[4].mxu0 %v12561_v33  ;;  %v12578_v51 = vadd.f32 %v9196_v48, %v12477_v8  ;;  %9488 = vmatpush3.bf16.msra.mxu1 %v10914_v41  ;;  %v12625_v41 = vld [vmem:[%s13325_s0 + $0x330] ss:$120 sps:$4 sm:$0xff]   ;;  %v12635_v49 = vld [vmem:[%s13325_s0 + $0x6c] ss:$120 sps:$4 sm:$0xff]  }
 0x265   : > { %6664 = vmatpush1.bf16.msra.mxu0 %v10910_v30  ;;  %9489 = vmatprep.subr.bf16.mxu1 %v10918_v43  ;;  %v10934_v30 = vld [vmem:[%s11362_s5 + $0xf98] ss:$12 sps:$4 sm:$0xff]  }
 0x266   : > { %6665 = vmatprep.subr.bf16.mxu0 %v10917_v46  ;;  %v9197_v58 = vpop.f32.mrb[60].mxu1  ;;  %7438 = vmatprep.mubr.bf16.mxu1 %v11191_v62  ;;  %v10938_v46 = vld [vmem:[%s11362_s5 + $0x1070] ss:$12 sps:$4 sm:$0xff]  }
 0x267   : > { %6638 = vmatprep.mubr.bf16.mxu0 %v12571_v54  ;;  %v9198_v8 = vpop.f32.mrb[61].mxu1 }
 0x268   : > { %v9199_v20 = vadd.f32 %v9198_v8, %v9197_v58  ;;  %v9200_v6 = vpop.f32.mrb[62].mxu1  ;;  %9490 = vmatpush3.bf16.msra.mxu1 %v10919_v56  ;;  %v10943_v58 = vld [vmem:[%s11362_s5 + $0x1148] ss:$12 sps:$4 sm:$0xff]  }
 0x269   : > { %6666 = vmatpush1.bf16.msra.mxu0 %v10915_v1  ;;  %v9201_v7 = vpop.f32.mrb[63].mxu1  ;;  %9491 = vmatprep.subr.bf16.mxu1 %v10923_v57  ;;  %v11194_v1 = vld [vmem:[%s13325_s0 + $0x318] ss:$120 sps:$4 sm:$0xff]   ;;  %v10944_v8 = vld [vmem:[%s11362_s5 + $0x1088] ss:$12 sps:$4 sm:$0xff]  }
 0x26a   : > { %6667 = vmatprep.subr.bf16.mxu0 %v10922_v60  ;;  %v12598_v12 = vadd.f32 %v9199_v20, %v12489_v26  ;;  %v9202_v14 = vadd.f32 %v9201_v7, %v9200_v6  ;;  %v10925_v26 = vld [vmem:[%s11362_s5 + $0x13f8] ss:$12 sps:$4 sm:$0xff]   ;;  %v10939_v60 = vld [vmem:[%s11362_s5 + $0xfb0] ss:$12 sps:$4 sm:$0xff]  }
 0x26b   : > { %7439 = vmatmul.mubr.bf16.gmra.mrb[168].mxu1 %v11192_v32  ;;  %v10942_v57 = vld [vmem:[%s11362_s5 + $0x1444] ss:$12 sps:$4 sm:$0xff]  }
 0x26c   : > { %6639 = vmatmul.mubr.bf16.gmra.mrb[8].mxu0 %v12593_v4  ;;  %v12610_v21 = vadd.f32 %v9202_v14, %v12496_v29  ;;  %9492 = vmatpush3.bf16.msra.mxu1 %v10924_v3  ;;  %v10940_v3 = vld [vmem:[%s11362_s5 + $0x1440] ss:$12 sps:$4 sm:$0xff]  }
 0x26d   : > { %6668 = vmatpush1.bf16.msra.mxu0 %v10920_v63  ;;  %9493 = vmatprep.subr.bf16.mxu1 %v10928_v15  ;;  %v11195_v63 = vld [vmem:[%s13325_s0 + $0x54] ss:$120 sps:$4 sm:$0xff]  }
 0x26e   : > { %6669 = vmatprep.subr.bf16.mxu0 %v10927_v9  ;;  %v9219_v27 = vpop.f32.mrb[64].mxu1  ;;  %7446 = vmatprep.mubr.bf16.mxu1 %v11193_v38  ;;  %v10947_v9 = vld [vmem:[%s11362_s5 + $0x145c] ss:$12 sps:$4 sm:$0xff]   ;;  %v10948_v15 = vld [vmem:[%s11362_s5 + $0x1160] ss:$12 sps:$4 sm:$0xff]  }
 0x26f   : > { %6648 = vmatprep.mubr.bf16.mxu0 %v12603_v17  ;;  %v9220_v29 = vpop.f32.mrb[65].mxu1 }
 0x270   : > { %v9221_v44 = vadd.f32 %v9220_v29, %v9219_v27  ;;  %v9222_v34 = vpop.f32.mrb[66].mxu1  ;;  %9494 = vmatpush3.bf16.msra.mxu1 %v10929_v23  ;;  %v10954_v27 = vld [vmem:[%s11362_s5 + $0x1474] ss:$12 sps:$4 sm:$0xff]   ;;  %v10957_v29 = vld [vmem:[%s11362_s5 + $0x10b8] ss:$12 sps:$4 sm:$0xff]  }
 0x271   : > { %6670 = vmatpush1.bf16.msra.mxu0 %v10925_v26  ;;  %v9223_v39 = vpop.f32.mrb[67].mxu1  ;;  %9495 = vmatprep.subr.bf16.mxu1 %v10933_v25  ;;  %v11196_v26 = vld [vmem:[%s13325_s0 + $0x50] ss:$120 sps:$4 sm:$0xff]   ;;  %v10949_v25 = vld [vmem:[%s11362_s5 + $0x10a0] ss:$12 sps:$4 sm:$0xff]  }
 0x272   : > { %6671 = vmatprep.subr.bf16.mxu0 %v10932_v36  ;;  %v12630_v43 = vadd.f32 %v9221_v44, %v12509_v53  ;;  %v9224_v48 = vadd.f32 %v9223_v39, %v9222_v34  ;;  %v10935_v53 = vld [vmem:[%s11362_s5 + $0x1428] ss:$12 sps:$4 sm:$0xff]   ;;  %v10945_v36 = vld [vmem:[%s11362_s5 + $0x1458] ss:$12 sps:$4 sm:$0xff]  }
 0x273   : > { %7447 = vmatmul.mubr.bf16.gmra.mrb[172].mxu1 %v11194_v1  ;;  %v10960_v44 = vld [vmem:[%s11362_s5 + $0x148c] ss:$12 sps:$4 sm:$0xff]  }
 0x274   : > { %6649 = vmatmul.mubr.bf16.gmra.mrb[12].mxu0 %v12625_v41  ;;  %v12642_v56 = vadd.f32 %v9224_v48, %v12517_v59  ;;  %9496 = vmatpush3.bf16.msra.mxu1 %v10934_v30  ;;  %v10952_v30 = vld [vmem:[%s11362_s5 + $0x1470] ss:$12 sps:$4 sm:$0xff]  }
 0x275   : > { %6672 = vmatpush1.bf16.msra.mxu0 %v10930_v28  ;;  %9497 = vmatprep.subr.bf16.mxu1 %v10938_v46  ;;  %v11197_v28 = vld [vmem:[%s13325_s0 + $0x144] ss:$120 sps:$4 sm:$0xff]  }
 0x276   : > { %6673 = vmatprep.subr.bf16.mxu0 %v10937_v42  ;;  %v9225_v62 = vpop.f32.mrb[68].mxu1  ;;  %7487 = vmatprep.mubr.bf16.mxu1 %v11195_v63  ;;  %v10961_v42 = vld [vmem:[%s11362_s5 + $0x1190] ss:$12 sps:$4 sm:$0xff]  }
 0x277   : > { %6691 = vmatprep.mubr.bf16.mxu0 %v12635_v49  ;;  %v9226_v59 = vpop.f32.mrb[69].mxu1 }
 0x278   : > { %v9227_v20 = vadd.f32 %v9226_v59, %v9225_v62  ;;  %v9228_v6 = vpop.f32.mrb[70].mxu1  ;;  %9498 = vmatpush3.bf16.msra.mxu1 %v10939_v60  ;;  %v11198_v60 = vld [vmem:[%s13325_s0 + $0x140] ss:$120 sps:$4 sm:$0xff]   ;;  %v10967_v62 = vld [vmem:[%s11362_s5 + $0x14a4] ss:$12 sps:$4 sm:$0xff]  }
 0x279   : > { %6674 = vmatpush1.bf16.msra.mxu0 %v10935_v53  ;;  %v9229_v7 = vpop.f32.mrb[71].mxu1  ;;  %9523 = vmatprep.subr.bf16.mxu1 %v10943_v58  ;;  %v10958_v53 = vld [vmem:[%s11362_s5 + $0x1488] ss:$12 sps:$4 sm:$0xff]  }
 0x27a   : > { %6675 = vmatprep.subr.bf16.mxu0 %v10942_v57  ;;  %v12657_v14 = vadd.f32 %v9227_v20, %v12534_v18  ;;  %v9230_v32 = vadd.f32 %v9229_v7, %v9228_v6  ;;  %v10955_v18 = vld [vmem:[%s11362_s5 + $0x1178] ss:$12 sps:$4 sm:$0xff]   ;;  %v10962_v57 = vld [vmem:[%s11362_s5 + $0x10d0] ss:$12 sps:$4 sm:$0xff]   ;;  %v10970_v20 = vld [vmem:[%s11362_s5 + $0x10e8] ss:$12 sps:$4 sm:$0xff]  }
 0x27b   : > { %7488 = vmatmul.mubr.bf16.vlgmr.msra.gmra.mrb[176].mxu1 %v11196_v26  ;;  %v10973_v7 = vld [vmem:[%s11362_s5 + $0x14bc] ss:$12 sps:$4 sm:$0xff]  }
 0x27c   : > { %v12663_v23 = vadd.f32 %v9230_v32, %v12547_v24  ;;  %9524 = vmatpush3.bf16.msra.mxu1 %v10944_v8  ;;  %7495 = vmatprep.mubr.bf16.mxu1 %v11197_v28  ;;  %v10965_v8 = vld [vmem:[%s11362_s5 + $0x14a0] ss:$12 sps:$4 sm:$0xff]  }
 0x27d   : > { %6676 = vmatpush1.bf16.msra.mxu0 %v10940_v3  ;;  %9525 = vmatprep.subr.bf16.mxu1 %v10948_v15  ;;  %v11199_v3 = vld [vmem:[%s13325_s0 + $0x234] ss:$120 sps:$4 sm:$0xff]  }
 0x27e   : > { %6677 = vmatprep.subr.bf16.mxu0 %v10947_v9  ;;  %v9231_v38 = vpop.f32.mrb[72].mxu1  ;;  %v10974_v15 = vld [vmem:[%s11362_s5 + $0x11c0] ss:$12 sps:$4 sm:$0xff]  }
 0x27f   : > { %v9232_v24 = vpop.f32.mrb[73].mxu1 }
 0x280   : > { %v9233_v34 = vadd.f32 %v9232_v24, %v9231_v38  ;;  %v9234_v39 = vpop.f32.mrb[74].mxu1  ;;  %9526 = vmatpush3.bf16.msra.mxu1 %v10949_v25  ;;  %v10971_v25 = vld [vmem:[%s11362_s5 + $0x14b8] ss:$12 sps:$4 sm:$0xff]  }
 0x281   : > { %6678 = vmatpush1.bf16.msra.mxu0 %v10945_v36  ;;  %v9235_v46 = vpop.f32.mrb[75].mxu1  ;;  %9527 = vmatprep.subr.bf16.mxu1 %v10955_v18  ;;  %v11200_v36 = vld [vmem:[%s13325_s0 + $0x230] ss:$120 sps:$4 sm:$0xff]   ;;  %v10975_v18 = vld [vmem:[%s11362_s5 + $0x1100] ss:$12 sps:$4 sm:$0xff]  }
 0x282   : > { %6679 = vmatprep.subr.bf16.mxu0 %v10954_v27  ;;  %v12677_v48 = vadd.f32 %v9233_v34, %v12566_v45  ;;  %v9236_v1 = vadd.f32 %v9235_v46, %v9234_v39  ;;  %v10968_v45 = vld [vmem:[%s11362_s5 + $0x11a8] ss:$12 sps:$4 sm:$0xff]   ;;  %v10981_v38 = vld [vmem:[%s11362_s5 + $0x11d8] ss:$12 sps:$4 sm:$0xff]   ;;  %v10987_v46 = vld [vmem:[%s11362_s5 + $0x11f0] ss:$12 sps:$4 sm:$0xff]  }
 0x283   : > { %7496 = vmatmul.mubr.bf16.gmra.mrb[180].mxu1 %v11198_v60  ;;  %v10983_v24 = vld [vmem:[%s11362_s5 + $0x1118] ss:$12 sps:$4 sm:$0xff]  }
 0x284   : > { %v12685_v58 = vadd.f32 %v9236_v1, %v12578_v51  ;;  %9528 = vmatpush3.bf16.msra.mxu1 %v10957_v29  ;;  %7503 = vmatprep.mubr.bf16.mxu1 %v11199_v3  ;;  %v10978_v29 = vld [vmem:[%s11362_s5 + $0x14d0] ss:$12 sps:$4 sm:$0xff]   ;;  %v10986_v39 = vld [vmem:[%s11362_s5 + $0x14ec] ss:$12 sps:$4 sm:$0xff]  }
 0x285   : > { %6680 = vmatpush1.bf16.msra.mxu0 %v10952_v30  ;;  %9529 = vmatprep.subr.bf16.mxu1 %v10961_v42  ;;  %v11201_v30 = vld [vmem:[%s13325_s0 + $0x324] ss:$120 sps:$4 sm:$0xff]   ;;  %v11202_v60 = vld [vmem:[%s13325_s0 + $0x320] ss:$120 sps:$4 sm:$0xff]  }
 0x286   : > { %6681 = vmatprep.subr.bf16.mxu0 %v10960_v44  ;;  %v9237_v63 = vpop.f32.mrb[76].mxu1 }
 0x287   : > { %v9238_v59 = vpop.f32.mrb[77].mxu1 }
 0x288   : > { %v9239_v51 = vadd.f32 %v9238_v59, %v9237_v63  ;;  %v9240_v6 = vpop.f32.mrb[78].mxu1  ;;  %9530 = vmatpush3.bf16.msra.mxu1 %v10962_v57  ;;  %v10994_v63 = vld [vmem:[%s11362_s5 + $0x1504] ss:$12 sps:$4 sm:$0xff]   ;;  %v11203_v59 = vld [vmem:[%s13325_s0 + $0x5c] ss:$120 sps:$4 sm:$0xff]  }
 0x289   : > { %6682 = vmatpush1.bf16.msra.mxu0 %v10958_v53  ;;  %v9241_v9 = vpop.f32.mrb[79].mxu1  ;;  %9531 = vmatprep.subr.bf16.mxu1 %v10968_v45  ;;  %v10988_v45 = vld [vmem:[%s11362_s5 + $0x1130] ss:$12 sps:$4 sm:$0xff]  }
 0x28a   : > { %6683 = vmatprep.subr.bf16.mxu0 %v10967_v62  ;;  %v12697_v32 = vadd.f32 %v9239_v51, %v12598_v12  ;;  %v9242_v26 = vadd.f32 %v9241_v9, %v9240_v6  ;;  %v10980_v12 = vld [vmem:[%s11362_s5 + $0x14d4] ss:$12 sps:$4 sm:$0xff]  }
 0x28b   : > { %7504 = vmatmul.mubr.bf16.gmra.mrb[184].mxu1 %v11200_v36  ;;  %v10984_v62 = vld [vmem:[%s11362_s5 + $0x14e8] ss:$12 sps:$4 sm:$0xff]   ;;  %v10992_v6 = vld [vmem:[%s11362_s5 + $0x1500] ss:$12 sps:$4 sm:$0xff]  }
 0x28c   : > { %v12704_v27 = vadd.f32 %v9242_v26, %v12610_v21  ;;  %9532 = vmatpush3.bf16.msra.mxu1 %v10970_v20  ;;  %7511 = vmatprep.mubr.bf16.mxu1 %v11201_v30  ;;  %v11000_v26 = vld [vmem:[%s11362_s5 + $0x12e0] ss:$12 sps:$4 sm:$0xff]  }
 0x28d   : > { %6684 = vmatpush1.bf16.msra.mxu0 %v10965_v8  ;;  %9533 = vmatprep.subr.bf16.mxu1 %v10974_v15  ;;  %v12735_v8 = vld [vmem:[%s13325_s0 + $0x68] ss:$120 sps:$4 sm:$0xff]  }
 0x28e   : > { %6685 = vmatprep.subr.bf16.mxu0 %v10973_v7  ;;  %v9259_v28 = vpop.f32.mrb[80].mxu1  ;;  %v10996_v7 = vld [vmem:[%s11362_s5 + $0x1208] ss:$12 sps:$4 sm:$0xff]  }
 0x28f   : > { %v9260_v44 = vpop.f32.mrb[81].mxu1  ;;  %v10999_v15 = vld [vmem:[%s11362_s5 + $0x151c] ss:$12 sps:$4 sm:$0xff]   ;;  %v11004_v30 = vld [vmem:[%s11362_s5 + $0x1534] ss:$12 sps:$4 sm:$0xff]  }
 0x290   : > { %v9261_v21 = vadd.f32 %v9260_v44, %v9259_v28  ;;  %v9262_v34 = vpop.f32.mrb[82].mxu1  ;;  %9534 = vmatpush3.bf16.msra.mxu1 %v10975_v18  ;;  %v12747_v18 = vld [vmem:[%s13325_s0 + $0x15c] ss:$120 sps:$4 sm:$0xff]   ;;  %v11001_v28 = vld [vmem:[%s11362_s5 + $0x1220] ss:$12 sps:$4 sm:$0xff]  }
 0x291   : > { %6686 = vmatpush1.bf16.msra.mxu0 %v10971_v25  ;;  %v9263_v42 = vpop.f32.mrb[83].mxu1  ;;  %9535 = vmatprep.subr.bf16.mxu1 %v10981_v38  ;;  %v11205_v44 = vld [vmem:[%s13325_s0 + $0x14c] ss:$120 sps:$4 sm:$0xff]  }
 0x292   : > { %6687 = vmatprep.subr.bf16.mxu0 %v10980_v12  ;;  %v12717_v1 = vadd.f32 %v9261_v21, %v12630_v43  ;;  %v9264_v53 = vadd.f32 %v9263_v42, %v9262_v34  ;;  %v10995_v43 = vld [vmem:[%s11362_s5 + $0x12c8] ss:$12 sps:$4 sm:$0xff]   ;;  %v11204_v12 = vld [vmem:[%s13325_s0 + $0x58] ss:$120 sps:$4 sm:$0xff]  }
 0x293   : > { %7512 = vmatmul.mubr.bf16.gmra.mrb[188].mxu1 %v11202_v60  ;;  %v12767_v21 = vld [vmem:[%s13325_s0 + $0x158] ss:$120 sps:$4 sm:$0xff]  }
 0x294   : > { %v12723_v57 = vadd.f32 %v9264_v53, %v12642_v56  ;;  %9536 = vmatpush3.bf16.msra.mxu1 %v10983_v24  ;;  %7552 = vmatprep.mubr.bf16.mxu1 %v11203_v59  ;;  %v11002_v42 = vld [vmem:[%s11362_s5 + $0x1530] ss:$12 sps:$4 sm:$0xff]   ;;  %v11009_v60 = vld [vmem:[%s11362_s5 + $0x154c] ss:$12 sps:$4 sm:$0xff]  }
 0x295   : > { %6688 = vmatpush1.bf16.msra.mxu0 %v10978_v29  ;;  %9537 = vmatprep.subr.bf16.mxu1 %v10987_v46  ;;  %v11005_v29 = vld [vmem:[%s11362_s5 + $0x12f8] ss:$12 sps:$4 sm:$0xff]  }
 0x296   : > { %6689 = vmatprep.subr.bf16.mxu0 %v10986_v39  ;;  %v9265_v3 = vpop.f32.mrb[84].mxu1  ;;  %v11006_v46 = vld [vmem:[%s11362_s5 + $0x1238] ss:$12 sps:$4 sm:$0xff]  }
 0x297   : > { %v9266_v56 = vpop.f32.mrb[85].mxu1 }
 0x298   : > { %v9267_v20 = vadd.f32 %v9266_v56, %v9265_v3  ;;  %v9268_v51 = vpop.f32.mrb[86].mxu1  ;;  %9538 = vmatpush3.bf16.msra.mxu1 %v10988_v45  ;;  %v11206_v3 = vld [vmem:[%s13325_s0 + $0x148] ss:$120 sps:$4 sm:$0xff]   ;;  %v11011_v56 = vld [vmem:[%s11362_s5 + $0x1250] ss:$12 sps:$4 sm:$0xff]  }
 0x299   : > { %6690 = vmatpush1.bf16.msra.mxu0 %v10984_v62  ;;  %v9269_v9 = vpop.f32.mrb[87].mxu1  ;;  %9563 = vmatprep.subr.bf16.mxu1 %v10995_v43  ;;  %v11010_v62 = vld [vmem:[%s11362_s5 + $0x1310] ss:$12 sps:$4 sm:$0xff]   ;;  %v12779_v43 = vld [vmem:[%s13325_s0 + $0x24c] ss:$120 sps:$4 sm:$0xff]  }
 0x29a   : > { %6732 = vmatprep.subr.bf16.mxu0 %v10994_v63  ;;  %v12742_v36 = vadd.f32 %v9267_v20, %v12657_v14  ;;  %v9270_v25 = vadd.f32 %v9269_v9, %v9268_v51  ;;  %v10997_v14 = vld [vmem:[%s11362_s5 + $0x1518] ss:$12 sps:$4 sm:$0xff]   ;;  %v11015_v51 = vld [vmem:[%s11362_s5 + $0x1328] ss:$12 sps:$4 sm:$0xff]  }
 0x29b   : > { %7553 = vmatmul.mubr.bf16.vlgmr.msra.gmra.mrb[192].mxu1 %v11204_v12  ;;  %v11014_v20 = vld [vmem:[%s11362_s5 + $0x1564] ss:$12 sps:$4 sm:$0xff]   ;;  %v12799_v9 = vld [vmem:[%s13325_s0 + $0x248] ss:$120 sps:$4 sm:$0xff]  }
 0x29c   : > { %6692 = vmatmul.mubr.bf16.vlgmr.msra.gmra.mrb[0].mxu0 %v12735_v8  ;;  %v12754_v38 = vadd.f32 %v9270_v25, %v12663_v23  ;;  %9564 = vmatpush3.bf16.msra.mxu1 %v10996_v7  ;;  %v11207_v7 = vld [vmem:[%s13325_s0 + $0x23c] ss:$120 sps:$4 sm:$0xff]   ;;  %v11012_v25 = vld [vmem:[%s11362_s5 + $0x1560] ss:$12 sps:$4 sm:$0xff]  }
 0x29d   : > { %6733 = vmatpush1.bf16.msra.mxu0 %v10992_v6  ;;  %9565 = vmatprep.subr.bf16.mxu1 %v11000_v26  ;;  %v11016_v12 = vld [vmem:[%s11362_s5 + $0x1268] ss:$12 sps:$4 sm:$0xff]  }
 0x29e   : > { %6734 = vmatprep.subr.bf16.mxu0 %v10999_v15  ;;  %v9271_v24 = vpop.f32.mrb[88].mxu1  ;;  %7560 = vmatprep.mubr.bf16.mxu1 %v11205_v44  ;;  %v12811_v44 = vld [vmem:[%s13325_s0 + $0x33c] ss:$120 sps:$4 sm:$0xff]  }
 0x29f   : > { %6701 = vmatprep.mubr.bf16.mxu0 %v12747_v18  ;;  %v9272_v23 = vpop.f32.mrb[89].mxu1 }
 0x2a0   : > { %v9273_v34 = vadd.f32 %v9272_v23, %v9271_v24  ;;  %v9274_v39 = vpop.f32.mrb[90].mxu1  ;;  %9566 = vmatpush3.bf16.msra.mxu1 %v11001_v28  ;;  %v11019_v28 = vld [vmem:[%s11362_s5 + $0x157c] ss:$12 sps:$4 sm:$0xff]   ;;  %v11208_v23 = vld [vmem:[%s13325_s0 + $0x238] ss:$120 sps:$4 sm:$0xff]  }
 0x2a1   : > { %6735 = vmatpush1.bf16.msra.mxu0 %v10997_v14  ;;  %v9275_v53 = vpop.f32.mrb[91].mxu1  ;;  %9567 = vmatprep.subr.bf16.mxu1 %v11005_v29 }
 0x2a2   : > { %6736 = vmatprep.subr.bf16.mxu0 %v11004_v30  ;;  %v12774_v45 = vadd.f32 %v9273_v34, %v12677_v48  ;;  %v9276_v63 = vadd.f32 %v9275_v53, %v9274_v39  ;;  %v11007_v48 = vld [vmem:[%s11362_s5 + $0x1548] ss:$12 sps:$4 sm:$0xff]   ;;  %v11020_v30 = vld [vmem:[%s11362_s5 + $0x1340] ss:$12 sps:$4 sm:$0xff]  }
 0x2a3   : > { %7561 = vmatmul.mubr.bf16.gmra.mrb[196].mxu1 %v11206_v3  ;;  %v11021_v39 = vld [vmem:[%s11362_s5 + $0x1280] ss:$12 sps:$4 sm:$0xff]  }
 0x2a4   : > { %6702 = vmatmul.mubr.bf16.gmra.mrb[4].mxu0 %v12767_v21  ;;  %v12786_v59 = vadd.f32 %v9276_v63, %v12685_v58  ;;  %9568 = vmatpush3.bf16.msra.mxu1 %v11006_v46  ;;  %v11025_v46 = vld [vmem:[%s11362_s5 + $0x1358] ss:$12 sps:$4 sm:$0xff]  }
 0x2a5   : > { %6737 = vmatpush1.bf16.msra.mxu0 %v11002_v42  ;;  %9569 = vmatprep.subr.bf16.mxu1 %v11010_v62  ;;  %v11024_v42 = vld [vmem:[%s11362_s5 + $0x1594] ss:$12 sps:$4 sm:$0xff]   ;;  %v12831_v62 = vld [vmem:[%s13325_s0 + $0x338] ss:$120 sps:$4 sm:$0xff]  }
 0x2a6   : > { %6738 = vmatprep.subr.bf16.mxu0 %v11009_v60  ;;  %v9277_v6 = vpop.f32.mrb[92].mxu1  ;;  %7568 = vmatprep.mubr.bf16.mxu1 %v11207_v7  ;;  %v11209_v60 = vld [vmem:[%s13325_s0 + $0x32c] ss:$120 sps:$4 sm:$0xff]  }
 0x2a7   : > { %6711 = vmatprep.mubr.bf16.mxu0 %v12779_v43  ;;  %v9278_v58 = vpop.f32.mrb[93].mxu1 }
 0x2a8   : > { %v9279_v15 = vadd.f32 %v9278_v58, %v9277_v6  ;;  %v9280_v26 = vpop.f32.mrb[94].mxu1  ;;  %9570 = vmatpush3.bf16.msra.mxu1 %v11011_v56  ;;  %v11026_v56 = vld [vmem:[%s11362_s5 + $0x1298] ss:$12 sps:$4 sm:$0xff]   ;;  %v11030_v6 = vld [vmem:[%s11362_s5 + $0x1370] ss:$12 sps:$4 sm:$0xff]  }
 0x2a9   : > { %6739 = vmatpush1.bf16.msra.mxu0 %v11007_v48  ;;  %v9281_v14 = vpop.f32.mrb[95].mxu1  ;;  %9571 = vmatprep.subr.bf16.mxu1 %v11015_v51  ;;  %v11022_v48 = vld [vmem:[%s11362_s5 + $0x1590] ss:$12 sps:$4 sm:$0xff]   ;;  %v11029_v51 = vld [vmem:[%s11362_s5 + $0x15ac] ss:$12 sps:$4 sm:$0xff]  }
 0x2aa   : > { %6740 = vmatprep.subr.bf16.mxu0 %v11014_v20  ;;  %v12806_v29 = vadd.f32 %v9279_v15, %v12697_v32  ;;  %v9282_v24 = vadd.f32 %v9281_v14, %v9280_v26  ;;  %v11017_v32 = vld [vmem:[%s11362_s5 + $0x1578] ss:$12 sps:$4 sm:$0xff]   ;;  %v12843_v15 = vld [vmem:[%s13325_s0 + $0x74] ss:$120 sps:$4 sm:$0xff]   ;;  %v11210_v26 = vld [vmem:[%s13325_s0 + $0x328] ss:$120 sps:$4 sm:$0xff]  }
 0x2ab   : > { %7569 = vmatmul.mubr.bf16.gmra.mrb[200].mxu1 %v11208_v23  ;;  %v11034_v14 = vld [vmem:[%s11362_s5 + $0x15c4] ss:$12 sps:$4 sm:$0xff]  }
 0x2ac   : > { %6712 = vmatmul.mubr.bf16.gmra.mrb[8].mxu0 %v12799_v9  ;;  %v12818_v34 = vadd.f32 %v9282_v24, %v12704_v27  ;;  %9572 = vmatpush3.bf16.msra.mxu1 %v11016_v12  ;;  %v11031_v12 = vld [vmem:[%s11362_s5 + $0x12b0] ss:$12 sps:$4 sm:$0xff]  }
 0x2ad   : > { %6741 = vmatpush1.bf16.msra.mxu0 %v11012_v25  ;;  %9573 = vmatprep.subr.bf16.mxu1 %v11020_v30  ;;  %v11211_v24 = vld [vmem:[%s13325_s0 + $0x64] ss:$120 sps:$4 sm:$0xff]  }
 0x2ae   : > { %6742 = vmatprep.subr.bf16.mxu0 %v11019_v28  ;;  %v9299_v53 = vpop.f32.mrb[96].mxu1  ;;  %7576 = vmatprep.mubr.bf16.mxu1 %v11209_v60  ;;  %v11035_v28 = vld [vmem:[%s11362_s5 + $0x1448] ss:$12 sps:$4 sm:$0xff]   ;;  %v11040_v60 = vld [vmem:[%s11362_s5 + $0x1460] ss:$12 sps:$4 sm:$0xff]  }
 0x2af   : > { %6721 = vmatprep.mubr.bf16.mxu0 %v12811_v44  ;;  %v9300_v27 = vpop.f32.mrb[97].mxu1 }
 0x2b0   : > { %v9301_v63 = vadd.f32 %v9300_v27, %v9299_v53  ;;  %v9302_v3 = vpop.f32.mrb[98].mxu1  ;;  %9574 = vmatpush3.bf16.msra.mxu1 %v11021_v39  ;;  %v11032_v39 = vld [vmem:[%s11362_s5 + $0x15c0] ss:$12 sps:$4 sm:$0xff]   ;;  %v11039_v53 = vld [vmem:[%s11362_s5 + $0x15dc] ss:$12 sps:$4 sm:$0xff]  }
 0x2b1   : > { %6743 = vmatpush1.bf16.msra.mxu0 %v11017_v32  ;;  %v9303_v20 = vpop.f32.mrb[99].mxu1  ;;  %9575 = vmatprep.subr.bf16.mxu1 %v11025_v46 }
 0x2b2   : > { %6744 = vmatprep.subr.bf16.mxu0 %v11024_v42  ;;  %v12838_v7 = vadd.f32 %v9301_v63, %v12717_v1  ;;  %v9304_v58 = vadd.f32 %v9303_v20, %v9302_v3  ;;  %v11027_v1 = vld [vmem:[%s11362_s5 + $0x15a8] ss:$12 sps:$4 sm:$0xff]  }
 0x2b3   : > { %7577 = vmatmul.mubr.bf16.gmra.mrb[204].mxu1 %v11210_v26  ;;  %v11036_v42 = vld [vmem:[%s11362_s5 + $0x1388] ss:$12 sps:$4 sm:$0xff]   ;;  %v11049_v26 = vld [vmem:[%s11362_s5 + $0x13b8] ss:$12 sps:$4 sm:$0xff]  }
 0x2b4   : > { %6722 = vmatmul.mubr.bf16.gmra.mrb[12].mxu0 %v12831_v62  ;;  %v12850_v25 = vadd.f32 %v9304_v58, %v12723_v57  ;;  %9576 = vmatpush3.bf16.msra.mxu1 %v11026_v56  ;;  %v11041_v56 = vld [vmem:[%s11362_s5 + $0x13a0] ss:$12 sps:$4 sm:$0xff]   ;;  %v11045_v58 = vld [vmem:[%s11362_s5 + $0x15f0] ss:$12 sps:$4 sm:$0xff]  }
 0x2b5   : > { %6745 = vmatpush1.bf16.msra.mxu0 %v11022_v48  ;;  %9577 = vmatprep.subr.bf16.mxu1 %v11030_v6  ;;  %v11037_v48 = vld [vmem:[%s11362_s5 + $0x15d8] ss:$12 sps:$4 sm:$0xff]   ;;  %v11047_v20 = vld [vmem:[%s11362_s5 + $0x15f4] ss:$12 sps:$4 sm:$0xff]  }
 0x2b6   : > { %6746 = vmatprep.subr.bf16.mxu0 %v11029_v51  ;;  %v9305_v30 = vpop.f32.mrb[100].mxu1  ;;  %7617 = vmatprep.mubr.bf16.mxu1 %v11211_v24  ;;  %v11048_v51 = vld [vmem:[%s11362_s5 + $0x1478] ss:$12 sps:$4 sm:$0xff]   ;;  %v11050_v24 = vld [vmem:[%s11362_s5 + $0x1608] ss:$12 sps:$4 sm:$0xff]  }
 0x2b7   : > { %6764 = vmatprep.mubr.bf16.mxu0 %v12843_v15  ;;  %v9306_v57 = vpop.f32.mrb[101].mxu1 }
 0x2b8   : > { %v9307_v23 = vadd.f32 %v9306_v57, %v9305_v30  ;;  %v9308_v32 = vpop.f32.mrb[102].mxu1  ;;  %9578 = vmatpush3.bf16.msra.mxu1 %v11031_v12  ;;  %v11052_v12 = vld [vmem:[%s11362_s5 + $0x160c] ss:$12 sps:$4 sm:$0xff]   ;;  %v11054_v57 = vld [vmem:[%s11362_s5 + $0x13d0] ss:$12 sps:$4 sm:$0xff]  }
 0x2b9   : > { %6747 = vmatpush1.bf16.msra.mxu0 %v11027_v1  ;;  %v9309_v46 = vpop.f32.mrb[103].mxu1  ;;  %9603 = vmatprep.subr.bf16.mxu1 %v11035_v28 }
 0x2ba   : > { %6748 = vmatprep.subr.bf16.mxu0 %v11034_v14  ;;  %v12865_v27 = vadd.f32 %v9307_v23, %v12742_v36  ;;  %v9310_v63 = vadd.f32 %v9309_v46, %v9308_v32  ;;  %v11053_v14 = vld [vmem:[%s11362_s5 + $0x1490] ss:$12 sps:$4 sm:$0xff]   ;;  %v11061_v32 = vld [vmem:[%s11362_s5 + $0x14a8] ss:$12 sps:$4 sm:$0xff]  }
 0x2bb   : > { %7618 = vmatmul.mubr.bf16.vlgmr.msra.gmra.mrb[208].mxu1 %v12523_v10  ;;  %v11060_v23 = vld [vmem:[%s11362_s5 + $0x1624] ss:$12 sps:$4 sm:$0xff]   ;;  %v11062_v46 = vld [vmem:[%s11362_s5 + $0x13e8] ss:$12 sps:$4 sm:$0xff]  }
 0x2bc   : > { %v12869_v3 = vadd.f32 %v9310_v63, %v12754_v38  ;;  %9604 = vmatpush3.bf16.msra.mxu1 %v11036_v42  ;;  %7625 = vmatprep.mubr.bf16.mxu1 %v12539_v22  ;;  %v11058_v42 = vld [vmem:[%s11362_s5 + $0x1620] ss:$12 sps:$4 sm:$0xff]  }
 0x2bd   : > { %6749 = vmatpush1.bf16.msra.mxu0 %v11032_v39  ;;  %9605 = vmatprep.subr.bf16.mxu1 %v11040_v60  ;;  %v11065_v60 = vld [vmem:[%s11362_s5 + $0x163c] ss:$12 sps:$4 sm:$0xff]   ;;  %v11066_v63 = vld [vmem:[%s11362_s5 + $0x14c0] ss:$12 sps:$4 sm:$0xff]  }
 0x2be   : > { %6750 = vmatprep.subr.bf16.mxu0 %v11039_v53  ;;  %v9311_v36 = vpop.f32.mrb[104].mxu1 }
 0x2bf   : > { %v9312_v6 = vpop.f32.mrb[105].mxu1 }
 0x2c0   : > { %v9313_v10 = vadd.f32 %v9312_v6, %v9311_v36  ;;  %v9314_v38 = vpop.f32.mrb[106].mxu1  ;;  %9606 = vmatpush3.bf16.msra.mxu1 %v11041_v56  ;;  %v11073_v36 = vld [vmem:[%s11362_s5 + $0x1654] ss:$12 sps:$4 sm:$0xff]   ;;  %v11074_v6 = vld [vmem:[%s11362_s5 + $0x14d8] ss:$12 sps:$4 sm:$0xff]  }
 0x2c1   : > { %6751 = vmatpush1.bf16.msra.mxu0 %v11037_v48  ;;  %v9315_v1 = vpop.f32.mrb[107].mxu1  ;;  %9607 = vmatprep.subr.bf16.mxu1 %v11048_v51  ;;  %v11067_v51 = vld [vmem:[%s11362_s5 + $0x1400] ss:$12 sps:$4 sm:$0xff]  }
 0x2c2   : > { %6752 = vmatprep.subr.bf16.mxu0 %v11047_v20  ;;  %v12881_v28 = vadd.f32 %v9313_v10, %v12774_v45  ;;  %v9316_v22 = vadd.f32 %v9315_v1, %v9314_v38  ;;  %v11063_v20 = vld [vmem:[%s11362_s5 + $0x1638] ss:$12 sps:$4 sm:$0xff]   ;;  %v11071_v38 = vld [vmem:[%s11362_s5 + $0x1650] ss:$12 sps:$4 sm:$0xff]  }
 0x2c3   : > { %7626 = vmatmul.mubr.bf16.gmra.mrb[212].mxu1 %v12561_v33  ;;  %v11078_v1 = vld [vmem:[%s11362_s5 + $0x166c] ss:$12 sps:$4 sm:$0xff]  }
 0x2c4   : > { %v12885_v30 = vadd.f32 %v9316_v22, %v12786_v59  ;;  %9608 = vmatpush3.bf16.msra.mxu1 %v11049_v26  ;;  %7633 = vmatprep.mubr.bf16.mxu1 %v12571_v54 }
 0x2c5   : > { %6753 = vmatpush1.bf16.msra.mxu0 %v11045_v58  ;;  %9609 = vmatprep.subr.bf16.mxu1 %v11053_v14  ;;  %v11075_v58 = vld [vmem:[%s11362_s5 + $0x1418] ss:$12 sps:$4 sm:$0xff]  }
 0x2c6   : > { %6754 = vmatprep.subr.bf16.mxu0 %v11052_v12  ;;  %v9317_v45 = vpop.f32.mrb[108].mxu1  ;;  %v11079_v12 = vld [vmem:[%s11362_s5 + $0x14f0] ss:$12 sps:$4 sm:$0xff]  }
 0x2c7   : > { %v9318_v39 = vpop.f32.mrb[109].mxu1 }
 0x2c8   : > { %v9319_v33 = vadd.f32 %v9318_v39, %v9317_v45  ;;  %v9320_v59 = vpop.f32.mrb[110].mxu1  ;;  %9610 = vmatpush3.bf16.msra.mxu1 %v11054_v57  ;;  %v11080_v57 = vld [vmem:[%s11362_s5 + $0x1430] ss:$12 sps:$4 sm:$0xff]   ;;  %v11085_v39 = vld [vmem:[%s11362_s5 + $0x1508] ss:$12 sps:$4 sm:$0xff]  }
 0x2c9   : > { %6755 = vmatpush1.bf16.msra.mxu0 %v11050_v24  ;;  %v9321_v53 = vpop.f32.mrb[111].mxu1  ;;  %9611 = vmatprep.subr.bf16.mxu1 %v11061_v32  ;;  %v11076_v24 = vld [vmem:[%s11362_s5 + $0x1668] ss:$12 sps:$4 sm:$0xff]  }
 0x2ca   : > { %6756 = vmatprep.subr.bf16.mxu0 %v11060_v23  ;;  %v12897_v48 = vadd.f32 %v9319_v33, %v12806_v29  ;;  %v9322_v54 = vadd.f32 %v9321_v53, %v9320_v59  ;;  %v11084_v23 = vld [vmem:[%s11362_s5 + $0x15c8] ss:$12 sps:$4 sm:$0xff]   ;;  %v11086_v59 = vld [vmem:[%s11362_s5 + $0x15e0] ss:$12 sps:$4 sm:$0xff]  }
 0x2cb   : > { %7634 = vmatmul.mubr.bf16.gmra.mrb[216].mxu1 %v12593_v4 }
 0x2cc   : > { %v12901_v56 = vadd.f32 %v9322_v54, %v12818_v34  ;;  %9612 = vmatpush3.bf16.msra.mxu1 %v11062_v46  ;;  %7641 = vmatprep.mubr.bf16.mxu1 %v12603_v17  ;;  %v12936_v46 = vld [vmem:[%s13325_s0 + $0x164] ss:$120 sps:$4 sm:$0xff]  }
 0x2cd   : > { %6757 = vmatpush1.bf16.msra.mxu0 %v11058_v42  ;;  %9613 = vmatprep.subr.bf16.mxu1 %v11066_v63 }
 0x2ce   : > { %6758 = vmatprep.subr.bf16.mxu0 %v11065_v60  ;;  %v9339_v29 = vpop.f32.mrb[112].mxu1  ;;  %v11087_v60 = vld [vmem:[%s11362_s5 + $0x1520] ss:$12 sps:$4 sm:$0xff]  }
 0x2cf   : > { %v9340_v10 = vpop.f32.mrb[113].mxu1 }
 0x2d0   : > { %v9341_v4 = vadd.f32 %v9340_v10, %v9339_v29  ;;  %v9342_v34 = vpop.f32.mrb[114].mxu1  ;;  %9614 = vmatpush3.bf16.msra.mxu1 %v11067_v51  ;;  %v11092_v51 = vld [vmem:[%s11362_s5 + $0x1538] ss:$12 sps:$4 sm:$0xff]   ;;  %v11095_v10 = vld [vmem:[%s13325_s0 + $0x254] ss:$120 sps:$4 sm:$0xff]  }
 0x2d1   : > { %6759 = vmatpush1.bf16.msra.mxu0 %v11063_v20  ;;  %v9343_v26 = vpop.f32.mrb[115].mxu1  ;;  %9615 = vmatprep.subr.bf16.mxu1 %v11074_v6  ;;  %v11093_v6 = vld [vmem:[%s11362_s5 + $0x1610] ss:$12 sps:$4 sm:$0xff]  }
 0x2d2   : > { %6760 = vmatprep.subr.bf16.mxu0 %v11073_v36  ;;  %v12913_v14 = vadd.f32 %v9341_v4, %v12838_v7  ;;  %v9344_v22 = vadd.f32 %v9343_v26, %v9342_v34  ;;  %v11094_v34 = vld [vmem:[%s11362_s5 + $0x1550] ss:$12 sps:$4 sm:$0xff]  }
 0x2d3   : > { %7642 = vmatmul.mubr.bf16.gmra.mrb[220].mxu1 %v12625_v41  ;;  %v12926_v41 = vld [vmem:[%s13325_s0 + $0x70] ss:$120 sps:$4 sm:$0xff]  }
 0x2d4   : > { %v12917_v17 = vadd.f32 %v9344_v22, %v12850_v25  ;;  %9616 = vmatpush3.bf16.msra.mxu1 %v11075_v58  ;;  %7682 = vmatprep.mubr.bf16.mxu1 %v12635_v49  ;;  %v11100_v22 = vld [vmem:[%s11362_s5 + $0x1640] ss:$12 sps:$4 sm:$0xff]  }
 0x2d5   : > { %6761 = vmatpush1.bf16.msra.mxu0 %v11071_v38  ;;  %9617 = vmatprep.subr.bf16.mxu1 %v11079_v12 }
 0x2d6   : > { %6762 = vmatprep.subr.bf16.mxu0 %v11078_v1  ;;  %v9345_v32 = vpop.f32.mrb[116].mxu1  ;;  %v11099_v1 = vld [vmem:[%s11362_s5 + $0x1568] ss:$12 sps:$4 sm:$0xff]  }
 0x2d7   : > { %v9346_v7 = vpop.f32.mrb[117].mxu1 }
 0x2d8   : > { %v9347_v25 = vadd.f32 %v9346_v7, %v9345_v32  ;;  %v9348_v45 = vpop.f32.mrb[118].mxu1  ;;  %9618 = vmatpush3.bf16.msra.mxu1 %v11080_v57  ;;  %v11102_v57 = vld [vmem:[%s13325_s0 + $0x344] ss:$120 sps:$4 sm:$0xff]   ;;  %v11101_v32 = vld [vmem:[%s11362_s5 + $0x1580] ss:$12 sps:$4 sm:$0xff]  }
 0x2d9   : > { %6763 = vmatpush1.bf16.msra.mxu0 %v11076_v24  ;;  %v9349_v33 = vpop.f32.mrb[119].mxu1  ;;  %9683 = vmatprep.subr.bf16.mxu1 %v11084_v23 }
 0x2da   : > { %9643 = vmatprep.subr.bf16.mxu0 %v11084_v23  ;;  %v12931_v42 = vadd.f32 %v9347_v25, %v12865_v27  ;;  %v9350_v49 = vadd.f32 %v9349_v33, %v9348_v45  ;;  %v11091_v27 = vld [vmem:[%s11362_s5 + $0x15f8] ss:$12 sps:$4 sm:$0xff]  }
 0x2db   : > { %7683 = vmatmul.mubr.bf16.vlgmr.msra.gmra.mrb[224].mxu1 %v12735_v8  ;;  %v12950_v8 = vld [vmem:[%s13325_s0 + $0x160] ss:$120 sps:$4 sm:$0xff]  }
 0x2dc   : > { %6765 = vmatmul.mubr.bf16.vlgmr.msra.gmra.mrb[0].mxu0 %v12926_v41  ;;  %v12941_v53 = vadd.f32 %v9350_v49, %v12869_v3  ;;  %9691 = vmatpush3.bf16.msra.mxu1 %v11085_v39 }
 0x2dd   : > { %9644 = vmatpush3.bf16.msra.mxu0 %v11085_v39  ;;  %9684 = vmatprep.subr.bf16.mxu1 %v11086_v59  ;;  %v11106_v39 = vld [vmem:[%s11362_s5 + $0x1598] ss:$12 sps:$4 sm:$0xff]  }
 0x2de   : > { %9645 = vmatprep.subr.bf16.mxu0 %v11086_v59  ;;  %v9351_v63 = vpop.f32.mrb[120].mxu1  ;;  %6774 = vmatprep.mubr.bf16.mxu0 %v12936_v46  ;;  %v11107_v59 = vld [vmem:[%s11362_s5 + $0x1670] ss:$12 sps:$4 sm:$0xff]  }
 0x2df   : > { %7690 = vmatprep.mubr.bf16.mxu1 %v12747_v18  ;;  %v9352_v54 = vpop.f32.mrb[121].mxu1 }
 0x2e0   : > { %v9353_v3 = vadd.f32 %v9352_v54, %v9351_v63  ;;  %v9354_v20 = vpop.f32.mrb[122].mxu1  ;;  %9692 = vmatpush3.bf16.msra.mxu1 %v11087_v60 }
 0x2e1   : > { %9646 = vmatpush3.bf16.msra.mxu0 %v11087_v60  ;;  %v9355_v36 = vpop.f32.mrb[123].mxu1  ;;  %9685 = vmatprep.subr.bf16.mxu1 %v11091_v27 }
 0x2e2   : > { %9647 = vmatprep.subr.bf16.mxu0 %v11091_v27  ;;  %v12955_v29 = vadd.f32 %v9353_v3, %v12881_v28  ;;  %v9356_v18 = vadd.f32 %v9355_v36, %v9354_v20  ;;  %v11098_v28 = vld [vmem:[%s11362_s5 + $0x1628] ss:$12 sps:$4 sm:$0xff]   ;;  %v11108_v27 = vld [vmem:[%s11362_s5 + $0x15b0] ss:$12 sps:$4 sm:$0xff]  }
 0x2e3   : > { %7691 = vmatmul.mubr.bf16.gmra.mrb[228].mxu1 %v12767_v21  ;;  %v11097_v21 = vld [vmem:[%s13325_s0 + $0x250] ss:$120 sps:$4 sm:$0xff]  }
 0x2e4   : > { %6775 = vmatmul.mubr.bf16.gmra.mrb[4].mxu0 %v12950_v8  ;;  %v12963_v4 = vadd.f32 %v9356_v18, %v12885_v30  ;;  %9693 = vmatpush3.bf16.msra.mxu1 %v11092_v51 }
 0x2e5   : > { %9648 = vmatpush3.bf16.msra.mxu0 %v11092_v51  ;;  %9686 = vmatprep.subr.bf16.mxu1 %v11093_v6 }
 0x2e6   : > { %9649 = vmatprep.subr.bf16.mxu0 %v11093_v6  ;;  %v9357_v38 = vpop.f32.mrb[124].mxu1  ;;  %6784 = vmatprep.mubr.bf16.mxu0 %v11095_v10 }
 0x2e7   : > { %7698 = vmatprep.mubr.bf16.mxu1 %v12779_v43  ;;  %v9358_v58 = vpop.f32.mrb[125].mxu1 }
 0x2e8   : > { %v9359_v26 = vadd.f32 %v9358_v58, %v9357_v38  ;;  %v9360_v30 = vpop.f32.mrb[126].mxu1  ;;  %9694 = vmatpush3.bf16.msra.mxu1 %v11094_v34 }
 0x2e9   : > { %9650 = vmatpush3.bf16.msra.mxu0 %v11094_v34  ;;  %v9361_v12 = vpop.f32.mrb[127].mxu1  ;;  %9687 = vmatprep.subr.bf16.mxu1 %v11098_v28 }
 0x2ea   : > { %9651 = vmatprep.subr.bf16.mxu0 %v11098_v28  ;;  %v12974_v24 = vadd.f32 %v9359_v26, %v12897_v48  ;;  %v9362_v43 = vadd.f32 %v9361_v12, %v9360_v30  ;;  %v11105_v48 = vld [vmem:[%s11362_s5 + $0x1658] ss:$12 sps:$4 sm:$0xff]   ;;  %s9925_s5 = smul.u32 6, %s11353_s26  ;;  %s176_s26 = sand.u32 1, %s11266_s13  }
 0x2eb   : > { %7699 = vmatmul.mubr.bf16.gmra.mrb[232].mxu1 %v12799_v9  ;;  %v11104_v9 = vld [vmem:[%s13325_s0 + $0x340] ss:$120 sps:$4 sm:$0xff]   ;;  %s13218_s7 = smul.u32 192, %s176_s26  ;;  %s13284_s16 = scalar_lea.sflag [#allocation3], %s176_s26 }
 0x2ec   : > { %6785 = vmatmul.mubr.bf16.gmra.mrb[8].mxu0 %v11097_v21  ;;  %v12981_v23 = vadd.f32 %v9362_v43, %v12901_v56  ;;  %9695 = vmatpush3.bf16.msra.mxu1 %v11099_v1  ;;  %s13196_s6 = scalar_lea.vmem %s13327_s2, %s9925_s5 }
 0x2ed   : > { %9652 = vmatpush3.bf16.msra.mxu0 %v11099_v1  ;;  %9688 = vmatprep.subr.bf16.mxu1 %v11100_v22  ;;  %s13238_s9 = scalar_lea.vmem [#allocation2], %s13218_s7 }
 0x2ee   : > { %9653 = vmatprep.subr.bf16.mxu0 %v11100_v22  ;;  %v9379_v7 = vpop.f32.mrb[128].mxu1  ;;  %6794 = vmatprep.mubr.bf16.mxu0 %v11102_v57  ;;  %s8159_s10 = sshll.u32 %s13238_s9, 4  ;;  %s13264_s10 = int_to_ptr.vmem [resolvable:$true] %s8159_s10 }
 0x2ef   : > { %7706 = vmatprep.mubr.bf16.mxu1 %v12811_v44  ;;  %v9380_v25 = vpop.f32.mrb[129].mxu1  ;;  %s11212_s20 = scalar_lea.vmem %s13264_s10, 3072  ;;  %p11219_p0 = scmp.lt.s32.totalorder %s13264_s10, %s11217_s25 }
 0x2f0   : > { %v9381_v45 = vadd.f32 %v9380_v25, %v9379_v7  ;;  %v9382_v56 = vpop.f32.mrb[130].mxu1  ;;  %9696 = vmatpush3.bf16.msra.mxu1 %v11101_v32  ;;  %p11213_p11 = scmp.ne.s32.totalorder %s13264_s10, %s11212_s20  ;;  %p11220_p1 = scmp.lt.s32.totalorder %s11218_s27, %s11212_s20 }
 0x2f1   : > { %9654 = vmatpush3.bf16.msra.mxu0 %v11101_v32  ;;  %v9383_v33 = vpop.f32.mrb[131].mxu1  ;;  %9689 = vmatprep.subr.bf16.mxu1 %v11105_v48 }
 0x2f2   : > { %9655 = vmatprep.subr.bf16.mxu0 %v11105_v48  ;;  %v7295_v49 = vadd.f32 %v9381_v45, %v12913_v14  ;;  %v9384_v60 = vadd.f32 %v9383_v33, %v9382_v56  ;;  %p11214_p12 = pnand %p11213_p11, %p11338_p5  ;;  %p11221_p2 = por %p11220_p1, %p11219_p0 }
 0x2f3   : > { %7707 = vmatmul.mubr.bf16.gmra.mrb[236].mxu1 %v12831_v62 }
 0x2f4   : > { %6795 = vmatmul.mubr.bf16.gmra.mrb[12].mxu0 %v11104_v9  ;;  %v7298_v44 = vadd.f32 %v9384_v60, %v12917_v17  ;;  %9697 = vmatpush3.bf16.msra.mxu1 %v11106_v39  ;;  %p11215_p13 = pneg %p11214_p12 }
 0x2f5   : > { %9656 = vmatpush3.bf16.msra.mxu0 %v11106_v39  ;;  %9690 = vmatprep.subr.bf16.mxu1 %v11107_v59 }
 0x2f6   : > { %9657 = vmatprep.subr.bf16.mxu0 %v11107_v59  ;;  %v9385_v63 = vpop.f32.mrb[132].mxu1  ;;  %7747 = vmatprep.mubr.bf16.mxu0 %v12843_v15  ;;  %p11222_p3 = pnand %p11221_p2, %p11215_p13 }
 0x2f7   : > { %7763 = vmatprep.mubr.bf16.mxu1 %v11095_v10  ;;  %v9386_v54 = vpop.f32.mrb[133].mxu1 }
 0x2f8   : > { %v9387_v3 = vadd.f32 %v9386_v54, %v9385_v63  ;;  %v9388_v20 = vpop.f32.mrb[134].mxu1  ;;  %9698 = vmatpush3.bf16.msra.mxu1 %v11108_v27 }
 0x2f9   : > { %9658 = vmatpush3.bf16.msra.mxu0 %v11108_v27  ;;  %v9389_v14 = vpop.f32.mrb[135].mxu1 }
 0x2fa   : > { %v7303_v51 = vadd.f32 %v9387_v3, %v12931_v42  ;;  %v9390_v62 = vadd.f32 %v9389_v14, %v9388_v20 }
 0x2fb   : > { %7764 = vmatmul.mubr.bf16.vlgmr.msra.gmra.mrb[240].mxu1 %v11097_v21 }
 0x2fc   : > { %7748 = vmatmul.mubr.bf16.vlgmr.msra.gmra.mrb[16].mxu0 %v12926_v41  ;;  %v7306_v17 = vadd.f32 %v9390_v62, %v12941_v53  ;;  %7771 = vmatprep.mubr.bf16.mxu1 %v11102_v57 }
 0x2fd   : > { %7755 = vmatprep.mubr.bf16.mxu0 %v12936_v46 }
 0x2fe   : > { %v9391_v36 = vpop.f32.mrb[136].mxu1 }
 0x2ff   : > { %v9392_v15 = vpop.f32.mrb[137].mxu1 }
 0x300   : > { %v9393_v6 = vadd.f32 %v9392_v15, %v9391_v36  ;;  %v9394_v18 = vpop.f32.mrb[138].mxu1 }
 0x301   : > { %v9395_v10 = vpop.f32.mrb[139].mxu1 }
 0x302   : > { %v7311_v34 = vadd.f32 %v9393_v6, %v12955_v29  ;;  %v9396_v28 = vadd.f32 %v9395_v10, %v9394_v18 }
 0x303   : > { %7772 = vmatmul.mubr.bf16.gmra.mrb[244].mxu1 %v11104_v9 }
 0x304   : > { %7756 = vmatmul.mubr.bf16.gmra.mrb[20].mxu0 %v12950_v8  ;;  %v7314_v42 = vadd.f32 %v9396_v28, %v12963_v4 }
 0x306   : > { %v9397_v41 = vpop.f32.mrb[140].mxu1 }
 0x307   : > { %v9398_v38 = vpop.f32.mrb[141].mxu1 }
 0x308   : > { %v9399_v58 = vadd.f32 %v9398_v38, %v9397_v41  ;;  %v9400_v53 = vpop.f32.mrb[142].mxu1 }
 0x309   : > { %v9401_v21 = vpop.f32.mrb[143].mxu1 }
 0x30a   : > { %v7319_v46 = vadd.f32 %v9399_v58, %v12974_v24  ;;  %v9402_v26 = vadd.f32 %v9401_v21, %v9400_v53 }
 0x30c   : > { %v7322_v30 = vadd.f32 %v9402_v26, %v12981_v23 }
 0x30e   : > { %v9419_v1 = vpop.f32.mrb[144].mxu1 }
 0x30f   : > { %v9420_v12 = vpop.f32.mrb[145].mxu1 }
 0x310   : > { %v9421_v22 = vadd.f32 %v9420_v12, %v9419_v1  ;;  %v9422_v29 = vpop.f32.mrb[146].mxu1 }
 0x311   : > { %v9423_v43 = vpop.f32.mrb[147].mxu1 }
 0x312   : > { %v7360_v57 = vadd.f32 %v9421_v22, %v7295_v49  ;;  %v9424_v8 = vadd.f32 %v9423_v43, %v9422_v29 }
 0x314   : > { %v7363_v32 = vadd.f32 %v9424_v8, %v7298_v44 }
 0x316   : > { %v9425_v48 = vpop.f32.mrb[148].mxu1 }
 0x317   : > { %v9426_v4 = vpop.f32.mrb[149].mxu1 }
 0x318   : > { %v9427_v7 = vadd.f32 %v9426_v4, %v9425_v48  ;;  %v9428_v25 = vpop.f32.mrb[150].mxu1 }
 0x319   : > { %v9429_v9 = vpop.f32.mrb[151].mxu1 }
 0x31a   : > { %v7368_v45 = vadd.f32 %v9427_v7, %v7303_v51  ;;  %v9430_v56 = vadd.f32 %v9429_v9, %v9428_v25 }
 0x31c   : > { %v7371_v39 = vadd.f32 %v9430_v56, %v7306_v17 }
 0x31e   : > { %v9431_v24 = vpop.f32.mrb[152].mxu1 }
 0x31f   : > { %v9432_v33 = vpop.f32.mrb[153].mxu1 }
 0x320   : > { %v9433_v59 = vadd.f32 %v9432_v33, %v9431_v24  ;;  %v9434_v23 = vpop.f32.mrb[154].mxu1 }
 0x321   : > { %v9435_v60 = vpop.f32.mrb[155].mxu1 }
 0x322   : > { %v7376_v27 = vadd.f32 %v9433_v59, %v7311_v34  ;;  %v9436_v63 = vadd.f32 %v9435_v60, %v9434_v23 }
 0x324   : > { %v7379_v54 = vadd.f32 %v9436_v63, %v7314_v42 }
 0x326   : > { %v9437_v3 = vpop.f32.mrb[156].mxu1 }
 0x327   : > { %v9438_v49 = vpop.f32.mrb[157].mxu1 }
 0x328   : > { %v9439_v20 = vadd.f32 %v9438_v49, %v9437_v3  ;;  %v9440_v44 = vpop.f32.mrb[158].mxu1 }
 0x329   : > { %v9441_v14 = vpop.f32.mrb[159].mxu1 }
 0x32a   : > { %v7384_v62 = vadd.f32 %v9439_v20, %v7319_v46  ;;  %v9442_v36 = vadd.f32 %v9441_v14, %v9440_v44 }
 0x32c   : > { %v7387_v15 = vadd.f32 %v9442_v36, %v7322_v30 }
 0x32e   : > { %v9459_v6 = vpop.f32.mrb[160].mxu1 }
 0x32f   : > { %v9460_v51 = vpop.f32.mrb[161].mxu1 }
 0x330   : > { %v9461_v18 = vadd.f32 %v9460_v51, %v9459_v6  ;;  %v9462_v17 = vpop.f32.mrb[162].mxu1 }
 0x331   : > { %v9463_v10 = vpop.f32.mrb[163].mxu1 }
 0x332   : > { %v7425_v28 = vadd.f32 %v9461_v18, %v7360_v57  ;;  %v9464_v41 = vadd.f32 %v9463_v10, %v9462_v17 }
 0x334   : > { %v7428_v38 = vadd.f32 %v9464_v41, %v7363_v32 }
 0x336   : > { %v9465_v58 = vpop.f32.mrb[164].mxu1 }
 0x337   : > { %v9466_v34 = vpop.f32.mrb[165].mxu1 }
 0x338   : > { %v9467_v53 = vadd.f32 %v9466_v34, %v9465_v58  ;;  %v9468_v42 = vpop.f32.mrb[166].mxu1 }
 0x339   : > { %v9469_v21 = vpop.f32.mrb[167].mxu1 }
 0x33a   : > { %v7433_v26 = vadd.f32 %v9467_v53, %v7368_v45  ;;  %v9470_v1 = vadd.f32 %v9469_v21, %v9468_v42 }
 0x33c   : > { %v7436_v12 = vadd.f32 %v9470_v1, %v7371_v39 }
 0x33e   : > { %v9471_v22 = vpop.f32.mrb[168].mxu1 }
 0x33f   : > { %v9472_v46 = vpop.f32.mrb[169].mxu1 }
 0x340   : > { %v9473_v29 = vadd.f32 %v9472_v46, %v9471_v22  ;;  %v9474_v30 = vpop.f32.mrb[170].mxu1 }
 0x341   : > { %v9475_v43 = vpop.f32.mrb[171].mxu1 }
 0x342   : > { %v7441_v8 = vadd.f32 %v9473_v29, %v7376_v27  ;;  %v9476_v48 = vadd.f32 %v9475_v43, %v9474_v30 }
 0x344   : > { %v7444_v4 = vadd.f32 %v9476_v48, %v7379_v54 }
 0x346   : > { %v9477_v7 = vpop.f32.mrb[172].mxu1 }
 0x347   : > { %v9478_v57 = vpop.f32.mrb[173].mxu1 }
 0x348   : > { %v9479_v25 = vadd.f32 %v9478_v57, %v9477_v7  ;;  %v9480_v32 = vpop.f32.mrb[174].mxu1 }
 0x349   : > { %v9481_v9 = vpop.f32.mrb[175].mxu1 }
 0x34a   : > { %v7449_v56 = vadd.f32 %v9479_v25, %v7384_v62  ;;  %v9482_v24 = vadd.f32 %v9481_v9, %v9480_v32 }
 0x34c   : > { %v7452_v33 = vadd.f32 %v9482_v24, %v7387_v15 }
 0x34e   : > { %v9499_v59 = vpop.f32.mrb[176].mxu1 }
 0x34f   : > { %v9500_v45 = vpop.f32.mrb[177].mxu1 }
 0x350   : > { %v9501_v23 = vadd.f32 %v9500_v45, %v9499_v59  ;;  %v9502_v39 = vpop.f32.mrb[178].mxu1 }
 0x351   : > { %v9503_v60 = vpop.f32.mrb[179].mxu1 }
 0x352   : > { %v7490_v63 = vadd.f32 %v9501_v23, %v7425_v28  ;;  %v9504_v3 = vadd.f32 %v9503_v60, %v9502_v39 }
 0x354   : > { %v7493_v49 = vadd.f32 %v9504_v3, %v7428_v38 }
 0x356   : > { %v9505_v20 = vpop.f32.mrb[180].mxu1 }
 0x357   : > { %v9506_v27 = vpop.f32.mrb[181].mxu1 }
 0x358   : > { %v9507_v44 = vadd.f32 %v9506_v27, %v9505_v20  ;;  %v9508_v54 = vpop.f32.mrb[182].mxu1 }
 0x359   : > { %v9509_v14 = vpop.f32.mrb[183].mxu1 }
 0x35a   : > { %v7498_v36 = vadd.f32 %v9507_v44, %v7433_v26  ;;  %v9510_v6 = vadd.f32 %v9509_v14, %v9508_v54 }
 0x35c   : > { %v7501_v51 = vadd.f32 %v9510_v6, %v7436_v12 }
 0x35e   : > { %v9511_v18 = vpop.f32.mrb[184].mxu1 }
 0x35f   : > { %v9512_v62 = vpop.f32.mrb[185].mxu1 }
 0x360   : > { %v9513_v17 = vadd.f32 %v9512_v62, %v9511_v18  ;;  %v9514_v15 = vpop.f32.mrb[186].mxu1 }
 0x361   : > { %v9515_v10 = vpop.f32.mrb[187].mxu1 }
 0x362   : > { %v7506_v41 = vadd.f32 %v9513_v17, %v7441_v8  ;;  %v9516_v58 = vadd.f32 %v9515_v10, %v9514_v15 }
 0x364   : > { %v7509_v34 = vadd.f32 %v9516_v58, %v7444_v4 }
 0x366   : > { %v9517_v53 = vpop.f32.mrb[188].mxu1 }
 0x367   : > { %v9518_v28 = vpop.f32.mrb[189].mxu1 }
 0x368   : > { %v9519_v42 = vadd.f32 %v9518_v28, %v9517_v53  ;;  %v9520_v38 = vpop.f32.mrb[190].mxu1 }
 0x369   : > { %v9521_v21 = vpop.f32.mrb[191].mxu1 }
 0x36a   : > { %v7514_v1 = vadd.f32 %v9519_v42, %v7449_v56  ;;  %v9522_v22 = vadd.f32 %v9521_v21, %v9520_v38 }
 0x36c   : > { %v7517_v46 = vadd.f32 %v9522_v22, %v7452_v33 }
 0x36e   : > { %v9539_v29 = vpop.f32.mrb[192].mxu1 }
 0x36f   : > { %v9540_v26 = vpop.f32.mrb[193].mxu1 }
 0x370   : > { %v9541_v30 = vadd.f32 %v9540_v26, %v9539_v29  ;;  %v9542_v12 = vpop.f32.mrb[194].mxu1 }
 0x371   : > { %v9543_v43 = vpop.f32.mrb[195].mxu1 }
 0x372   : > { %v7555_v48 = vadd.f32 %v9541_v30, %v7490_v63  ;;  %v9544_v7 = vadd.f32 %v9543_v43, %v9542_v12 }
 0x374   : > { %v7558_v57 = vadd.f32 %v9544_v7, %v7493_v49 }
 0x376   : > { %v9545_v25 = vpop.f32.mrb[196].mxu1 }
 0x377   : > { %v9546_v8 = vpop.f32.mrb[197].mxu1 }
 0x378   : > { %v9547_v32 = vadd.f32 %v9546_v8, %v9545_v25  ;;  %v9548_v4 = vpop.f32.mrb[198].mxu1 }
 0x379   : > { %v9549_v9 = vpop.f32.mrb[199].mxu1 }
 0x37a   : > { %v7563_v24 = vadd.f32 %v9547_v32, %v7498_v36  ;;  %v9550_v59 = vadd.f32 %v9549_v9, %v9548_v4 }
 0x37c   : > { %v7566_v45 = vadd.f32 %v9550_v59, %v7501_v51 }
 0x37e   : > { %v9551_v23 = vpop.f32.mrb[200].mxu1 }
 0x37f   : > { %v9552_v56 = vpop.f32.mrb[201].mxu1 }
 0x380   : > { %v9553_v39 = vadd.f32 %v9552_v56, %v9551_v23  ;;  %v9554_v33 = vpop.f32.mrb[202].mxu1 }
 0x381   : > { %v9555_v60 = vpop.f32.mrb[203].mxu1 }
 0x382   : > { %v7571_v3 = vadd.f32 %v9553_v39, %v7506_v41  ;;  %v9556_v20 = vadd.f32 %v9555_v60, %v9554_v33 }
 0x384   : > { %v7574_v27 = vadd.f32 %v9556_v20, %v7509_v34 }
 0x386   : > { %v9557_v44 = vpop.f32.mrb[204].mxu1 }
 0x387   : > { %v9558_v63 = vpop.f32.mrb[205].mxu1 }
 0x388   : > { %v9559_v54 = vadd.f32 %v9558_v63, %v9557_v44  ;;  %v9560_v49 = vpop.f32.mrb[206].mxu1 }
 0x389   : > { %v9561_v14 = vpop.f32.mrb[207].mxu1 }
 0x38a   : > { %v7579_v6 = vadd.f32 %v9559_v54, %v7514_v1  ;;  %v9562_v18 = vadd.f32 %v9561_v14, %v9560_v49 }
 0x38c   : > { %v7582_v62 = vadd.f32 %v9562_v18, %v7517_v46 }
 0x38e   : > { %v9579_v17 = vpop.f32.mrb[208].mxu1 }
 0x38f   : > { %v9580_v36 = vpop.f32.mrb[209].mxu1 }
 0x390   : > { %v9581_v15 = vadd.f32 %v9580_v36, %v9579_v17  ;;  %v9582_v51 = vpop.f32.mrb[210].mxu1 }
 0x391   : > { %v9583_v10 = vpop.f32.mrb[211].mxu1 }
 0x392   : > { %v7620_v58 = vadd.f32 %v9581_v15, %v7555_v48  ;;  %v9584_v53 = vadd.f32 %v9583_v10, %v9582_v51 }
 0x394   : > { %v7623_v28 = vadd.f32 %v9584_v53, %v7558_v57 }
 0x396   : > { %v9585_v42 = vpop.f32.mrb[212].mxu1 }
 0x397   : > { %v9586_v41 = vpop.f32.mrb[213].mxu1 }
 0x398   : > { %v9587_v38 = vadd.f32 %v9586_v41, %v9585_v42  ;;  %v9588_v34 = vpop.f32.mrb[214].mxu1 }
 0x399   : > { %v9589_v21 = vpop.f32.mrb[215].mxu1 }
 0x39a   : > { %v7628_v22 = vadd.f32 %v9587_v38, %v7563_v24  ;;  %v9590_v29 = vadd.f32 %v9589_v21, %v9588_v34 }
 0x39c   : > { %v7631_v26 = vadd.f32 %v9590_v29, %v7566_v45 }
 0x39e   : > { %v9591_v30 = vpop.f32.mrb[216].mxu1 }
 0x39f   : > { %v9592_v1 = vpop.f32.mrb[217].mxu1 }
 0x3a0   : > { %v9593_v12 = vadd.f32 %v9592_v1, %v9591_v30  ;;  %v9594_v46 = vpop.f32.mrb[218].mxu1 }
 0x3a1   : > { %v9595_v43 = vpop.f32.mrb[219].mxu1 }
 0x3a2   : > { %v7636_v7 = vadd.f32 %v9593_v12, %v7571_v3  ;;  %v9596_v25 = vadd.f32 %v9595_v43, %v9594_v46 }
 0x3a4   : > { %v13005_v8 = vadd.f32 %v9596_v25, %v7574_v27 }
 0x3a6   : > { %v9597_v48 = vpop.f32.mrb[220].mxu1 }
 0x3a7   : > { %v9598_v32 = vpop.f32.mrb[221].mxu1 }
 0x3a8   : > { %v9599_v57 = vadd.f32 %v9598_v32, %v9597_v48  ;;  %v9600_v4 = vpop.f32.mrb[222].mxu1 }
 0x3a9   : > { %v9601_v9 = vpop.f32.mrb[223].mxu1 }
 0x3aa   : > { %v13007_v59 = vadd.f32 %v9599_v57, %v7579_v6  ;;  %v9602_v23 = vadd.f32 %v9601_v9, %v9600_v4 }
 0x3ac   : > { %v13009_v24 = vadd.f32 %v9602_v23, %v7582_v62 }
 0x3ae   : > { %v9619_v56 = vpop.f32.mrb[224].mxu1 }
 0x3af   : > { %v6766_v45 = vpop.f32.mrb[0].mxu0  ;;  %v9620_v60 = vpop.f32.mrb[225].mxu1 }
 0x3b0   : > { %v13012_v39 = vadd.f32 %v6766_v45, %v12231_v31  ;;  %v6768_v33 = vpop.f32.mrb[1].mxu0  ;;  %v9621_v20 = vadd.f32 %v9620_v60, %v9619_v56  ;;  %v9622_v44 = vpop.f32.mrb[226].mxu1 }
 0x3b1   : > { %v13015_v3 = vadd.f32 %v6768_v33, %v12238_v35  ;;  %v6770_v27 = vpop.f32.mrb[2].mxu0  ;;  %v9623_v49 = vpop.f32.mrb[227].mxu1 }
 0x3b2   : > { %v13018_v63 = vadd.f32 %v6770_v27, %v12243_v37  ;;  %v6772_v54 = vpop.f32.mrb[3].mxu0  ;;  %v13020_v14 = vadd.f32 %v9621_v20, %v7620_v58  ;;  %v9624_v31 = vadd.f32 %v9623_v49, %v9622_v44 }
 0x3b3   : > { %v13023_v6 = vadd.f32 %v6772_v54, %v12247_v40 }
 0x3b4   : > { %v13025_v18 = vadd.f32 %v9624_v31, %v7623_v28  ;;  %v7780_v38 = vadd.f32 %v13018_v63, %v13012_v39 }
 0x3b6   : > { %v9625_v17 = vpop.f32.mrb[228].mxu1 }
 0x3b7   : > { %v6776_v62 = vpop.f32.mrb[4].mxu0  ;;  %v9626_v15 = vpop.f32.mrb[229].mxu1 }
 0x3b8   : > { %v13028_v35 = vadd.f32 %v6776_v62, %v12259_v47  ;;  %v6778_v36 = vpop.f32.mrb[5].mxu0  ;;  %v9627_v51 = vadd.f32 %v9626_v15, %v9625_v17  ;;  %v9628_v58 = vpop.f32.mrb[230].mxu1 }
 0x3b9   : > { %v13031_v37 = vadd.f32 %v6778_v36, %v12265_v50  ;;  %v6780_v10 = vpop.f32.mrb[6].mxu0  ;;  %v9629_v42 = vpop.f32.mrb[231].mxu1  ;;  %v7793_v50 = vadd.f32 %v13023_v6, %v13015_v3 }
 0x3ba   : > { %v13034_v53 = vadd.f32 %v6780_v10, %v12268_v52  ;;  %v6782_v40 = vpop.f32.mrb[7].mxu0  ;;  %v13036_v28 = vadd.f32 %v9627_v51, %v7628_v22  ;;  %v9630_v47 = vadd.f32 %v9629_v42, %v9628_v58  ;;  %v7781_v21 = vadd.f32 %v13028_v35, %v7780_v38 }
 0x3bb   : > { %v13039_v41 = vadd.f32 %v6782_v40, %v12272_v55  ;;  %v7794_v52 = vadd.f32 %v13031_v37, %v7793_v50 }
 0x3bc   : > { %v13045_v34 = vadd.f32 %v9630_v47, %v7631_v26  ;;  %v7782_v26 = vadd.f32 %v13034_v53, %v7781_v21 }
 0x3bd   : > { %v7795_v4 = vadd.f32 %v13039_v41, %v7794_v52 }
 0x3be   : > { %v9631_v30 = vpop.f32.mrb[232].mxu1 }
 0x3bf   : > { %v6786_v29 = vpop.f32.mrb[8].mxu0  ;;  %v9632_v1 = vpop.f32.mrb[233].mxu1 }
 0x3c0   : > { %v13050_v22 = vadd.f32 %v6786_v29, %v12281_v61  ;;  %v6788_v55 = vpop.f32.mrb[9].mxu0  ;;  %v9633_v46 = vadd.f32 %v9632_v1, %v9631_v30  ;;  %v9634_v25 = vpop.f32.mrb[234].mxu1 }
 0x3c1   : > { %v13053_v12 = vadd.f32 %v6788_v55, %v12287_v0  ;;  %v6790_v43 = vpop.f32.mrb[10].mxu0  ;;  %v9635_v57 = vpop.f32.mrb[235].mxu1 }
 0x3c2   : > { %v13057_v48 = vadd.f32 %v6790_v43, %v12290_v2  ;;  %v6792_v32 = vpop.f32.mrb[11].mxu0  ;;  %v7701_v9 = vadd.f32 %v9633_v46, %v7636_v7  ;;  %v9636_v23 = vadd.f32 %v9635_v57, %v9634_v25  ;;  %v7783_v0 = vadd.f32 %v13050_v22, %v7782_v26 }
 0x3c3   : > { %v13061_v61 = vadd.f32 %v6792_v32, %v12294_v5  ;;  %v7796_v45 = vadd.f32 %v13053_v12, %v7795_v4 }
 0x3c4   : > { %v7704_v56 = vadd.f32 %v9636_v23, %v13005_v8  ;;  %v7784_v2 = vadd.f32 %v13057_v48, %v7783_v0 }
 0x3c5   : > { %v7797_v7 = vadd.f32 %v13061_v61, %v7796_v45 }
 0x3c6   : > { %v9637_v60 = vpop.f32.mrb[236].mxu1 }
 0x3c7   : > { %v6796_v33 = vpop.f32.mrb[12].mxu0  ;;  %v9638_v44 = vpop.f32.mrb[237].mxu1 }
 0x3c8   : > { %v13068_v20 = vadd.f32 %v6796_v33, %v12303_v11  ;;  %v6798_v27 = vpop.f32.mrb[13].mxu0  ;;  %v9639_v54 = vadd.f32 %v9638_v44, %v9637_v60  ;;  %v9640_v31 = vpop.f32.mrb[238].mxu1 }
 0x3c9   : > { %v13072_v5 = vadd.f32 %v6798_v27, %v12308_v13  ;;  %v6800_v49 = vpop.f32.mrb[14].mxu0  ;;  %v9641_v36 = vpop.f32.mrb[239].mxu1 }
 0x3ca   : > { %v13075_v62 = vadd.f32 %v6800_v49, %v12312_v16  ;;  %v7785_v8 = vadd.f32 %v13068_v20, %v7784_v2  ;;  %v6802_v17 = vpop.f32.mrb[15].mxu0  ;;  %v7709_v11 = vadd.f32 %v9639_v54, %v13007_v59  ;;  %v9642_v10 = vadd.f32 %v9641_v36, %v9640_v31 }
 0x3cb   : > { %v13080_v15 = vadd.f32 %v6802_v17, %v12316_v19  ;;  %v7798_v51 = vadd.f32 %v13072_v5, %v7797_v7 }
 0x3cc   : > { %v7786_v13 = vadd.f32 %v13075_v62, %v7785_v8  ;;  %v13086_v40 = vadd.f32 %v9642_v10, %v13009_v24 }
 0x3cd   : > { %v7799_v58 = vadd.f32 %v13080_v15, %v7798_v51 }
 0x3ce   : > { %v7787_v16 = vrot.slane %v7786_v13, 4  ;;  %v9671_v38 = vpop.f32.mrb[240].mxu1 }
 0x3cf   : > { %v7800_v42 = vrot.slane %v7799_v58, 4  ;;  %v9659_v47 = vpop.f32.mrb[16].mxu0  ;;  %v9672_v59 = vpop.f32.mrb[241].mxu1 }
 0x3d0   : > { %v7788_v50 = vadd.f32 %v7787_v16, %v7786_v13  ;;  %v9660_v21 = vpop.f32.mrb[17].mxu0  ;;  %v9673_v29 = vadd.f32 %v9672_v59, %v9671_v38  ;;  %v9674_v55 = vpop.f32.mrb[242].mxu1 }
 0x3d1   : > { %v7801_v52 = vadd.f32 %v7800_v42, %v7799_v58  ;;  %v9661_v19 = vadd.f32 %v9660_v21, %v9659_v47  ;;  %v9662_v30 = vpop.f32.mrb[18].mxu0  ;;  %v9675_v43 = vpop.f32.mrb[243].mxu1 }
 0x3d2   : > { %v7789_v1 = vrot.slane %v7788_v50, 2  ;;  %v9663_v46 = vpop.f32.mrb[19].mxu0  ;;  %v13091_v24 = vadd.f32 %v9673_v29, %v7701_v9  ;;  %v9676_v4 = vadd.f32 %v9675_v43, %v9674_v55 }
 0x3d3   : > { %v7802_v25 = vrot.slane %v7801_v52, 2  ;;  %v13089_v26 = vadd.f32 %v9661_v19, %v13020_v14  ;;  %v9664_v32 = vadd.f32 %v9663_v46, %v9662_v30  ;;  %v7831_v19 = vlaneseq }
 0x3d4   : > { %v7790_v57 = vadd.f32 %v7789_v1, %v7788_v50  ;;  %v13096_v33 = vadd.f32 %v9676_v4, %v7704_v56 }
 0x3d5   : > { %v7803_v23 = vadd.f32 %v7802_v25, %v7801_v52  ;;  %v13094_v0 = vadd.f32 %v9664_v32, %v13025_v18  ;;  %v7807_v52 = vsel %vm7806_vm0, %v13089_v26, 0.0 }
 0x3d6   : > { %v7791_v45 = vrot.slane %v7790_v57, 1  ;;  %v9677_v27 = vpop.f32.mrb[244].mxu1 }
 0x3d7   : > { %v7804_v60 = vrot.slane %v7803_v23, 1  ;;  %v9665_v2 = vpop.f32.mrb[20].mxu0  ;;  %v9678_v54 = vpop.f32.mrb[245].mxu1 }
 0x3d8   : > { %v7792_v44 = vadd.f32 %v7791_v45, %v7790_v57  ;;  %v9666_v7 = vpop.f32.mrb[21].mxu0  ;;  %v9679_v9 = vadd.f32 %v9678_v54, %v9677_v27  ;;  %v9680_v8 = vpop.f32.mrb[246].mxu1 }
 0x3d9   : > { %v7805_v14 = vadd.f32 %v7804_v60, %v7803_v23  ;;  %v9667_v49 = vadd.f32 %v9666_v7, %v9665_v2  ;;  %v9668_v31 = vpop.f32.mrb[22].mxu0  ;;  %v9681_v51 = vpop.f32.mrb[247].mxu1  ;;  %v13132_v60 = vshrl.u32 %v7831_v19, 7 }
 0x3da   : > { %v13098_v17 = vmul.f32 0.020408163, %v7792_v44  ;;  %v9669_v36 = vpop.f32.mrb[23].mxu0  ;;  %v13105_v10 = vadd.f32 %v9679_v9, %v7709_v11  ;;  %v9682_v45 = vadd.f32 %v9681_v51, %v9680_v8 }
 0x3db   : > { %v13100_v18 = vmul.f32 0.020408163, %v7805_v14  ;;  %v13103_v56 = vadd.f32 %v9667_v49, %v13036_v28  ;;  %v9670_v13 = vadd.f32 %v9669_v36, %v9668_v31  ;;  %v7808_v28 = vsel %vm7806_vm0, %v13094_v0, 0.0 }
 0x3dc   : > { %v7848_v58 = vsub.f32 %v13012_v39, %v13098_v17  ;;  %v7851_v16 = vsub.f32 %v13018_v63, %v13098_v17  ;;  %v7854_v11 = vsub.f32 %v13028_v35, %v13098_v17  ;;  %v7809_v55 = vadd.f32 %v7808_v28, %v7807_v52 }
 0x3dd   : > { %v7849_v42 = vsub.f32 %v13015_v3, %v13100_v18  ;;  %v7852_v50 = vsub.f32 %v13023_v6, %v13100_v18  ;;  %v7855_v21 = vsub.f32 %v13031_v37, %v13100_v18  ;;  %v7810_v1 = vsel %vm7806_vm0, %v13103_v56, 0.0 }
 0x3de   : > { %v7912_v47 = vmul.f32 %v7848_v58, %v7848_v58  ;;  %v7915_v38 = vmul.f32 %v7851_v16, %v7851_v16  ;;  %v7857_v46 = vsub.f32 %v13034_v53, %v13098_v17  ;;  %v7918_v43 = vmul.f32 %v7854_v11, %v7854_v11 }
 0x3df   : > { %v7913_v59 = vmul.f32 %v7849_v42, %v7849_v42  ;;  %v7916_v30 = vmul.f32 %v7852_v50, %v7852_v50  ;;  %v7811_v32 = vadd.f32 %v7810_v1, %v7809_v55  ;;  %v7858_v57 = vsub.f32 %v13039_v41, %v13100_v18 }
 0x3e0   : > { %v7936_v29 = vadd.f32 %v7915_v38, %v7912_v47  ;;  %v7919_v4 = vmul.f32 %v7855_v21, %v7855_v21  ;;  %v13130_v23 = vadd.f32 %v9670_v13, %v13045_v34  ;;  %v13137_v7 = vadd.f32 %v9682_v45, %v13086_v40 }
 0x3e1   : > { %v7949_v25 = vadd.f32 %v7916_v30, %v7913_v59  ;;  %v7860_v54 = vsub.f32 %v13050_v22, %v13098_v17  ;;  %v7921_v14 = vmul.f32 %v7857_v46, %v7857_v46  ;;  %v7861_v34 = vsub.f32 %v13053_v12, %v13100_v18 }
 0x3e2   : > { %v7937_v2 = vadd.f32 %v7936_v29, %v7918_v43  ;;  %v7812_v44 = vsel %vm7806_vm0, %v13130_v23, 0.0  ;;  %v7922_v9 = vmul.f32 %v7858_v57, %v7858_v57  ;;  %v7814_v31 = vsel %vm7806_vm0, %v13091_v24, 0.0 }
 0x3e3   : > { %v7950_v27 = vadd.f32 %v7949_v25, %v7919_v4  ;;  %v7813_v49 = vadd.f32 %v7812_v44, %v7811_v32  ;;  %v13146_v8 = vadd.s32 48, %v13132_v60  ;;  %v7816_v40 = vsel %vm7806_vm0, %v13096_v33, 0.0 }
 0x3e4   : > { %v7938_v36 = vadd.f32 %v7937_v2, %v7921_v14  ;;  %v7863_v58 = vsub.f32 %v13057_v48, %v13098_v17  ;;  %v7924_v16 = vmul.f32 %v7860_v54, %v7860_v54  ;;  %v7866_v47 = vsub.f32 %v13068_v20, %v13098_v17 }
 0x3e5   : > { %v7815_v51 = vadd.f32 %v7814_v31, %v7813_v49  ;;  %v7951_v13 = vadd.f32 %v7950_v27, %v7922_v9  ;;  %v7864_v38 = vsub.f32 %v13061_v61, %v13100_v18  ;;  %v7925_v50 = vmul.f32 %v7861_v34, %v7861_v34 }
 0x3e6   : > { %v7818_v28 = vsel %vm7806_vm0, %v13105_v10, 0.0  ;;  %vm7846_vm1 = vcmp.lt.s32.totalorder %v13146_v8, 49  ;;  %v7939_v11 = vadd.f32 %v7938_v36, %v7924_v16  ;;  %v7867_v21 = vsub.f32 %v13072_v5, %v13100_v18 }
 0x3e7   : > { %v7817_v42 = vadd.f32 %v7816_v40, %v7815_v51  ;;  %v7952_v52 = vadd.f32 %v7951_v13, %v7925_v50  ;;  %v7820_v19 = vsel %vm7806_vm0, %v13137_v7, 0.0  ;;  %v7927_v29 = vmul.f32 %v7863_v58, %v7863_v58 }
 0x3e8   : > { %v7906_v55 = vsel %vm7846_vm1, %v7866_v47, 0.0  ;;  %v7928_v1 = vmul.f32 %v7864_v38, %v7864_v38  ;;  %v7907_v43 = vsel %vm7846_vm1, %v7867_v21, 0.0 }
 0x3e9   : > { %v7819_v59 = vadd.f32 %v7818_v28, %v7817_v42  ;;  %v7940_v46 = vadd.f32 %v7939_v11, %v7927_v29  ;;  %v7930_v57 = vmul.f32 %v7906_v55, %v7906_v55  ;;  %v7931_v45 = vmul.f32 %v7907_v43, %v7907_v43 }
 0x3ea   : > { %v7953_v32 = vadd.f32 %v7952_v52, %v7928_v1 }
 0x3eb   : > { %v7821_v30 = vadd.f32 %v7820_v19, %v7819_v59  ;;  %v7941_v2 = vadd.f32 %v7940_v46, %v7930_v57 }
 0x3ec   : > { %v7954_v44 = vadd.f32 %v7953_v32, %v7931_v45 }
 0x3ed   : > { %v7822_v25 = vrot.slane %v7821_v30, 4  ;;  %v7943_v14 = vrot.slane %v7941_v2, 4 }
 0x3ee   : > { %v7956_v34 = vrot.slane %v7954_v44, 4 }
 0x3ef   : > { %v7823_v4 = vadd.f32 %v7822_v25, %v7821_v30  ;;  %v7944_v31 = vadd.f32 %v7943_v14, %v7941_v2 }
 0x3f0   : > { %v7957_v51 = vadd.f32 %v7956_v34, %v7954_v44 }
 0x3f1   : > { %v7824_v27 = vrot.slane %v7823_v4, 2  ;;  %v7945_v42 = vrot.slane %v7944_v31, 2 }
 0x3f2   : > { %v7958_v28 = vrot.slane %v7957_v51, 2 }
 0x3f3   : > { %v7825_v54 = vadd.f32 %v7824_v27, %v7823_v4  ;;  %v7946_v29 = vadd.f32 %v7945_v42, %v7944_v31 }
 0x3f4   : > { %v7959_v1 = vadd.f32 %v7958_v28, %v7957_v51 }
 0x3f5   : > { %v7826_v49 = vrot.slane %v7825_v54, 1  ;;  %v7947_v4 = vrot.slane %v7946_v29, 1 }
 0x3f6   : > { %v7960_v2 = vrot.slane %v7959_v1, 1 }
 0x3f7   : > { %v7827_v9 = vadd.f32 %v7826_v49, %v7825_v54  ;;  %v7948_v14 = vadd.f32 %v7947_v4, %v7946_v29  ;;  %v8006_v4 = vsub.s32 2, %v13132_v60 }
 0x3f9   : > { %v13167_v36 = vmul.f32 0.020408163, %v7827_v9  ;;  %v7961_v9 = vadd.f32 %v7960_v2, %v7959_v1  ;;  %v7983_v51 = vmul.f32 0.020408163, %v7948_v14 }
 0x3fb   : > { %v7850_v13 = vsub.f32 %v13089_v26, %v13167_v36  ;;  %v7853_v40 = vsub.f32 %v13094_v0, %v13167_v36  ;;  %v7856_v58 = vsub.f32 %v13103_v56, %v13167_v36  ;;  %v7859_v16 = vsub.f32 %v13130_v23, %v13167_v36 }
 0x3fc   : > { %v7862_v11 = vsub.f32 %v13091_v24, %v13167_v36  ;;  %v7865_v30 = vsub.f32 %v13096_v33, %v13167_v36  ;;  %v7868_v46 = vsub.f32 %v13105_v10, %v13167_v36  ;;  %v7989_v42 = vadd.f32 0.001, %v7983_v51 }
 0x3fd   : > { %v7914_v47 = vmul.f32 %v7850_v13, %v7850_v13  ;;  %v7917_v38 = vmul.f32 %v7853_v40, %v7853_v40  ;;  %v7920_v50 = vmul.f32 %v7856_v58, %v7856_v58  ;;  %v7923_v21 = vmul.f32 %v7859_v16, %v7859_v16 }
 0x3fe   : > { %v7926_v25 = vmul.f32 %v7862_v11, %v7862_v11  ;;  %v7929_v45 = vmul.f32 %v7865_v30, %v7865_v30  ;;  %v7908_v27 = vsel %vm7846_vm1, %v7868_v46, 0.0  ;;  %v7984_v40 = vmul.f32 0.020408163, %v7961_v9 }
 0x3ff   : > { %v7962_v59 = vsel %vm7806_vm0, %v7914_v47, 0.0  ;;  %v7963_v52 = vsel %vm7806_vm0, %v7917_v38, 0.0  ;;  %v7965_v55 = vsel %vm7806_vm0, %v7920_v50, 0.0  ;;  %v7967_v32 = vsel %vm7806_vm0, %v7923_v21, 0.0 }
 0x400   : > { %v7964_v19 = vadd.f32 %v7963_v52, %v7962_v59  ;;  %v7969_v44 = vsel %vm7806_vm0, %v7926_v25, 0.0  ;;  %v7932_v49 = vmul.f32 %v7908_v27, %v7908_v27  ;;  %v7971_v34 = vsel %vm7806_vm0, %v7929_v45, 0.0  ;;  %v7986_v52 = vld [vmem:[%s13196_s6] ss:$2 sm:$0x7] }
 0x401   : > { %v7990_v47 = vadd.f32 0.001, %v7984_v40  ;;  %11109 = vrsqrt.f32 %v7989_v42  ;;  %v7998_v21 = vsub.s32 0, %v13132_v60  ;;  %v8002_v59 = vsub.s32 1, %v13132_v60 }
 0x402   : > { %v7966_v43 = vadd.f32 %v7965_v55, %v7964_v19  ;;  %v7973_v13 = vsel %vm7806_vm0, %v7932_v49, 0.0 }
 0x403   : > { %11111 = vrsqrt.f32 %v7990_v47  ;;  %v7999_v55 = vrot.slane %v7986_v52, %v7998_v21  ;;  %v8003_v1 = vrot.slane %v7986_v52, %v8002_v59 }
 0x404   : > { %v7968_v57 = vadd.f32 %v7967_v32, %v7966_v43  ;;  %v11276_v32 = vmov 1966171168  }
 0x406   : > { %v7970_v54 = vadd.f32 %v7969_v44, %v7968_v57  ;;  %v8022_v57 = vunpack.c.l.s4 %v11276_v32  ;;  %v8007_v44 = vrot.slane %v7986_v52, %v8006_v4 }
 0x408   : > { %v7972_v31 = vadd.f32 %v7971_v34, %v7970_v54  ;;  %v8023_v27 = vunpack.c.0.s8 %v8022_v57 }
 0x40a   : > { %v7974_v58 = vadd.f32 %v7973_v13, %v7972_v31  ;;  %v8026_v49 = vsub.s32 %v8023_v27, %v13132_v60 }
 0x40b   : > { %v11110_v30 = vpop.eup %11109 }
 0x40c   : > { %v7977_v16 = vrot.slane %v7974_v58, 4  ;;  %v8011_v43 = vmul.f32 %v11110_v30, %v7999_v55 }
 0x40d   : > { %v11112_v46 = vpop.eup %11111 }
 0x40e   : > { %v7978_v8 = vadd.f32 %v7977_v16, %v7974_v58  ;;  %v8012_v25 = vmul.f32 %v11112_v46, %v8003_v1  ;;  %v8014_v45 = vmul.f32 %v8011_v43, %v13098_v17  ;;  %v8048_v9 = vrot.slane %v8011_v43, %v7998_v21  ;;  %v9079_v16 = vld [vmem:[%s13196_s6 + $0x1] ss:$2 sm:$0x7] }
 0x410   : > { %v7979_v38 = vrot.slane %v7978_v8, 2  ;;  %v8015_v2 = vmul.f32 %v8012_v25, %v13100_v18  ;;  %v8052_v40 = vrot.slane %v8012_v25, %v7998_v21  ;;  %v8057_v17 = vmul.f32 %v13012_v39, %v8048_v9 }
 0x411   : > { %v8060_v18 = vmul.f32 %v13018_v63, %v8048_v9  ;;  %v8063_v42 = vmul.f32 %v13028_v35, %v8048_v9  ;;  %v8066_v47 = vmul.f32 %v13034_v53, %v8048_v9  ;;  %v8069_v60 = vmul.f32 %v13050_v22, %v8048_v9 }
 0x412   : > { %v7980_v50 = vadd.f32 %v7979_v38, %v7978_v8  ;;  %v8020_v14 = vcombine.low %v8014_v45, %v8015_v2  ;;  %v8075_v38 = vmul.f32 %v13068_v20, %v8048_v9  ;;  %v8058_v63 = vmul.f32 %v13015_v3, %v8052_v40 }
 0x413   : > { %v8064_v35 = vmul.f32 %v13031_v37, %v8052_v40  ;;  %v8067_v53 = vmul.f32 %v13039_v41, %v8052_v40  ;;  %v8070_v22 = vmul.f32 %v13053_v12, %v8052_v40  ;;  %v8076_v20 = vmul.f32 %v13072_v5, %v8052_v40 }
 0x414   : > { %v7981_v28 = vrot.slane %v7980_v50, 1  ;;  %v8027_v51 = vrot.slane %v8020_v14, %v8026_v49 }
 0x416   : > { %v7982_v11 = vadd.f32 %v7981_v28, %v7980_v50  ;;  %v8078_v50 = vmul.f32 %v13075_v62, %v8048_v9  ;;  %v8061_v28 = vmul.f32 %v13023_v6, %v8052_v40  ;;  %v8079_v62 = vmul.f32 %v13080_v15, %v8052_v40 }
 0x418   : > { %v7985_v19 = vmul.f32 0.020408163, %v7982_v11 }
 0x41a   : > { %v7991_v29 = vadd.f32 0.001, %v7985_v19 }
 0x41c   : > { %11113 = vrsqrt.f32 %v7991_v29 }
 0x426   : > { %v11114_v54 = vpop.eup %11113 }
 0x427   : > { %v8013_v34 = vmul.f32 %v11114_v54, %v8007_v44 }
 0x429   : > { %v8016_v31 = vmul.f32 %v8013_v34, %v13167_v36  ;;  %v8056_v8 = vrot.slane %v8013_v34, %v7998_v21  ;;  %v8072_v36 = vmul.f32 %v13057_v48, %v8048_v9  ;;  %v8073_v48 = vmul.f32 %v13061_v61, %v8052_v40 }
 0x42b   : > { %v8034_v13 = vrot.slane %v8016_v31, %v8026_v49  ;;  %v8059_v52 = vmul.f32 %v8056_v8, %v13089_v26  ;;  %v8062_v3 = vmul.f32 %v8056_v8, %v13094_v0  ;;  %v8065_v6 = vmul.f32 %v8056_v8, %v13103_v56 }
 0x42c   : > { %v8068_v37 = vmul.f32 %v8056_v8, %v13130_v23  ;;  %v8071_v61 = vmul.f32 %v8056_v8, %v13091_v24  ;;  %v8074_v5 = vmul.f32 %v8056_v8, %v13096_v33  ;;  %v8077_v29 = vmul.f32 %v8056_v8, %v13105_v10 }
 0x42d   : > { %v8035_v58 = vcombine.low %v8027_v51, %v8034_v13  ;;  %v8080_v15 = vmul.f32 %v8056_v8, %v13137_v7 }
 0x42f   : > { %v8042_v39 = vrot.slane %v8035_v58, %v8026_v49 }
 0x431   : > { %v8044_v11 = vsub.f32 %v9079_v16, %v8042_v39 }
 0x433   : > { %v8085_v19 = vrot.slane %v8044_v11, %v7998_v21  ;;  %v8089_v41 = vrot.slane %v8044_v11, %v8002_v59  ;;  %v8093_v12 = vrot.slane %v8044_v11, %v8006_v4 }
 0x435   : > { %v8097_v30 = vadd.f32 %v8085_v19, %v8057_v17  ;;  %v8098_v26 = vadd.f32 %v8089_v41, %v8058_v63  ;;  %v8099_v55 = vadd.f32 %v8093_v12, %v8059_v52  ;;  %v8100_v0 = vadd.f32 %v8085_v19, %v8060_v18 }
 0x436   : > { %v8101_v56 = vadd.f32 %v8089_v41, %v8061_v28  ;;  %v8102_v1 = vadd.f32 %v8093_v12, %v8062_v3  ;;  %v8103_v23 = vadd.f32 %v8085_v19, %v8063_v42  ;;  %v8104_v21 = vadd.f32 %v8089_v41, %v8064_v35 }
 0x437   : > { %v8105_v24 = vadd.f32 %v8093_v12, %v8065_v6  ;;  %v8106_v33 = vadd.f32 %v8085_v19, %v8066_v47  ;;  %v8107_v10 = vadd.f32 %v8089_v41, %v8067_v53  ;;  %v8108_v7 = vadd.f32 %v8093_v12, %v8068_v37  ;;  %8121 = vst [vmem:[%s13238_s9] sm:$0xff] %v8097_v30 }
 0x438   : > { %8122 = vst [vmem:[%s13238_s9 + $0x8] sm:$0xff] %v8098_v26  ;;  %8123 = vst.msk [vmem:[%s13238_s9 + $0x10] sm:$0xff] %vm7806_vm0, %v8099_v55  ;;  %v8109_v59 = vadd.f32 %v8085_v19, %v8069_v60  ;;  %v8110_v46 = vadd.f32 %v8089_v41, %v8070_v22  ;;  %v8111_v43 = vadd.f32 %v8093_v12, %v8071_v61 }
 0x439   : > { %8124 = vst [vmem:[%s13238_s9 + $0x18] sm:$0xff] %v8100_v0  ;;  %v8112_v25 = vadd.f32 %v8085_v19, %v8072_v36  ;;  %8125 = vst [vmem:[%s13238_s9 + $0x20] sm:$0xff] %v8101_v56  ;;  %v8113_v32 = vadd.f32 %v8089_v41, %v8073_v48  ;;  %v8114_v57 = vadd.f32 %v8093_v12, %v8074_v5 }
 0x43a   : > { %8126 = vst.msk [vmem:[%s13238_s9 + $0x28] sm:$0xff] %vm7806_vm0, %v8102_v1  ;;  %8127 = vst [vmem:[%s13238_s9 + $0x30] sm:$0xff] %v8103_v23  ;;  %v8115_v4 = vadd.f32 %v8085_v19, %v8075_v38  ;;  %v8116_v45 = vadd.f32 %v8089_v41, %v8076_v20  ;;  %v8117_v2 = vadd.f32 %v8093_v12, %v8077_v29 }
 0x43b   : > { %8128 = vst [vmem:[%s13238_s9 + $0x38] sm:$0xff] %v8104_v21  ;;  %8129 = vst.msk [vmem:[%s13238_s9 + $0x40] sm:$0xff] %vm7806_vm0, %v8105_v24  ;;  %v8118_v27 = vadd.f32 %v8085_v19, %v8078_v50  ;;  %v8119_v44 = vadd.f32 %v8089_v41, %v8079_v62  ;;  %v8120_v54 = vadd.f32 %v8093_v12, %v8080_v15 }
 0x43c   : > { %8130 = vst [vmem:[%s13238_s9 + $0x48] sm:$0xff] %v8106_v33  ;;  %8131 = vst [vmem:[%s13238_s9 + $0x50] sm:$0xff] %v8107_v10 }
 0x43d   : > { %8132 = vst.msk [vmem:[%s13238_s9 + $0x58] sm:$0xff] %vm7806_vm0, %v8108_v7  ;;  %8133 = vst [vmem:[%s13238_s9 + $0x60] sm:$0xff] %v8109_v59 }
 0x43e   : > { %8134 = vst [vmem:[%s13238_s9 + $0x68] sm:$0xff] %v8110_v46  ;;  %8135 = vst.msk [vmem:[%s13238_s9 + $0x70] sm:$0xff] %vm7806_vm0, %v8111_v43 }
 0x43f   : > { %8136 = vst [vmem:[%s13238_s9 + $0x78] sm:$0xff] %v8112_v25  ;;  %8137 = vst [vmem:[%s13238_s9 + $0x80] sm:$0xff] %v8113_v32 }
 0x440   : > { %8138 = vst.msk [vmem:[%s13238_s9 + $0x88] sm:$0xff] %vm7806_vm0, %v8114_v57  ;;  %8139 = vst [vmem:[%s13238_s9 + $0x90] sm:$0xff] %v8115_v4 }
 0x441   : > { %8140 = vst [vmem:[%s13238_s9 + $0x98] sm:$0xff] %v8116_v45  ;;  %8141 = vst.msk [vmem:[%s13238_s9 + $0xa0] sm:$0xff] %vm7806_vm0, %v8117_v2 }
 0x442   : > { %8142 = vst [vmem:[%s13238_s9 + $0xa8] sm:$0xff] %v8118_v27  ;;  %8143 = vst [vmem:[%s13238_s9 + $0xb0] sm:$0xff] %v8119_v44 }
 0x443   : > { %8144 = vst.msk [vmem:[%s13238_s9 + $0xb8] sm:$0xff] %vm7806_vm0, %v8120_v54 }
 0x444   : > { %11225 = shalt.err (!%p11222_p3)
}
 0x445   : > { %s11226_s28 = scalar_lea.hbm %s13262_s19, 3072  ;;  %s11230_s30 = scalar_lea.hbm %s13328_s3, 6144 }
 0x446   : > { %p11227_p4 = scmp.ne.s32.totalorder %s13262_s19, %s11226_s28  ;;  %p11231_p9 = scmp.lt.u32.totalorder %s13262_s19, %s13328_s3 }
 0x447   : > { %p11232_p10 = scmp.lt.u32.totalorder %s11230_s30, %s11226_s28  ;;  %p11234_p12 = scmp.lt.u32.totalorder %s11226_s28, %s13262_s19 }
 0x448   : > { %p11228_p7 = pnand %p11227_p4, %p11338_p5 }
 0x449   : > { %p11233_p11 = por %p11232_p10, %p11231_p9 }
 0x44a   : > { %p11229_p8 = pneg %p11228_p7 }
 0x44b   : > { %p11235_p13 = por %p11234_p12, %p11233_p11 }
 0x44d   : > { %p11236_p0 = pnand %p11235_p13, %p11229_p8 }
 0x44f   : > { %11239 = shalt.err (!%p11236_p0)
}
 0x450   : > { %s11278_s26 = smov 384   ;;  %s11279_s7 = smov 24  }
 0x451   : > { %9927 = dma.vmem_to_hbm [thread:$0]  (%p11338_p5), %s13264_s10, 3072, %s13262_s19, %s13284_s16, %s11278_s26, %s11278_s26, %s11279_s7  }
 0x452 PF: > { %p9933_p1 = scmp.ge.s32.totalorder %s11274_s15, 2  ;;  %s8174_s8 = sand.u32 1, %s11262_s12  }
 0x453   : > { %s8175_s9 = scalar_lea.sflag [#allocation3], %s8174_s8 }
 0x454   : > { %p9930_p2 = pnand %p9933_p1, %p11342_p6 }
 0x456   : > { %11257 = dma.done.wait (!%p9930_p2), %s8175_s9, 3072  }
 0x457   : > { %11259 = vsyncadd (!%p9930_p2), %s8175_s9, 4294964224  ;;  %p13_p3 = scmp.ge.s32.totalorder %s11325_s18, 4   ;;  %s13331_s12 = smov %s11266_s13 }
 0x458   : > { %s13332_s13 = smov %s11270_s14  ;;  %s13333_s14 = smov %s11336_s21 }
 0x459   : > { %s13334_s15 = smov %s11325_s18  ;;  %15 = sbr.rel (!%p13_p3) target bundleno = 3 (0x3), region = 71 }
 0x460   :  { %8180 = vsyncpa [#allocation3], 1 }
 0x461   :  { %8182 = vsyncpa [#allocation3 + $0x1], 1 }

</bundles_post_ra>
